<compile_context>
chip_gen: v7x
topology: tpu7x:2x2x1
jax: 0.10.0
libtpu: 0.0.40
codegen_flags: <defaults>
</compile_context>

<pallas_src>
import math

import jax
import jax.numpy as jnp
from jax.experimental import pallas as pl
from jax.experimental.pallas import tpu as pltpu


_W_ROW_ALIGN = 16   # bf16 sublane tile: every weight block starts tile-aligned
_V_ROW_ALIGN = 8    # f32 sublane tile: every bias / pool row starts tile-aligned


# ------------------------------------------------------------------ kernel ---

def _build_fused_gin_stack_kernel(plan, eps):
    """Builds one fused kernel for the whole stacked-GIN forward pass."""
    eps = float(eps)

    def kernel(feat_ref, a_ref, w_ref, b_ref, pw_ref, out_ref):

        def aggregate(z):
            # (1 + eps) * z + A_blockdiag @ z  (== per-graph A @ z_g).
            # The A matmul feeds the MXU bf16 operands; accumulate in f32.
            az = jnp.dot(a_ref[...], z.astype(jnp.bfloat16),
                         preferred_element_type=jnp.float32)
            if eps == 0.0:
                return z + az
            return jnp.float32(1.0 + eps) * z + az

        def part_operand(p):
            # Features stay behind their ref (loaded at use, already bf16);
            # computed activations are f32 values cast at the dot.
            return feat_ref[...] if p is None else p.astype(jnp.bfloat16)

        # Activation kept as column blocks, newest first: [x_{s-1},...,x_0,feat]
        parts = [None]
        for st in plan["stacks"]:
            skip = parts                       # "tmp" in the reference module
            x = None
            n_layers = len(st)
            for li, layer in enumerate(st):
                d_out = layer["d_out"]
                if li == 0:
                    # z = (virtual concat of parts) @ W0  ==  sum_p p @ W0_p
                    z = None
                    for p, (off, d_in, _do) in zip(parts, layer["blocks"]):
                        c = jnp.dot(part_operand(p),
                                    w_ref[off:off + d_in, :d_out],
                                    preferred_element_type=jnp.float32)
                        z = c if z is None else z + c
                else:
                    (off, d_in, _do), = layer["blocks"]
                    z = jnp.dot(x.astype(jnp.bfloat16),
                                w_ref[off:off + d_in, :d_out],
                                preferred_element_type=jnp.float32)
                # Aggregate AFTER the weight contraction (exact by linearity):
                # aggregate(h) @ W == aggregate(h @ W).
                br = layer["bias_row"]
                x = aggregate(z) + b_ref[br:br + 1, :d_out]
                if li < n_layers - 1:
                    x = jnp.maximum(x, 0.0)
            parts = [x] + skip                 # == concat([gin_out, tmp], -1)

        # ---- pooling on VPU/XLU (broadcast-multiply + lane reduce) ----------
        pooled = None
        for p, (row, d) in zip(parts, plan["pool"]):
            v = feat_ref[...].astype(jnp.float32) if p is None else p
            s = jnp.sum(v * pw_ref[row:row + 1, :d], axis=-1, keepdims=True)
            pooled = s if pooled is None else pooled + s
        out_ref[...] = pooled.astype(out_ref.dtype)

    return kernel


# ---------------------------------------------------- host-side param packs ---

def _build_plan_and_packs(params, pool_weight, in_dim, average):
    """Packs all parameters into 3 buffers + a static slicing plan.

    w_pack : (rows, wcols) bf16 — every weight block at a 16-aligned row offset.
    b_pack : (8*n_layers, wcols) f32 — bias i at row 8*i.
    p_pack : (8*n_parts, pcols) f32 — pool-weight rows per final concat block
             (all-ones when average=True, since sum(x,-1) == ones-pooling).
    """
    wcols = max(W.shape[1] for layers in params for (W, _) in layers)

    w_blocks, b_rows, plan_stacks = [], [], []
    w_off = 0

    def add_w_block(blk):
        nonlocal w_off
        d_in, d_out = blk.shape
        off = w_off
        pad_r = (-d_in) % _W_ROW_ALIGN
        w_blocks.append(jnp.pad(blk, ((0, pad_r), (0, wcols - d_out))))
        w_off += d_in + pad_r
        return (off, d_in, d_out)

    part_dims = [in_dim]
    for layers in params:
        st = []
        for li, (W, b) in enumerate(layers):
            d_in, d_out = W.shape
            if li == 0:
                assert d_in == sum(part_dims)
                blocks, r = [], 0
                for d in part_dims:           # split rows per skip block
                    blocks.append(add_w_block(W[r:r + d, :]))
                    r += d
            else:
                blocks = [add_w_block(W)]
            bias_row = len(b_rows) * _V_ROW_ALIGN
            b_rows.append(jnp.pad(b.reshape(1, d_out),
                                  ((0, _V_ROW_ALIGN - 1), (0, wcols - d_out))))
            st.append(dict(blocks=blocks, bias_row=bias_row, d_out=d_out))
        plan_stacks.append(st)
        part_dims = [layers[-1][0].shape[1]] + part_dims

    final = sum(part_dims)
    pcols = max(part_dims)
    pw_full = (jnp.ones((final, 1), jnp.float32) if average
               else pool_weight.astype(jnp.float32))
    p_rows, pool_plan, r = [], [], 0
    for d in part_dims:
        row = len(p_rows) * _V_ROW_ALIGN
        seg = pw_full[r:r + d, 0].reshape(1, d)
        p_rows.append(jnp.pad(seg, ((0, _V_ROW_ALIGN - 1), (0, pcols - d))))
        pool_plan.append((row, d))
        r += d

    w_pack = jnp.concatenate(w_blocks, axis=0).astype(jnp.bfloat16)
    b_pack = jnp.concatenate(b_rows, axis=0).astype(jnp.float32)
    p_pack = jnp.concatenate(p_rows, axis=0).astype(jnp.float32)
    plan = dict(stacks=plan_stacks, pool=pool_plan)
    return plan, w_pack, b_pack, p_pack


# ----------------------------------------------------------------- wrapper ---

def gin_stack_forward(features, A, params, pool_weight, eps, average=False):
    """features: (B, T, N, in_dim), A: (N, N) -> (B, T, N) pooled output."""
    B, T, N, in_dim = features.shape
    R = B * T * N

    feat2d = features.reshape(R, in_dim).astype(jnp.bfloat16)
    # Block-diagonal adjacency in bf16: one lane-dense matmul aggregates all
    # B*T graphs at once.  Quadratic in B*T*N — replace with per-graph
    # aggregation / a B*T grid before scaling shapes (v7x: 64 MiB VMEM).
    a_big = jnp.kron(jnp.eye(B * T, dtype=jnp.float32),
                     A.astype(jnp.float32)).astype(jnp.bfloat16)

    plan, w_pack, b_pack, p_pack = _build_plan_and_packs(
        params, pool_weight, in_dim, average)

    kernel = _build_fused_gin_stack_kernel(plan, eps)
    vmem = pl.BlockSpec(memory_space=pltpu.MemorySpace.VMEM)
    pooled = pl.pallas_call(
        kernel,
        out_shape=jax.ShapeDtypeStruct((R, 1), jnp.float32),
        in_specs=[vmem] * 5,
        out_specs=vmem,
    )(feat2d, a_big, w_pack, b_pack, p_pack)
    return pooled.reshape(B, T, N)


# --------------------------------------------------------- parameter set-up ---

def _xavier_uniform(key, shape):
    fan_in, fan_out = shape[0], shape[1]
    limit = math.sqrt(6.0 / (fan_in + fan_out))
    return jax.random.uniform(key, shape, jnp.float32, -limit, limit)


def make_gin_stack_params(key, in_dim, num_layers, gin_hidden_dim, out_dim,
                          num_stacks=3, average=False):
    """Replicates GIN_stack.__init__ dimension bookkeeping; returns params."""
    stack_in_dims = [in_dim]
    stack_out_dims = []
    use_first_n_last = out_dim != 0
    first, last = in_dim, out_dim
    cur_out_dim = out_dim
    final = None
    stack_out_dims.append(cur_out_dim if cur_out_dim != 0 else in_dim)
    for i in range(1, num_stacks):
        if cur_out_dim == 0 and (not use_first_n_last):
            stack_in_dim = (2 ** i) * in_dim
            if i == num_stacks - 1:
                final = 2 * stack_in_dim
        else:
            stack_in_dim = first + last
            first = stack_in_dim
            last = stack_in_dim
            cur_out_dim = 0
            if i == num_stacks - 1:
                final = first + last
        stack_in_dims.append(stack_in_dim)
        stack_out_dims.append(stack_in_dim)   # out_dim == 0 -> out dim = in dim

    params = []
    for s in range(num_stacks):
        din, dout = stack_in_dims[s], stack_out_dims[s]
        layer_dims = [din] + [gin_hidden_dim] * (num_layers - 1) + [dout]
        layers = []
        for li in range(num_layers):
            key, kw, kb = jax.random.split(key, 3)
            W = _xavier_uniform(kw, (layer_dims[li], layer_dims[li + 1]))
            b = jax.random.uniform(kb, (1, layer_dims[li + 1]), jnp.float32,
                                   -0.05, 0.05)
            layers.append((W, b))
        params.append(layers)

    pool_weight = None
    if not average:
        key, kp = jax.random.split(key)
        pool_weight = _xavier_uniform(kp, (final, 1))
    return params, pool_weight, final


# ---------------------------------------------------------------- reference ---

def gin_stack_reference(features, A, params, pool_weight, eps, average=False):
    """Pure-JAX f32 reference of the same math (for a correctness check)."""
    hi = jax.lax.Precision.HIGHEST
    out = features.astype(jnp.float32)
    A = A.astype(jnp.float32)
    for stack_layers in params:
        tmp = out
        h = out
        L = len(stack_layers)
        for li, (W, b) in enumerate(stack_layers):
            agg = (1.0 + eps) * h + jnp.einsum("nm,btmd->btnd", A, h,
                                               precision=hi)
            h = jnp.einsum("btnd,de->btne", agg, W, precision=hi) + b
            if li < L - 1:
                h = jnp.maximum(h, 0.0)
        out = jnp.concatenate([h, tmp], axis=-1)
    if not average:
        return jnp.einsum("btnf,fo->btno", out, pool_weight,
                          precision=hi)[..., 0]
    return jnp.sum(out, axis=-1)


# --------------------------------------------------------------------- main ---

if __name__ == "__main__":
    # small shapes: batch=2, time=8, num_nodes=16, in_dim=4
    B, T, N, in_dim = 2, 8, 16, 4
    num_layers, gin_hidden_dim, out_dim, eps, num_stacks = 2, 32, 8, 0.0, 3

    key = jax.random.PRNGKey(0)
    k_feat, k_adj, k_par = jax.random.split(key, 3)

    features = jax.random.normal(k_feat, (B, T, N, in_dim), jnp.float32)
    A = jax.random.uniform(k_adj, (N, N), jnp.float32)
    A = (A + A.T) * 0.5                                # symmetric adjacency

    params, pool_weight, final_dim = make_gin_stack_params(
        k_par, in_dim, num_layers, gin_hidden_dim, out_dim,
        num_stacks=num_stacks, average=False)

    result = gin_stack_forward(features, A, params, pool_weight, eps,
                               average=False)
    jax.block_until_ready(result)
    assert result.shape == (B, T, N), result.shape

    # numeric check against the pure-f32 JAX reference of the same math.
    # The kernel feeds the MXU bf16 operands (f32 accumulation), so allow a
    # bf16-sized tolerance; real bugs show up as O(1) relative error.
    ref = gin_stack_reference(features, A, params, pool_weight, eps,
                              average=False)
    rel_err = float(jnp.max(jnp.abs(result - ref)) /
                    (jnp.max(jnp.abs(ref)) + 1e-6))
    assert rel_err < 5e-2, f"max relative error {rel_err}"

    print("KERNEL_OK")
</pallas_src>

<mosaic_0001>
module attributes {stable_mosaic.version = 11 : i64} {
  func.func @kernel(%arg0: memref<256x4xbf16, #tpu.memory_space<vmem>>, %arg1: memref<256x256xbf16, #tpu.memory_space<vmem>>, %arg2: memref<192x32xbf16, #tpu.memory_space<vmem>>, %arg3: memref<48x32xf32, #tpu.memory_space<vmem>>, %arg4: memref<32x24xf32, #tpu.memory_space<vmem>>, %arg5: memref<256x1xf32, #tpu.memory_space<vmem>>) attributes {dimension_semantics = [], scalar_prefetch = 0 : i64, scratch_operands = 0 : i64, tpu.core_type = #tpu.core_type<tc>} {
    %c0 = arith.constant 0 : index
    %c0_0 = arith.constant 0 : index
    %0 = vector.load %arg0[%c0, %c0_0] : memref<256x4xbf16, #tpu.memory_space<vmem>>, vector<256x4xbf16>
    %c0_1 = arith.constant 0 : index
    %c0_2 = arith.constant 0 : index
    %1 = vector.load %arg2[%c0_1, %c0_2] : memref<192x32xbf16, #tpu.memory_space<vmem>>, vector<4x32xbf16>
    %cst = arith.constant dense<0.000000e+00> : vector<256x32xf32>
    %2 = tpu.matmul %0, %1, %cst {dimension_numbers = #tpu.dot_dimension_numbers<[1], [0], [0], [1], [0, 0, 1, 1], [], []>} : vector<256x4xbf16>, vector<4x32xbf16>, vector<256x32xf32> -> vector<256x32xf32>
    %c0_3 = arith.constant 0 : index
    %c0_4 = arith.constant 0 : index
    %3 = vector.load %arg1[%c0_3, %c0_4] : memref<256x256xbf16, #tpu.memory_space<vmem>>, vector<256x256xbf16>
    %4 = arith.truncf %2 : vector<256x32xf32> to vector<256x32xbf16>
    %cst_5 = arith.constant dense<0.000000e+00> : vector<256x32xf32>
    %5 = tpu.matmul %3, %4, %cst_5 {dimension_numbers = #tpu.dot_dimension_numbers<[1], [0], [0], [1], [0, 0, 1, 1], [], []>} : vector<256x256xbf16>, vector<256x32xbf16>, vector<256x32xf32> -> vector<256x32xf32>
    %6 = arith.addf %2, %5 : vector<256x32xf32>
    %c0_6 = arith.constant 0 : index
    %c0_7 = arith.constant 0 : index
    %7 = vector.load %arg3[%c0_6, %c0_7] : memref<48x32xf32, #tpu.memory_space<vmem>>, vector<1x32xf32>
    %8 = vector.broadcast %7 : vector<1x32xf32> to vector<256x32xf32>
    %9 = arith.addf %6, %8 : vector<256x32xf32>
    %cst_8 = arith.constant 0.000000e+00 : f32
    %10 = vector.broadcast %cst_8 : f32 to vector<256x32xf32>
    %11 = arith.maximumf %9, %10 : vector<256x32xf32>
    %12 = arith.truncf %11 : vector<256x32xf32> to vector<256x32xbf16>
    %c16 = arith.constant 16 : index
    %c0_9 = arith.constant 0 : index
    %13 = vector.load %arg2[%c16, %c0_9] : memref<192x32xbf16, #tpu.memory_space<vmem>>, vector<32x8xbf16>
    %cst_10 = arith.constant dense<0.000000e+00> : vector<256x8xf32>
    %14 = tpu.matmul %12, %13, %cst_10 {dimension_numbers = #tpu.dot_dimension_numbers<[1], [0], [0], [1], [0, 0, 1, 1], [], []>} : vector<256x32xbf16>, vector<32x8xbf16>, vector<256x8xf32> -> vector<256x8xf32>
    %c0_11 = arith.constant 0 : index
    %c0_12 = arith.constant 0 : index
    %15 = vector.load %arg1[%c0_11, %c0_12] : memref<256x256xbf16, #tpu.memory_space<vmem>>, vector<256x256xbf16>
    %16 = arith.truncf %14 : vector<256x8xf32> to vector<256x8xbf16>
    %cst_13 = arith.constant dense<0.000000e+00> : vector<256x8xf32>
    %17 = tpu.matmul %15, %16, %cst_13 {dimension_numbers = #tpu.dot_dimension_numbers<[1], [0], [0], [1], [0, 0, 1, 1], [], []>} : vector<256x256xbf16>, vector<256x8xbf16>, vector<256x8xf32> -> vector<256x8xf32>
    %18 = arith.addf %14, %17 : vector<256x8xf32>
    %c8 = arith.constant 8 : index
    %c0_14 = arith.constant 0 : index
    %19 = vector.load %arg3[%c8, %c0_14] : memref<48x32xf32, #tpu.memory_space<vmem>>, vector<1x8xf32>
    %20 = vector.broadcast %19 : vector<1x8xf32> to vector<256x8xf32>
    %21 = arith.addf %18, %20 : vector<256x8xf32>
    %22 = arith.truncf %21 : vector<256x8xf32> to vector<256x8xbf16>
    %c48 = arith.constant 48 : index
    %c0_15 = arith.constant 0 : index
    %23 = vector.load %arg2[%c48, %c0_15] : memref<192x32xbf16, #tpu.memory_space<vmem>>, vector<8x32xbf16>
    %cst_16 = arith.constant dense<0.000000e+00> : vector<256x32xf32>
    %24 = tpu.matmul %22, %23, %cst_16 {dimension_numbers = #tpu.dot_dimension_numbers<[1], [0], [0], [1], [0, 0, 1, 1], [], []>} : vector<256x8xbf16>, vector<8x32xbf16>, vector<256x32xf32> -> vector<256x32xf32>
    %c0_17 = arith.constant 0 : index
    %c0_18 = arith.constant 0 : index
    %25 = vector.load %arg0[%c0_17, %c0_18] : memref<256x4xbf16, #tpu.memory_space<vmem>>, vector<256x4xbf16>
    %c64 = arith.constant 64 : index
    %c0_19 = arith.constant 0 : index
    %26 = vector.load %arg2[%c64, %c0_19] : memref<192x32xbf16, #tpu.memory_space<vmem>>, vector<4x32xbf16>
    %cst_20 = arith.constant dense<0.000000e+00> : vector<256x32xf32>
    %27 = tpu.matmul %25, %26, %cst_20 {dimension_numbers = #tpu.dot_dimension_numbers<[1], [0], [0], [1], [0, 0, 1, 1], [], []>} : vector<256x4xbf16>, vector<4x32xbf16>, vector<256x32xf32> -> vector<256x32xf32>
    %28 = arith.addf %24, %27 : vector<256x32xf32>
    %c0_21 = arith.constant 0 : index
    %c0_22 = arith.constant 0 : index
    %29 = vector.load %arg1[%c0_21, %c0_22] : memref<256x256xbf16, #tpu.memory_space<vmem>>, vector<256x256xbf16>
    %30 = arith.truncf %28 : vector<256x32xf32> to vector<256x32xbf16>
    %cst_23 = arith.constant dense<0.000000e+00> : vector<256x32xf32>
    %31 = tpu.matmul %29, %30, %cst_23 {dimension_numbers = #tpu.dot_dimension_numbers<[1], [0], [0], [1], [0, 0, 1, 1], [], []>} : vector<256x256xbf16>, vector<256x32xbf16>, vector<256x32xf32> -> vector<256x32xf32>
    %32 = arith.addf %28, %31 : vector<256x32xf32>
    %c16_24 = arith.constant 16 : index
    %c0_25 = arith.constant 0 : index
    %33 = vector.load %arg3[%c16_24, %c0_25] : memref<48x32xf32, #tpu.memory_space<vmem>>, vector<1x32xf32>
    %34 = vector.broadcast %33 : vector<1x32xf32> to vector<256x32xf32>
    %35 = arith.addf %32, %34 : vector<256x32xf32>
    %cst_26 = arith.constant 0.000000e+00 : f32
    %36 = vector.broadcast %cst_26 : f32 to vector<256x32xf32>
    %37 = arith.maximumf %35, %36 : vector<256x32xf32>
    %38 = arith.truncf %37 : vector<256x32xf32> to vector<256x32xbf16>
    %c80 = arith.constant 80 : index
    %c0_27 = arith.constant 0 : index
    %39 = vector.load %arg2[%c80, %c0_27] : memref<192x32xbf16, #tpu.memory_space<vmem>>, vector<32x12xbf16>
    %cst_28 = arith.constant dense<0.000000e+00> : vector<256x12xf32>
    %40 = tpu.matmul %38, %39, %cst_28 {dimension_numbers = #tpu.dot_dimension_numbers<[1], [0], [0], [1], [0, 0, 1, 1], [], []>} : vector<256x32xbf16>, vector<32x12xbf16>, vector<256x12xf32> -> vector<256x12xf32>
    %c0_29 = arith.constant 0 : index
    %c0_30 = arith.constant 0 : index
    %41 = vector.load %arg1[%c0_29, %c0_30] : memref<256x256xbf16, #tpu.memory_space<vmem>>, vector<256x256xbf16>
    %42 = arith.truncf %40 : vector<256x12xf32> to vector<256x12xbf16>
    %cst_31 = arith.constant dense<0.000000e+00> : vector<256x12xf32>
    %43 = tpu.matmul %41, %42, %cst_31 {dimension_numbers = #tpu.dot_dimension_numbers<[1], [0], [0], [1], [0, 0, 1, 1], [], []>} : vector<256x256xbf16>, vector<256x12xbf16>, vector<256x12xf32> -> vector<256x12xf32>
    %44 = arith.addf %40, %43 : vector<256x12xf32>
    %c24 = arith.constant 24 : index
    %c0_32 = arith.constant 0 : index
    %45 = vector.load %arg3[%c24, %c0_32] : memref<48x32xf32, #tpu.memory_space<vmem>>, vector<1x12xf32>
    %46 = vector.broadcast %45 : vector<1x12xf32> to vector<256x12xf32>
    %47 = arith.addf %44, %46 : vector<256x12xf32>
    %48 = arith.truncf %47 : vector<256x12xf32> to vector<256x12xbf16>
    %c112 = arith.constant 112 : index
    %c0_33 = arith.constant 0 : index
    %49 = vector.load %arg2[%c112, %c0_33] : memref<192x32xbf16, #tpu.memory_space<vmem>>, vector<12x32xbf16>
    %cst_34 = arith.constant dense<0.000000e+00> : vector<256x32xf32>
    %50 = tpu.matmul %48, %49, %cst_34 {dimension_numbers = #tpu.dot_dimension_numbers<[1], [0], [0], [1], [0, 0, 1, 1], [], []>} : vector<256x12xbf16>, vector<12x32xbf16>, vector<256x32xf32> -> vector<256x32xf32>
    %51 = arith.truncf %21 : vector<256x8xf32> to vector<256x8xbf16>
    %c128 = arith.constant 128 : index
    %c0_35 = arith.constant 0 : index
    %52 = vector.load %arg2[%c128, %c0_35] : memref<192x32xbf16, #tpu.memory_space<vmem>>, vector<8x32xbf16>
    %cst_36 = arith.constant dense<0.000000e+00> : vector<256x32xf32>
    %53 = tpu.matmul %51, %52, %cst_36 {dimension_numbers = #tpu.dot_dimension_numbers<[1], [0], [0], [1], [0, 0, 1, 1], [], []>} : vector<256x8xbf16>, vector<8x32xbf16>, vector<256x32xf32> -> vector<256x32xf32>
    %54 = arith.addf %50, %53 : vector<256x32xf32>
    %c0_37 = arith.constant 0 : index
    %c0_38 = arith.constant 0 : index
    %55 = vector.load %arg0[%c0_37, %c0_38] : memref<256x4xbf16, #tpu.memory_space<vmem>>, vector<256x4xbf16>
    %c144 = arith.constant 144 : index
    %c0_39 = arith.constant 0 : index
    %56 = vector.load %arg2[%c144, %c0_39] : memref<192x32xbf16, #tpu.memory_space<vmem>>, vector<4x32xbf16>
    %cst_40 = arith.constant dense<0.000000e+00> : vector<256x32xf32>
    %57 = tpu.matmul %55, %56, %cst_40 {dimension_numbers = #tpu.dot_dimension_numbers<[1], [0], [0], [1], [0, 0, 1, 1], [], []>} : vector<256x4xbf16>, vector<4x32xbf16>, vector<256x32xf32> -> vector<256x32xf32>
    %58 = arith.addf %54, %57 : vector<256x32xf32>
    %c0_41 = arith.constant 0 : index
    %c0_42 = arith.constant 0 : index
    %59 = vector.load %arg1[%c0_41, %c0_42] : memref<256x256xbf16, #tpu.memory_space<vmem>>, vector<256x256xbf16>
    %60 = arith.truncf %58 : vector<256x32xf32> to vector<256x32xbf16>
    %cst_43 = arith.constant dense<0.000000e+00> : vector<256x32xf32>
    %61 = tpu.matmul %59, %60, %cst_43 {dimension_numbers = #tpu.dot_dimension_numbers<[1], [0], [0], [1], [0, 0, 1, 1], [], []>} : vector<256x256xbf16>, vector<256x32xbf16>, vector<256x32xf32> -> vector<256x32xf32>
    %62 = arith.addf %58, %61 : vector<256x32xf32>
    %c32 = arith.constant 32 : index
    %c0_44 = arith.constant 0 : index
    %63 = vector.load %arg3[%c32, %c0_44] : memref<48x32xf32, #tpu.memory_space<vmem>>, vector<1x32xf32>
    %64 = vector.broadcast %63 : vector<1x32xf32> to vector<256x32xf32>
    %65 = arith.addf %62, %64 : vector<256x32xf32>
    %cst_45 = arith.constant 0.000000e+00 : f32
    %66 = vector.broadcast %cst_45 : f32 to vector<256x32xf32>
    %67 = arith.maximumf %65, %66 : vector<256x32xf32>
    %68 = arith.truncf %67 : vector<256x32xf32> to vector<256x32xbf16>
    %c160 = arith.constant 160 : index
    %c0_46 = arith.constant 0 : index
    %69 = vector.load %arg2[%c160, %c0_46] : memref<192x32xbf16, #tpu.memory_space<vmem>>, vector<32x24xbf16>
    %cst_47 = arith.constant dense<0.000000e+00> : vector<256x24xf32>
    %70 = tpu.matmul %68, %69, %cst_47 {dimension_numbers = #tpu.dot_dimension_numbers<[1], [0], [0], [1], [0, 0, 1, 1], [], []>} : vector<256x32xbf16>, vector<32x24xbf16>, vector<256x24xf32> -> vector<256x24xf32>
    %c0_48 = arith.constant 0 : index
    %c0_49 = arith.constant 0 : index
    %71 = vector.load %arg1[%c0_48, %c0_49] : memref<256x256xbf16, #tpu.memory_space<vmem>>, vector<256x256xbf16>
    %72 = arith.truncf %70 : vector<256x24xf32> to vector<256x24xbf16>
    %cst_50 = arith.constant dense<0.000000e+00> : vector<256x24xf32>
    %73 = tpu.matmul %71, %72, %cst_50 {dimension_numbers = #tpu.dot_dimension_numbers<[1], [0], [0], [1], [0, 0, 1, 1], [], []>} : vector<256x256xbf16>, vector<256x24xbf16>, vector<256x24xf32> -> vector<256x24xf32>
    %74 = arith.addf %70, %73 : vector<256x24xf32>
    %c40 = arith.constant 40 : index
    %c0_51 = arith.constant 0 : index
    %75 = vector.load %arg3[%c40, %c0_51] : memref<48x32xf32, #tpu.memory_space<vmem>>, vector<1x24xf32>
    %76 = vector.broadcast %75 : vector<1x24xf32> to vector<256x24xf32>
    %77 = arith.addf %74, %76 : vector<256x24xf32>
    %c0_52 = arith.constant 0 : index
    %c0_53 = arith.constant 0 : index
    %78 = vector.load %arg4[%c0_52, %c0_53] : memref<32x24xf32, #tpu.memory_space<vmem>>, vector<1x24xf32>
    %79 = vector.broadcast %78 : vector<1x24xf32> to vector<256x24xf32>
    %80 = arith.mulf %77, %79 : vector<256x24xf32>
    %cst_54 = arith.constant dense<0.000000e+00> : vector<256xf32>
    %81 = vector.multi_reduction <add>, %80, %cst_54 [1] : vector<256x24xf32> to vector<256xf32>
    %82 = vector.shape_cast %81 : vector<256xf32> to vector<256x1xf32>
    %c8_55 = arith.constant 8 : index
    %c0_56 = arith.constant 0 : index
    %83 = vector.load %arg4[%c8_55, %c0_56] : memref<32x24xf32, #tpu.memory_space<vmem>>, vector<1x12xf32>
    %84 = vector.broadcast %83 : vector<1x12xf32> to vector<256x12xf32>
    %85 = arith.mulf %47, %84 : vector<256x12xf32>
    %cst_57 = arith.constant dense<0.000000e+00> : vector<256xf32>
    %86 = vector.multi_reduction <add>, %85, %cst_57 [1] : vector<256x12xf32> to vector<256xf32>
    %87 = vector.shape_cast %86 : vector<256xf32> to vector<256x1xf32>
    %88 = arith.addf %82, %87 : vector<256x1xf32>
    %c16_58 = arith.constant 16 : index
    %c0_59 = arith.constant 0 : index
    %89 = vector.load %arg4[%c16_58, %c0_59] : memref<32x24xf32, #tpu.memory_space<vmem>>, vector<1x8xf32>
    %90 = vector.broadcast %89 : vector<1x8xf32> to vector<256x8xf32>
    %91 = arith.mulf %21, %90 : vector<256x8xf32>
    %cst_60 = arith.constant dense<0.000000e+00> : vector<256xf32>
    %92 = vector.multi_reduction <add>, %91, %cst_60 [1] : vector<256x8xf32> to vector<256xf32>
    %93 = vector.shape_cast %92 : vector<256xf32> to vector<256x1xf32>
    %94 = arith.addf %88, %93 : vector<256x1xf32>
    %c0_61 = arith.constant 0 : index
    %c0_62 = arith.constant 0 : index
    %95 = vector.load %arg0[%c0_61, %c0_62] : memref<256x4xbf16, #tpu.memory_space<vmem>>, vector<256x4xbf16>
    %96 = arith.extf %95 : vector<256x4xbf16> to vector<256x4xf32>
    %c24_63 = arith.constant 24 : index
    %c0_64 = arith.constant 0 : index
    %97 = vector.load %arg4[%c24_63, %c0_64] : memref<32x24xf32, #tpu.memory_space<vmem>>, vector<1x4xf32>
    %98 = vector.broadcast %97 : vector<1x4xf32> to vector<256x4xf32>
    %99 = arith.mulf %96, %98 : vector<256x4xf32>
    %cst_65 = arith.constant dense<0.000000e+00> : vector<256xf32>
    %100 = vector.multi_reduction <add>, %99, %cst_65 [1] : vector<256x4xf32> to vector<256xf32>
    %101 = vector.shape_cast %100 : vector<256xf32> to vector<256x1xf32>
    %102 = arith.addf %94, %101 : vector<256x1xf32>
    %c0_66 = arith.constant 0 : index
    %c0_67 = arith.constant 0 : index
    %103 = vector.load %arg5[%c0_66, %c0_67] : memref<256x1xf32, #tpu.memory_space<vmem>>, vector<256x1xf32>
    tpu.vector_store %arg5[%c0_66, %c0_67], %102 {strides = array<i32>} : memref<256x1xf32, #tpu.memory_space<vmem>>, vector<256x1xf32>,
    return
  }
}

</mosaic_0001>

<bundles_post_ra>
// kernel: tpu_custom_call.1
= control target key start
LH: loop header
LB: loop body
LE: loop exit
PB: predicated region body
PF: predicated region fallthrough
CT: control target
= control target key end

     0   :  { %vm183_vm0 = vcmask 1041408   ;;  %vm134_vm1 = vcmask 31744   ;;  %vm850_vm2 = vcmask 261120   ;;  %vm1537_vm3 = vcmask 1043456   ;;  %s8985_s2 = inlined_call_operand.vmem [shape: bf16[192,32], index: 2, kind: input, shape index: {}]   ;;  %s8986_s0 = inlined_call_operand.vmem [shape: bf16[256,4], index: 0, kind: input, shape index: {}]   ;;  %s8987_s1 = inlined_call_operand.vmem [shape: bf16[256,256], index: 1, kind: input, shape index: {}]   ;;  %s8988_s3 = inlined_call_operand.vmem [shape: f32[48,32], index: 3, kind: input, shape index: {}]   ;;  %s8989_s4 = inlined_call_operand.vmem [shape: f32[32,24], index: 4, kind: input, shape index: {}]   ;;  %s8990_s5 = inlined_call_operand.vmem [shape: f32[256,1], index: 5, kind: output, shape index: {}]  }
   0x1   :  { %v53_v0 = vld [vmem:[%s8985_s2] sm:$0x3]  ;;  %v6207_v2 = vld [vmem:[%s8986_s0 + $0x8] sm:$0xff]   ;;  %v6214_v4 = vld [vmem:[%s8986_s0 + $0x10] sm:$0xff]   ;;  %vm1488_vm4 = vcmask 64512   ;;  %vm2704_vm5 = vcmask 1045504  }
   0x2   :  { %v6202_v1 = vld [vmem:[%s8986_s0] sm:$0xff]   ;;  %9076 = vst [vmem:[#allocation3_spill] sm:$0xff] %v6207_v2  ;;  %5990 = vmatprep.subr.msk.bf16.mxu0 %vm183_vm0, %v53_v0  ;;  %v185_v3 = vsel %vm183_vm0, %v53_v0, 0  ;;  %9077 = vst [vmem:[#allocation4_spill] sm:$0xff] %v6214_v4  ;;  %v6223_v5 = vld [vmem:[%s8986_s0 + $0x18] sm:$0xff]   ;;  %vm2655_vm6 = vcmask 97280  }
   0x3   :  { %9075 = vst [vmem:[#allocation2_spill] sm:$0xff] %v6202_v1  ;;  %5567 = vmatpush3.bf16.msra.mxu0 %v185_v3  ;;  %5568 = vmatprep.mubr.msk.bf16.mxu0 %vm134_vm1, %v6202_v1  ;;  %9078 = vst [vmem:[#allocation5_spill] sm:$0xff] %v6223_v5  ;;  %v6228_v6 = vld [vmem:[%s8986_s0 + $0x20] sm:$0xff]   ;;  %v6239_v7 = vld [vmem:[%s8986_s0 + $0x28] sm:$0xff]   ;;  %vm3868_vm7 = vcmask 195584   ;;  %vm4492_vm8 = vcmask 7168  }
   0x4   :  { %9079 = vst [vmem:[#allocation6_spill] sm:$0xff] %v6228_v6  ;;  %9080 = vst [vmem:[#allocation7_spill] sm:$0xff] %v6239_v7  ;;  %v6244_v8 = vld [vmem:[%s8986_s0 + $0x30] sm:$0xff]   ;;  %v6253_v9 = vld [vmem:[%s8986_s0 + $0x38] sm:$0xff]  }
   0x5   :  { %9081 = vst [vmem:[#allocation8_spill] sm:$0xff] %v6244_v8  ;;  %9082 = vst [vmem:[#allocation9_spill] sm:$0xff] %v6253_v9  ;;  %v6258_v10 = vld [vmem:[%s8986_s0 + $0x40] sm:$0xff]   ;;  %v6267_v11 = vld [vmem:[%s8986_s0 + $0x48] sm:$0xff]  }
   0x6   :  { %5569 = vmatmul.mubr.msk.bf16.vlgmr.msra.gmra.mrb[0].mxu0 %vm134_vm1, %v6207_v2  ;;  %9083 = vst [vmem:[#allocation10_spill] sm:$0xff] %v6258_v10  ;;  %9084 = vst [vmem:[#allocation11_spill] sm:$0xff] %v6267_v11  ;;  %v6272_v12 = vld [vmem:[%s8986_s0 + $0x50] sm:$0xff]   ;;  %v6281_v13 = vld [vmem:[%s8986_s0 + $0x58] sm:$0xff]  }
   0x7   :  { %5572 = vmatprep.mubr.msk.bf16.mxu0 %vm134_vm1, %v6214_v4  ;;  %9085 = vst [vmem:[#allocation12_spill] sm:$0xff] %v6272_v12  ;;  %9086 = vst [vmem:[#allocation13_spill] sm:$0xff] %v6281_v13  ;;  %v6286_v14 = vld [vmem:[%s8986_s0 + $0x60] sm:$0xff]   ;;  %v6295_v15 = vld [vmem:[%s8986_s0 + $0x68] sm:$0xff]  }
   0x8   :  { %9087 = vst [vmem:[#allocation14_spill] sm:$0xff] %v6286_v14  ;;  %9088 = vst [vmem:[#allocation15_spill] sm:$0xff] %v6295_v15  ;;  %v6300_v16 = vld [vmem:[%s8986_s0 + $0x70] sm:$0xff]   ;;  %v6309_v17 = vld [vmem:[%s8986_s0 + $0x78] sm:$0xff]  }
   0x9   :  { %9089 = vst [vmem:[#allocation16_spill] sm:$0xff] %v6300_v16  ;;  %9090 = vst [vmem:[#allocation17_spill] sm:$0xff] %v6309_v17  ;;  %v6316_v18 = vld [vmem:[%s8987_s1 + $0x4] ss:$8 sps:$4 sm:$0xff]   ;;  %v6014_v19 = vld [vmem:[%s8987_s1 + $0x54] ss:$8 sps:$4 sm:$0xff]  }
   0xa   :  { %628 = vmatprep.mubr.bf16.mxu1 %v6014_v19 }
   0xe   :  { %5573 = vmatmul.mubr.msk.bf16.gmra.mrb[4].mxu0 %vm134_vm1, %v6223_v5 }
   0xf   :  { %5576 = vmatprep.mubr.msk.bf16.mxu0 %vm134_vm1, %v6228_v6 }
  0x16   :  { %5577 = vmatmul.mubr.msk.bf16.gmra.mrb[8].mxu0 %vm134_vm1, %v6239_v7 }
  0x17   :  { %5580 = vmatprep.mubr.msk.bf16.mxu0 %vm134_vm1, %v6244_v8 }
  0x1e   :  { %5581 = vmatmul.mubr.msk.bf16.gmra.mrb[12].mxu0 %vm134_vm1, %v6253_v9 }
  0x1f   :  { %5584 = vmatprep.mubr.msk.bf16.mxu0 %vm134_vm1, %v6258_v10 }
  0x26   :  { %5585 = vmatmul.mubr.msk.bf16.gmra.mrb[16].mxu0 %vm134_vm1, %v6267_v11 }
  0x27   :  { %5588 = vmatprep.mubr.msk.bf16.mxu0 %vm134_vm1, %v6272_v12 }
  0x2e   :  { %5589 = vmatmul.mubr.msk.bf16.gmra.mrb[20].mxu0 %vm134_vm1, %v6281_v13 }
  0x2f   :  { %5592 = vmatprep.mubr.msk.bf16.mxu0 %vm134_vm1, %v6286_v14  ;;  %v6609_v14 = vld [vmem:[%s8988_s3] ss:$0 sm:$0xff] }
  0x36   :  { %5593 = vmatmul.mubr.msk.bf16.gmra.mrb[24].mxu0 %vm134_vm1, %v6295_v15 }
  0x37   :  { %5596 = vmatprep.mubr.msk.bf16.mxu0 %vm134_vm1, %v6300_v16 }
  0x3e   :  { %5597 = vmatmul.mubr.msk.bf16.gmra.mrb[28].mxu0 %vm134_vm1, %v6309_v17  ;;  %v6522_v17 = vld [vmem:[%s8987_s1 + $0x90] ss:$8 sps:$4 sm:$0xff]  }
  0x3f   :  { %588 = vmatprep.mubr.bf16.mxu0 %v6316_v18  ;;  %9103 = vst [vmem:[#allocation30_spill] sm:$0xff] %v6522_v17 }
  0xd9   :  { %v6322_v20 = vpop.f32.mrb[0].mxu0 }
  0xda   :  { %v6324_v21 = vpop.f32.mrb[1].mxu0 }
  0xdb   :  { %v6326_v22 = vpop.f32.mrb[2].mxu0 }
  0xdc   :  { %v381_v23 = vpack.c.bf16 %v6326_v22, %v6322_v20  ;;  %v6330_v24 = vpop.f32.mrb[3].mxu0 }
  0xdd   :  { %v380_v25 = vpack.c.bf16 %v6330_v24, %v6324_v21 }
  0xe1   :  { %v6334_v26 = vpop.f32.mrb[4].mxu0 }
  0xe2   :  { %v6336_v27 = vpop.f32.mrb[5].mxu0 }
  0xe3   :  { %v6338_v28 = vpop.f32.mrb[6].mxu0 }
  0xe4   :  { %v383_v29 = vpack.c.bf16 %v6338_v28, %v6334_v26  ;;  %v6342_v30 = vpop.f32.mrb[7].mxu0 }
  0xe5   :  { %v382_v31 = vpack.c.bf16 %v6342_v30, %v6336_v27 }
  0xe9   :  { %v6346_v32 = vpop.f32.mrb[8].mxu0 }
  0xea   :  { %v6348_v33 = vpop.f32.mrb[9].mxu0 }
  0xeb   :  { %v6350_v34 = vpop.f32.mrb[10].mxu0 }
  0xec   :  { %v385_v35 = vpack.c.bf16 %v6350_v34, %v6346_v32  ;;  %v6354_v36 = vpop.f32.mrb[11].mxu0 }
  0xed   :  { %v384_v37 = vpack.c.bf16 %v6354_v36, %v6348_v33 }
  0xf1   :  { %v6358_v38 = vpop.f32.mrb[12].mxu0 }
  0xf2   :  { %v6360_v39 = vpop.f32.mrb[13].mxu0 }
  0xf3   :  { %v6362_v40 = vpop.f32.mrb[14].mxu0 }
  0xf4   :  { %v387_v41 = vpack.c.bf16 %v6362_v40, %v6358_v38  ;;  %v6366_v42 = vpop.f32.mrb[15].mxu0 }
  0xf5   :  { %v386_v43 = vpack.c.bf16 %v6366_v42, %v6360_v39 }
  0xf9   :  { %v6370_v44 = vpop.f32.mrb[16].mxu0 }
  0xfa   :  { %v6372_v45 = vpop.f32.mrb[17].mxu0 }
  0xfb   :  { %v6374_v46 = vpop.f32.mrb[18].mxu0 }
  0xfc   :  { %v6376_v47 = vpop.f32.mrb[19].mxu0  ;;  %v389_v48 = vpack.c.bf16 %v6374_v46, %v6370_v44 }
  0xfd   :  { %v388_v49 = vpack.c.bf16 %v6376_v47, %v6372_v45 }
  0xff   :  { %4755 = vmatprep.subr.bf16.mxu0 %v388_v49  ;;  %5878 = vmatprep.subr.bf16.mxu1 %v388_v49  ;;  %v6469_v49 = vld [vmem:[%s8987_s1 + $0x20] ss:$8 sps:$4 sm:$0xff]  }
 0x100   :  { %4756 = vmatpush3.bf16.msra.mxu0 %v380_v25  ;;  %5886 = vmatpush3.bf16.msra.mxu1 %v380_v25  ;;  %v6421_v25 = vld [vmem:[%s8987_s1] ss:$8 sps:$4 sm:$0xff]  }
 0x101   :  { %v6382_v50 = vpop.f32.mrb[20].mxu0  ;;  %4757 = vmatprep.subr.bf16.mxu0 %v389_v48  ;;  %5879 = vmatprep.subr.bf16.mxu1 %v389_v48  ;;  %v6460_v48 = vld [vmem:[%s8987_s1 + $0x74] ss:$8 sps:$4 sm:$0xff]  }
 0x102   :  { %v6384_v51 = vpop.f32.mrb[21].mxu0  ;;  %9094 = vst [vmem:[#allocation21_spill] sm:$0xff] %v6460_v48 }
 0x103   :  { %v6386_v52 = vpop.f32.mrb[22].mxu0 }
 0x104   :  { %v391_v53 = vpack.c.bf16 %v6386_v52, %v6382_v50  ;;  %v6390_v54 = vpop.f32.mrb[23].mxu0  ;;  %4758 = vmatpush3.bf16.msra.mxu0 %v381_v23  ;;  %5887 = vmatpush3.bf16.msra.mxu1 %v381_v23 }
 0x105   :  { %v390_v55 = vpack.c.bf16 %v6390_v54, %v6384_v51 }
 0x107   :  { %4759 = vmatprep.subr.bf16.mxu0 %v390_v55  ;;  %5880 = vmatprep.subr.bf16.mxu1 %v390_v55  ;;  %v6479_v55 = vld [vmem:[%s8987_s1 + $0x34] ss:$8 sps:$4 sm:$0xff]  }
 0x108   :  { %4760 = vmatpush3.bf16.msra.mxu0 %v382_v31  ;;  %5888 = vmatpush3.bf16.msra.mxu1 %v382_v31  ;;  %v6431_v31 = vld [vmem:[%s8987_s1 + $0x14] ss:$8 sps:$4 sm:$0xff]   ;;  %9096 = vst [vmem:[#allocation23_spill] sm:$0xff] %v6479_v55 }
 0x109   :  { %v6394_v56 = vpop.f32.mrb[24].mxu0  ;;  %4761 = vmatprep.subr.bf16.mxu0 %v391_v53  ;;  %5881 = vmatprep.subr.bf16.mxu1 %v391_v53  ;;  %v6474_v53 = vld [vmem:[%s8987_s1 + $0x70] ss:$8 sps:$4 sm:$0xff]  }
 0x10a   :  { %v6396_v57 = vpop.f32.mrb[25].mxu0  ;;  %9095 = vst [vmem:[#allocation22_spill] sm:$0xff] %v6474_v53 }
 0x10b   :  { %v6398_v58 = vpop.f32.mrb[26].mxu0 }
 0x10c   :  { %v393_v59 = vpack.c.bf16 %v6398_v58, %v6394_v56  ;;  %v6402_v60 = vpop.f32.mrb[27].mxu0  ;;  %4762 = vmatpush3.bf16.msra.mxu0 %v383_v29  ;;  %5889 = vmatpush3.bf16.msra.mxu1 %v383_v29  ;;  %v6426_v29 = vld [vmem:[%s8987_s1 + $0x50] ss:$8 sps:$4 sm:$0xff]  }
 0x10d   :  { %v392_v61 = vpack.c.bf16 %v6402_v60, %v6396_v57  ;;  %9091 = vst [vmem:[#allocation18_spill] sm:$0xff] %v6426_v29 }
 0x10f   :  { %4763 = vmatprep.subr.bf16.mxu0 %v392_v61  ;;  %5882 = vmatprep.subr.bf16.mxu1 %v392_v61  ;;  %v6493_v61 = vld [vmem:[%s8987_s1 + $0x30] ss:$8 sps:$4 sm:$0xff]  }
 0x110   :  { %4764 = vmatpush3.bf16.msra.mxu0 %v384_v37  ;;  %5890 = vmatpush3.bf16.msra.mxu1 %v384_v37  ;;  %v6445_v37 = vld [vmem:[%s8987_s1 + $0x10] ss:$8 sps:$4 sm:$0xff]   ;;  %9098 = vst [vmem:[#allocation25_spill] sm:$0xff] %v6493_v61 }
 0x111   :  { %v6406_v62 = vpop.f32.mrb[28].mxu0  ;;  %4765 = vmatprep.subr.bf16.mxu0 %v393_v59  ;;  %5883 = vmatprep.subr.bf16.mxu1 %v393_v59  ;;  %v6484_v59 = vld [vmem:[%s8987_s1 + $0x84] ss:$8 sps:$4 sm:$0xff]  }
 0x112   :  { %v6408_v63 = vpop.f32.mrb[29].mxu0  ;;  %9097 = vst [vmem:[#allocation24_spill] sm:$0xff] %v6484_v59 }
 0x113   :  { %v6410_v0 = vpop.f32.mrb[30].mxu0 }
 0x114   :  { %v395_v3 = vpack.c.bf16 %v6410_v0, %v6406_v62  ;;  %v6414_v19 = vpop.f32.mrb[31].mxu0  ;;  %4766 = vmatpush3.bf16.msra.mxu0 %v385_v35  ;;  %5891 = vmatpush3.bf16.msra.mxu1 %v385_v35  ;;  %v6436_v35 = vld [vmem:[%s8987_s1 + $0x64] ss:$8 sps:$4 sm:$0xff]  }
 0x115   :  { %v394_v23 = vpack.c.bf16 %v6414_v19, %v6408_v63  ;;  %9092 = vst [vmem:[#allocation19_spill] sm:$0xff] %v6436_v35 }
 0x117   :  { %4767 = vmatprep.subr.bf16.mxu0 %v394_v23  ;;  %5884 = vmatprep.subr.bf16.mxu1 %v394_v23  ;;  %v6503_v23 = vld [vmem:[%s8987_s1 + $0x44] ss:$8 sps:$4 sm:$0xff]  }
 0x118   :  { %4768 = vmatpush3.bf16.msra.mxu0 %v386_v43  ;;  %5892 = vmatpush3.bf16.msra.mxu1 %v386_v43  ;;  %v6455_v43 = vld [vmem:[%s8987_s1 + $0x24] ss:$8 sps:$4 sm:$0xff]   ;;  %9100 = vst [vmem:[#allocation27_spill] sm:$0xff] %v6503_v23 }
 0x119   :  { %4769 = vmatprep.subr.bf16.mxu0 %v395_v3  ;;  %5885 = vmatprep.subr.bf16.mxu1 %v395_v3  ;;  %v6498_v3 = vld [vmem:[%s8987_s1 + $0x80] ss:$8 sps:$4 sm:$0xff]  }
 0x11a   :  { %9099 = vst [vmem:[#allocation26_spill] sm:$0xff] %v6498_v3 }
 0x11c   :  { %4770 = vmatpush3.bf16.msra.mxu0 %v387_v41  ;;  %5893 = vmatpush3.bf16.msra.mxu1 %v387_v41  ;;  %v6450_v41 = vld [vmem:[%s8987_s1 + $0x60] ss:$8 sps:$4 sm:$0xff]  }
 0x11d   :  { %9093 = vst [vmem:[#allocation20_spill] sm:$0xff] %v6450_v41 }
 0x11f   :  { %589 = vmatmul.mubr.bf16.vlgmr.msra.gmra.mrb[32].mxu0 %v6421_v25  ;;  %629 = vmatmul.mubr.bf16.vlgmr.msra.gmra.mrb[0].mxu1 %v6426_v29 }
 0x120   :  { %596 = vmatprep.mubr.bf16.mxu0 %v6431_v31  ;;  %636 = vmatprep.mubr.bf16.mxu1 %v6436_v35 }
 0x127   :  { %597 = vmatmul.mubr.bf16.gmra.mrb[36].mxu0 %v6445_v37  ;;  %637 = vmatmul.mubr.bf16.gmra.mrb[4].mxu1 %v6450_v41 }
 0x128   :  { %604 = vmatprep.mubr.bf16.mxu0 %v6455_v43  ;;  %644 = vmatprep.mubr.bf16.mxu1 %v6460_v48  ;;  %v6527_v48 = vld [vmem:[%s8987_s1 + $0xa4] ss:$8 sps:$4 sm:$0xff]  }
 0x129   :  { %9104 = vst [vmem:[#allocation31_spill] sm:$0xff] %v6527_v48 }
 0x12f   :  { %605 = vmatmul.mubr.bf16.gmra.mrb[40].mxu0 %v6469_v49  ;;  %645 = vmatmul.mubr.bf16.gmra.mrb[8].mxu1 %v6474_v53  ;;  %v6508_v53 = vld [vmem:[%s8987_s1 + $0x94] ss:$8 sps:$4 sm:$0xff]  }
 0x130   :  { %612 = vmatprep.mubr.bf16.mxu0 %v6479_v55  ;;  %652 = vmatprep.mubr.bf16.mxu1 %v6484_v59  ;;  %9101 = vst [vmem:[#allocation28_spill] sm:$0xff] %v6508_v53  ;;  %v6517_v59 = vld [vmem:[%s8987_s1 + $0x40] ss:$8 sps:$4 sm:$0xff]  }
 0x131   :  { %9102 = vst [vmem:[#allocation29_spill] sm:$0xff] %v6517_v59 }
 0x137   :  { %613 = vmatmul.mubr.bf16.gmra.mrb[44].mxu0 %v6493_v61  ;;  %653 = vmatmul.mubr.bf16.gmra.mrb[12].mxu1 %v6498_v3  ;;  %v6540_v3 = vld [vmem:[%s8987_s1 + $0xb4] ss:$8 sps:$4 sm:$0xff]  }
 0x138   :  { %620 = vmatprep.mubr.bf16.mxu0 %v6503_v23  ;;  %660 = vmatprep.mubr.bf16.mxu1 %v6508_v53  ;;  %v6535_v53 = vld [vmem:[%s8987_s1 + $0xa0] ss:$8 sps:$4 sm:$0xff]   ;;  %9106 = vst [vmem:[#allocation33_spill] sm:$0xff] %v6540_v3 }
 0x139   :  { %9105 = vst [vmem:[#allocation32_spill] sm:$0xff] %v6535_v53 }
 0x13f   :  { %621 = vmatmul.mubr.bf16.gmra.mrb[48].mxu0 %v6517_v59  ;;  %661 = vmatmul.mubr.bf16.gmra.mrb[16].mxu1 %v6522_v17  ;;  %v6547_v17 = vld [vmem:[%s8987_s1 + $0xb0] ss:$8 sps:$4 sm:$0xff]  }
 0x140   :  { %668 = vmatprep.mubr.bf16.mxu1 %v6527_v48  ;;  %9107 = vst [vmem:[#allocation34_spill] sm:$0xff] %v6547_v17  ;;  %v6552_v48 = vld [vmem:[%s8987_s1 + $0xc4] ss:$8 sps:$4 sm:$0xff]  }
 0x141   :  { %9108 = vst [vmem:[#allocation35_spill] sm:$0xff] %v6552_v48 }
 0x147   :  { %669 = vmatmul.mubr.bf16.gmra.mrb[20].mxu1 %v6535_v53  ;;  %v6559_v53 = vld [vmem:[%s8987_s1 + $0xc0] ss:$8 sps:$4 sm:$0xff]  }
 0x148   :  { %676 = vmatprep.mubr.bf16.mxu1 %v6540_v3  ;;  %9109 = vst [vmem:[#allocation36_spill] sm:$0xff] %v6559_v53  ;;  %v6564_v3 = vld [vmem:[%s8987_s1 + $0xd4] ss:$8 sps:$4 sm:$0xff]  }
 0x149   :  { %9110 = vst [vmem:[#allocation37_spill] sm:$0xff] %v6564_v3 }
 0x14f   :  { %677 = vmatmul.mubr.bf16.gmra.mrb[24].mxu1 %v6547_v17  ;;  %v6571_v17 = vld [vmem:[%s8987_s1 + $0xd0] ss:$8 sps:$4 sm:$0xff]  }
 0x150   :  { %684 = vmatprep.mubr.bf16.mxu1 %v6552_v48  ;;  %9111 = vst [vmem:[#allocation38_spill] sm:$0xff] %v6571_v17  ;;  %v6576_v48 = vld [vmem:[%s8987_s1 + $0xe4] ss:$8 sps:$4 sm:$0xff]  }
 0x151   :  { %9112 = vst [vmem:[#allocation39_spill] sm:$0xff] %v6576_v48 }
 0x157   :  { %685 = vmatmul.mubr.bf16.gmra.mrb[28].mxu1 %v6559_v53  ;;  %v6583_v53 = vld [vmem:[%s8987_s1 + $0xe0] ss:$8 sps:$4 sm:$0xff]  }
 0x158   :  { %692 = vmatprep.mubr.bf16.mxu1 %v6564_v3  ;;  %9113 = vst [vmem:[#allocation40_spill] sm:$0xff] %v6583_v53  ;;  %v6588_v3 = vld [vmem:[%s8987_s1 + $0xf4] ss:$8 sps:$4 sm:$0xff]  }
 0x159   :  { %9114 = vst [vmem:[#allocation41_spill] sm:$0xff] %v6588_v3 }
 0x15f   :  { %693 = vmatmul.mubr.bf16.gmra.mrb[32].mxu1 %v6571_v17  ;;  %v6595_v17 = vld [vmem:[%s8987_s1 + $0xf0] ss:$8 sps:$4 sm:$0xff]  }
 0x160   :  { %700 = vmatprep.mubr.bf16.mxu1 %v6576_v48  ;;  %9115 = vst [vmem:[#allocation42_spill] sm:$0xff] %v6595_v17  ;;  %v6060_v48 = vld [vmem:[%s8985_s2 + $0x8] sm:$0xff]  }
 0x161   :  { %5600 = vmatprep.subr.bf16.mxu0 %v6060_v48 }
 0x162   :  { %5601 = vmatpush3.bf16.msra.mxu0 %v6060_v48 }
 0x167   :  { %701 = vmatmul.mubr.bf16.gmra.mrb[36].mxu1 %v6583_v53 }
 0x168   :  { %708 = vmatprep.mubr.bf16.mxu1 %v6588_v3  ;;  %v6061_v3 = vld [vmem:[%s8985_s2 + $0x10] sm:$0xff]  }
 0x169   :  { %5602 = vmatprep.subr.bf16.mxu0 %v6061_v3 }
 0x16a   :  { %5603 = vmatpush3.bf16.msra.mxu0 %v6061_v3 }
 0x16f   :  { %709 = vmatmul.mubr.bf16.gmra.mrb[40].mxu1 %v6595_v17 }
 0x170   :  { %5638 = vmatprep.mubr.msk.bf16.mxu1 %vm134_vm1, %v6202_v1 }
 0x1f2   :  { %v4771_v53 = vpop.f32.mrb[32].mxu0  ;;  %v4801_v41 = vpop.f32.mrb[0].mxu1 }
 0x1f3   :  { %v4772_v16 = vpop.f32.mrb[33].mxu0  ;;  %v4802_v15 = vpop.f32.mrb[1].mxu1 }
 0x1f4   :  { %v4773_v17 = vadd.f32 %v4772_v16, %v4771_v53  ;;  %v4803_v35 = vadd.f32 %v4802_v15, %v4801_v41  ;;  %v4774_v29 = vpop.f32.mrb[34].mxu0  ;;  %v4804_v1 = vpop.f32.mrb[2].mxu1 }
 0x1f5   :  { %v4775_v48 = vpop.f32.mrb[35].mxu0  ;;  %v4805_v13 = vpop.f32.mrb[3].mxu1 }
 0x1f6   :  { %v717_v59 = vadd.f32 %v4773_v17, %v6324_v21  ;;  %v727_v12 = vadd.f32 %v6346_v32, %v4803_v35  ;;  %v4776_v3 = vadd.f32 %v4775_v48, %v4774_v29  ;;  %v4806_v11 = vadd.f32 %v4805_v13, %v4804_v1 }
 0x1f8   :  { %v754_v23 = vadd.f32 %v6609_v14, %v717_v59  ;;  %v718_v16 = vadd.f32 %v4776_v3, %v6330_v24  ;;  %v728_v15 = vadd.f32 %v6350_v34, %v4806_v11  ;;  %v764_v41 = vadd.f32 %v6609_v14, %v727_v12 }
 0x1fa   :  { %v755_v53 = vadd.f32 %v6609_v14, %v718_v16  ;;  %v765_v61 = vadd.f32 %v6609_v14, %v728_v15  ;;  %v4777_v10 = vpop.f32.mrb[36].mxu0  ;;  %v4807_v9 = vpop.f32.mrb[4].mxu1  ;;  %v786_v55 = vmax.f32 %v754_v23, 0.0  ;;  %v796_v24 = vmax.f32 %v764_v41, 0.0 }
 0x1fb   :  { %v4778_v17 = vpop.f32.mrb[37].mxu0  ;;  %v4808_v21 = vpop.f32.mrb[5].mxu1 }
 0x1fc   :  { %v787_v32 = vmax.f32 %v755_v53, 0.0  ;;  %v797_v29 = vmax.f32 %v765_v61, 0.0  ;;  %v4779_v1 = vadd.f32 %v4778_v17, %v4777_v10  ;;  %v4809_v13 = vadd.f32 %v4808_v21, %v4807_v9  ;;  %v4780_v35 = vpop.f32.mrb[38].mxu0  ;;  %v4810_v59 = vpop.f32.mrb[6].mxu1 }
 0x1fd   :  { %v4781_v48 = vpop.f32.mrb[39].mxu0  ;;  %v4811_v11 = vpop.f32.mrb[7].mxu1 }
 0x1fe   :  { %v818_v12 = vpack.c.bf16 %v787_v32, %v786_v55  ;;  %v719_v34 = vadd.f32 %v6322_v20, %v4779_v1  ;;  %v729_v3 = vadd.f32 %v4809_v13, %v6360_v39  ;;  %v4782_v16 = vadd.f32 %v4781_v48, %v4780_v35 }
 0x1ff   :  { %v4812_v15 = vadd.f32 %v4811_v11, %v4810_v59  ;;  %v6621_v23 = vpack.c.bf16 %v797_v29, %v796_v24 }
 0x200   :  { %v756_v53 = vadd.f32 %v6609_v14, %v719_v34  ;;  %v720_v10 = vadd.f32 %v6326_v22, %v4782_v16  ;;  %5604 = vmatprep.mubr.msk.bf16.mxu0 %vm850_vm2, %v818_v12  ;;  %v766_v9 = vadd.f32 %v6609_v14, %v729_v3 }
 0x201   :  { %v730_v61 = vadd.f32 %v4812_v15, %v6366_v42 }
 0x202   :  { %v757_v55 = vadd.f32 %v6609_v14, %v720_v10  ;;  %v4783_v41 = vpop.f32.mrb[40].mxu0  ;;  %v4813_v20 = vpop.f32.mrb[8].mxu1  ;;  %v788_v32 = vmax.f32 %v756_v53, 0.0  ;;  %v798_v59 = vmax.f32 %v766_v9, 0.0 }
 0x203   :  { %v767_v39 = vadd.f32 %v6609_v14, %v730_v61  ;;  %v4784_v17 = vpop.f32.mrb[41].mxu0  ;;  %v4814_v21 = vpop.f32.mrb[9].mxu1 }
 0x204   :  { %v789_v29 = vmax.f32 %v757_v55, 0.0  ;;  %v4785_v1 = vadd.f32 %v4784_v17, %v4783_v41  ;;  %v4815_v13 = vadd.f32 %v4814_v21, %v4813_v20  ;;  %v4786_v35 = vpop.f32.mrb[42].mxu0  ;;  %v4816_v22 = vpop.f32.mrb[10].mxu1 }
 0x205   :  { %v799_v24 = vmax.f32 %v767_v39, 0.0  ;;  %v4787_v48 = vpop.f32.mrb[43].mxu0  ;;  %v4817_v11 = vpop.f32.mrb[11].mxu1 }
 0x206   :  { %v819_v12 = vpack.c.bf16 %v789_v29, %v788_v32  ;;  %v721_v42 = vadd.f32 %v4785_v1, %v6336_v27  ;;  %v731_v34 = vadd.f32 %v6358_v38, %v4815_v13  ;;  %v4788_v3 = vadd.f32 %v4787_v48, %v4786_v35 }
 0x207   :  { %v4818_v16 = vadd.f32 %v4817_v11, %v4816_v22  ;;  %v6632_v15 = vpack.c.bf16 %v799_v24, %v798_v59 }
 0x208   :  { %v758_v53 = vadd.f32 %v6609_v14, %v721_v42  ;;  %v722_v10 = vadd.f32 %v4788_v3, %v6342_v30  ;;  %5605 = vmatmul.mubr.msk.bf16.vlgmr.msra.gmra.mrb[52].mxu0 %vm850_vm2, %v819_v12  ;;  %v768_v9 = vadd.f32 %v6609_v14, %v731_v34 }
 0x209   :  { %v732_v61 = vadd.f32 %v6362_v40, %v4818_v16 }
 0x20a   :  { %v759_v55 = vadd.f32 %v6609_v14, %v722_v10  ;;  %v4789_v41 = vpop.f32.mrb[44].mxu0  ;;  %v4819_v27 = vpop.f32.mrb[12].mxu1  ;;  %v790_v17 = vmax.f32 %v758_v53, 0.0  ;;  %v800_v13 = vmax.f32 %v768_v9, 0.0 }
 0x20b   :  { %v769_v38 = vadd.f32 %v6609_v14, %v732_v61  ;;  %v4790_v20 = vpop.f32.mrb[45].mxu0  ;;  %v4820_v39 = vpop.f32.mrb[13].mxu1 }
 0x20c   :  { %v791_v21 = vmax.f32 %v759_v55, 0.0  ;;  %v4791_v32 = vadd.f32 %v4790_v20, %v4789_v41  ;;  %v4821_v29 = vadd.f32 %v4820_v39, %v4819_v27  ;;  %v4792_v1 = vpop.f32.mrb[46].mxu0  ;;  %v4822_v30 = vpop.f32.mrb[14].mxu1 }
 0x20d   :  { %v801_v35 = vmax.f32 %v769_v38, 0.0  ;;  %v4793_v22 = vpop.f32.mrb[47].mxu0  ;;  %v4823_v59 = vpop.f32.mrb[15].mxu1 }
 0x20e   :  { %v820_v24 = vpack.c.bf16 %v791_v21, %v790_v17  ;;  %v723_v40 = vadd.f32 %v6334_v26, %v4791_v32  ;;  %v733_v48 = vadd.f32 %v4821_v29, %v6372_v45  ;;  %v4794_v11 = vadd.f32 %v4793_v22, %v4792_v1 }
 0x20f   :  { %v4824_v12 = vadd.f32 %v4823_v59, %v4822_v30  ;;  %v6643_v42 = vpack.c.bf16 %v801_v35, %v800_v13 }
 0x210   :  { %v760_v34 = vadd.f32 %v6609_v14, %v723_v40  ;;  %v724_v3 = vadd.f32 %v6338_v28, %v4794_v11  ;;  %5608 = vmatprep.mubr.msk.bf16.mxu0 %vm850_vm2, %v820_v24  ;;  %v770_v16 = vadd.f32 %v6609_v14, %v733_v48 }
 0x211   :  { %v734_v53 = vadd.f32 %v4824_v12, %v6376_v47 }
 0x212   :  { %v761_v10 = vadd.f32 %v6609_v14, %v724_v3  ;;  %v4795_v9 = vpop.f32.mrb[48].mxu0  ;;  %v4825_v26 = vpop.f32.mrb[16].mxu1  ;;  %v792_v41 = vmax.f32 %v760_v34, 0.0  ;;  %v802_v17 = vmax.f32 %v770_v16, 0.0 }
 0x213   :  { %v771_v45 = vadd.f32 %v6609_v14, %v734_v53  ;;  %v4796_v61 = vpop.f32.mrb[49].mxu0  ;;  %v4826_v55 = vpop.f32.mrb[17].mxu1 }
 0x214   :  { %v793_v27 = vmax.f32 %v761_v10, 0.0  ;;  %v4797_v38 = vadd.f32 %v4796_v61, %v4795_v9  ;;  %v4827_v20 = vadd.f32 %v4826_v55, %v4825_v26  ;;  %v4798_v39 = vpop.f32.mrb[50].mxu0  ;;  %v4828_v28 = vpop.f32.mrb[18].mxu1 }
 0x215   :  { %v803_v21 = vmax.f32 %v771_v45, 0.0  ;;  %v4799_v32 = vpop.f32.mrb[51].mxu0  ;;  %v4829_v29 = vpop.f32.mrb[19].mxu1 }
 0x216   :  { %v821_v1 = vpack.c.bf16 %v793_v27, %v792_v41  ;;  %v725_v47 = vadd.f32 %v4797_v38, %v6348_v33  ;;  %v735_v30 = vadd.f32 %v6370_v44, %v4827_v20  ;;  %v4800_v13 = vadd.f32 %v4799_v32, %v4798_v39 }
 0x217   :  { %v4830_v35 = vadd.f32 %v4829_v29, %v4828_v28  ;;  %v826_v22 = vpack.c.bf16 %v803_v21, %v802_v17 }
 0x218   :  { %v762_v59 = vadd.f32 %v6609_v14, %v725_v47  ;;  %v726_v24 = vadd.f32 %v4800_v13, %v6354_v36  ;;  %5609 = vmatmul.mubr.msk.bf16.gmra.mrb[56].mxu0 %vm850_vm2, %v821_v1  ;;  %v772_v40 = vadd.f32 %v6609_v14, %v735_v30 }
 0x219   :  { %v736_v48 = vadd.f32 %v6374_v46, %v4830_v35 }
 0x21a   :  { %v763_v11 = vadd.f32 %v6609_v14, %v726_v24  ;;  %v4831_v12 = vpop.f32.mrb[20].mxu1  ;;  %v794_v44 = vmax.f32 %v762_v59, 0.0  ;;  %v804_v10 = vmax.f32 %v772_v40, 0.0 }
 0x21b   :  { %v773_v33 = vadd.f32 %v6609_v14, %v736_v48  ;;  %v4832_v34 = vpop.f32.mrb[21].mxu1 }
 0x21c   :  { %v795_v3 = vmax.f32 %v763_v11, 0.0  ;;  %v4833_v16 = vadd.f32 %v4832_v34, %v4831_v12  ;;  %v4834_v53 = vpop.f32.mrb[22].mxu1 }
 0x21d   :  { %v805_v9 = vmax.f32 %v773_v33, 0.0  ;;  %v4835_v26 = vpop.f32.mrb[23].mxu1 }
 0x21e   :  { %v822_v36 = vpack.c.bf16 %v795_v3, %v794_v44  ;;  %v737_v45 = vadd.f32 %v4833_v16, %v6384_v51  ;;  %v4836_v61 = vadd.f32 %v4835_v26, %v4834_v53 }
 0x21f   :  { %v827_v55 = vpack.c.bf16 %v805_v9, %v804_v10 }
 0x220   :  { %v774_v46 = vadd.f32 %v6609_v14, %v737_v45  ;;  %v738_v41 = vadd.f32 %v4836_v61, %v6390_v54  ;;  %5612 = vmatprep.mubr.msk.bf16.mxu0 %vm850_vm2, %v822_v36 }
 0x221   :  { %5613 = vmatmul.mubr.msk.bf16.gmra.mrb[60].mxu0 %vm850_vm2, %v6621_v23 }
 0x222   :  { %v775_v27 = vadd.f32 %v6609_v14, %v738_v41  ;;  %v4837_v38 = vpop.f32.mrb[24].mxu1  ;;  %5616 = vmatprep.mubr.msk.bf16.mxu0 %vm850_vm2, %v6632_v15  ;;  %v806_v39 = vmax.f32 %v774_v46, 0.0 }
 0x223   :  { %v4838_v20 = vpop.f32.mrb[25].mxu1 }
 0x224   :  { %v807_v51 = vmax.f32 %v775_v27, 0.0  ;;  %v4839_v28 = vadd.f32 %v4838_v20, %v4837_v38  ;;  %v4840_v17 = vpop.f32.mrb[26].mxu1 }
 0x225   :  { %v4841_v21 = vpop.f32.mrb[27].mxu1 }
 0x226   :  { %v739_v32 = vadd.f32 %v6382_v50, %v4839_v28  ;;  %v4842_v54 = vadd.f32 %v4841_v21, %v4840_v17  ;;  %v828_v29 = vpack.c.bf16 %v807_v51, %v806_v39 }
 0x228   :  { %v776_v1 = vadd.f32 %v6609_v14, %v739_v32  ;;  %v740_v23 = vadd.f32 %v6386_v52, %v4842_v54 }
 0x229   :  { %5617 = vmatmul.mubr.msk.bf16.gmra.mrb[64].mxu0 %vm850_vm2, %v6643_v42 }
 0x22a   :  { %v777_v47 = vadd.f32 %v6609_v14, %v740_v23  ;;  %v4843_v15 = vpop.f32.mrb[28].mxu1  ;;  %5620 = vmatprep.mubr.msk.bf16.mxu0 %vm850_vm2, %v826_v22  ;;  %v808_v13 = vmax.f32 %v776_v1, 0.0 }
 0x22b   :  { %v4844_v30 = vpop.f32.mrb[29].mxu1 }
 0x22c   :  { %v809_v35 = vmax.f32 %v777_v47, 0.0  ;;  %v4845_v59 = vadd.f32 %v4844_v30, %v4843_v15  ;;  %v4846_v24 = vpop.f32.mrb[30].mxu1 }
 0x22d   :  { %v4847_v50 = vpop.f32.mrb[31].mxu1 }
 0x22e   :  { %v741_v40 = vadd.f32 %v4845_v59, %v6396_v57  ;;  %v4848_v48 = vadd.f32 %v4847_v50, %v4846_v24  ;;  %v829_v11 = vpack.c.bf16 %v809_v35, %v808_v13 }
 0x230   :  { %v778_v52 = vadd.f32 %v6609_v14, %v741_v40  ;;  %v742_v12 = vadd.f32 %v4848_v48, %v6402_v60 }
 0x231   :  { %5621 = vmatmul.mubr.msk.bf16.gmra.mrb[68].mxu0 %vm850_vm2, %v827_v55 }
 0x232   :  { %v779_v42 = vadd.f32 %v6609_v14, %v742_v12  ;;  %v4849_v33 = vpop.f32.mrb[32].mxu1  ;;  %5624 = vmatprep.mubr.msk.bf16.mxu0 %vm850_vm2, %v828_v29  ;;  %v810_v34 = vmax.f32 %v778_v52, 0.0 }
 0x233   :  { %v4850_v22 = vpop.f32.mrb[33].mxu1 }
 0x234   :  { %v811_v44 = vmax.f32 %v779_v42, 0.0  ;;  %v4851_v3 = vadd.f32 %v4850_v22, %v4849_v33  ;;  %v4852_v16 = vpop.f32.mrb[34].mxu1 }
 0x235   :  { %v4853_v53 = vpop.f32.mrb[35].mxu1 }
 0x236   :  { %v743_v57 = vadd.f32 %v6394_v56, %v4851_v3  ;;  %v4854_v10 = vadd.f32 %v4853_v53, %v4852_v16  ;;  %v830_v9 = vpack.c.bf16 %v811_v44, %v810_v34 }
 0x238   :  { %v780_v26 = vadd.f32 %v6609_v14, %v743_v57  ;;  %v744_v60 = vadd.f32 %v6398_v58, %v4854_v10 }
 0x239   :  { %5625 = vmatmul.mubr.msk.bf16.gmra.mrb[72].mxu0 %vm850_vm2, %v829_v11 }
 0x23a   :  { %v781_v36 = vadd.f32 %v6609_v14, %v744_v60  ;;  %v4855_v45 = vpop.f32.mrb[36].mxu1  ;;  %5628 = vmatprep.mubr.msk.bf16.mxu0 %vm850_vm2, %v830_v9  ;;  %v812_v55 = vmax.f32 %v780_v26, 0.0 }
 0x23b   :  { %v4856_v61 = vpop.f32.mrb[37].mxu1 }
 0x23c   :  { %v813_v46 = vmax.f32 %v781_v36, 0.0  ;;  %v4857_v41 = vadd.f32 %v4856_v61, %v4855_v45  ;;  %v4858_v27 = vpop.f32.mrb[38].mxu1 }
 0x23d   :  { %v4859_v38 = vpop.f32.mrb[39].mxu1 }
 0x23e   :  { %v745_v56 = vadd.f32 %v4857_v41, %v6408_v63  ;;  %v4860_v20 = vadd.f32 %v4859_v38, %v4858_v27  ;;  %v831_v39 = vpack.c.bf16 %v813_v46, %v812_v55 }
 0x240   :  { %v782_v51 = vadd.f32 %v6609_v14, %v745_v56  ;;  %v746_v58 = vadd.f32 %v4860_v20, %v6414_v19 }
 0x241   :  { %5629 = vmatmul.mubr.msk.bf16.gmra.mrb[76].mxu0 %vm850_vm2, %v831_v39 }
 0x242   :  { %v783_v28 = vadd.f32 %v6609_v14, %v746_v58  ;;  %v4861_v17 = vpop.f32.mrb[40].mxu1  ;;  %v814_v32 = vmax.f32 %v782_v51, 0.0 }
 0x243   :  { %v4862_v21 = vpop.f32.mrb[41].mxu1 }
 0x244   :  { %v815_v54 = vmax.f32 %v783_v28, 0.0  ;;  %v4863_v29 = vadd.f32 %v4862_v21, %v4861_v17  ;;  %v4864_v1 = vpop.f32.mrb[42].mxu1 }
 0x245   :  { %v4865_v23 = vpop.f32.mrb[43].mxu1 }
 0x246   :  { %v747_v47 = vadd.f32 %v6406_v62, %v4863_v29  ;;  %v4866_v63 = vadd.f32 %v4865_v23, %v4864_v1  ;;  %v832_v15 = vpack.c.bf16 %v815_v54, %v814_v32 }
 0x248   :  { %v784_v30 = vadd.f32 %v6609_v14, %v747_v47  ;;  %v748_v13 = vadd.f32 %v6410_v0, %v4866_v63  ;;  %5632 = vmatprep.mubr.msk.bf16.mxu0 %vm850_vm2, %v832_v15 }
 0x24a   :  { %v785_v19 = vadd.f32 %v6609_v14, %v748_v13  ;;  %v816_v35 = vmax.f32 %v784_v30, 0.0  ;;  %v6083_v13 = vld [vmem:[%s8986_s0] sm:$0xff]  }
 0x24c   :  { %v817_v59 = vmax.f32 %v785_v19, 0.0  ;;  %v4295_v19 = vunpack.c.l.bf16 %v6083_v13 }
 0x24e   :  { %v833_v24 = vpack.c.bf16 %v817_v59, %v816_v35  ;;  %v1323_v35 = vld [vmem:[%s8985_s2 + $0x20] sm:$0x3]  ;;  %v4296_v59 = vunpack.c.h.bf16 %v6083_v13  ;;  %v6086_v13 = vld [vmem:[%s8986_s0 + $0x18] sm:$0xff]  }
 0x24f   :  { %5991 = vmatprep.subr.msk.bf16.mxu1 %vm183_vm0, %v1323_v35 }
 0x250   :  { %5633 = vmatmul.mubr.msk.bf16.gmra.mrb[80].mxu0 %vm850_vm2, %v833_v24  ;;  %v6084_v24 = vld [vmem:[%s8986_s0 + $0x8] sm:$0xff]  }
 0x251   :  { %1108 = vmatprep.mubr.bf16.mxu0 %v6316_v18 }
 0x2db   :  { %v6701_v50 = vpop.f32.mrb[52].mxu0 }
 0x2dc   :  { %v6703_v62 = vpop.f32.mrb[53].mxu0 }
 0x2dd   :  { %v6705_v40 = vpop.f32.mrb[54].mxu0 }
 0x2de   :  { %v1061_v0 = vpack.c.bf16 %v6705_v40, %v6701_v50  ;;  %v6709_v48 = vpop.f32.mrb[55].mxu0 }
 0x2df   :  { %v1060_v14 = vpack.c.bf16 %v6709_v48, %v6703_v62 }
 0x2eb   :  { %v6713_v11 = vpop.f32.mrb[56].mxu0 }
 0x2ec   :  { %v6715_v52 = vpop.f32.mrb[57].mxu0 }
 0x2ed   :  { %v6717_v12 = vpop.f32.mrb[58].mxu0 }
 0x2ee   :  { %v1063_v18 = vpack.c.bf16 %v6717_v12, %v6713_v11  ;;  %v6721_v42 = vpop.f32.mrb[59].mxu0 }
 0x2ef   :  { %v1062_v33 = vpack.c.bf16 %v6721_v42, %v6715_v52 }
 0x2f4   :  { %v6725_v22 = vpop.f32.mrb[60].mxu0 }
 0x2f5   :  { %v6727_v34 = vpop.f32.mrb[61].mxu0 }
 0x2f6   :  { %v6729_v44 = vpop.f32.mrb[62].mxu0 }
 0x2f7   :  { %v1065_v3 = vpack.c.bf16 %v6729_v44, %v6725_v22  ;;  %v6733_v16 = vpop.f32.mrb[63].mxu0 }
 0x2f8   :  { %v1064_v53 = vpack.c.bf16 %v6733_v16, %v6727_v34 }
 0x2fc   :  { %v6737_v57 = vpop.f32.mrb[64].mxu0 }
 0x2fd   :  { %v6739_v10 = vpop.f32.mrb[65].mxu0 }
 0x2fe   :  { %v6741_v9 = vpop.f32.mrb[66].mxu0 }
 0x2ff   :  { %v1067_v26 = vpack.c.bf16 %v6741_v9, %v6737_v57  ;;  %v6745_v60 = vpop.f32.mrb[67].mxu0 }
 0x300   :  { %v1066_v36 = vpack.c.bf16 %v6745_v60, %v6739_v10 }
 0x304   :  { %v6749_v45 = vpop.f32.mrb[68].mxu0 }
 0x305   :  { %v6751_v61 = vpop.f32.mrb[69].mxu0 }
 0x306   :  { %v6753_v55 = vpop.f32.mrb[70].mxu0 }
 0x307   :  { %v1069_v46 = vpack.c.bf16 %v6753_v55, %v6749_v45  ;;  %v6757_v41 = vpop.f32.mrb[71].mxu0 }
 0x308   :  { %v1068_v27 = vpack.c.bf16 %v6757_v41, %v6751_v61 }
 0x30a   :  { %4885 = vmatprep.subr.bf16.mxu0 %v1068_v27 }
 0x30b   :  { %4886 = vmatpush3.bf16.msra.mxu0 %v1060_v14  ;;  %v4298_v14 = vunpack.c.h.bf16 %v6084_v24 }
 0x30c   :  { %v6761_v38 = vpop.f32.mrb[72].mxu0  ;;  %4887 = vmatprep.subr.bf16.mxu0 %v1069_v46 }
 0x30d   :  { %v6763_v56 = vpop.f32.mrb[73].mxu0 }
 0x30e   :  { %v6765_v20 = vpop.f32.mrb[74].mxu0 }
 0x30f   :  { %v1071_v39 = vpack.c.bf16 %v6765_v20, %v6761_v38  ;;  %v6769_v51 = vpop.f32.mrb[75].mxu0  ;;  %4888 = vmatpush3.bf16.msra.mxu0 %v1061_v0  ;;  %v4297_v0 = vunpack.c.l.bf16 %v6084_v24 }
 0x310   :  { %v1070_v58 = vpack.c.bf16 %v6769_v51, %v6763_v56 }
 0x312   :  { %4889 = vmatprep.subr.bf16.mxu0 %v1070_v58 }
 0x313   :  { %4890 = vmatpush3.bf16.msra.mxu0 %v1062_v33  ;;  %v1325_v33 = vsel %vm183_vm0, %v1323_v35, 0 }
 0x314   :  { %v6773_v28 = vpop.f32.mrb[76].mxu0  ;;  %4891 = vmatprep.subr.bf16.mxu0 %v1071_v39  ;;  %5637 = vmatpush3.bf16.msra.mxu1 %v1325_v33 }
 0x315   :  { %v6775_v17 = vpop.f32.mrb[77].mxu0 }
 0x316   :  { %v6777_v21 = vpop.f32.mrb[78].mxu0 }
 0x317   :  { %v1073_v32 = vpack.c.bf16 %v6777_v21, %v6773_v28  ;;  %v6781_v54 = vpop.f32.mrb[79].mxu0  ;;  %4892 = vmatpush3.bf16.msra.mxu0 %v1063_v18  ;;  %v6809_v18 = vld [vmem:[%s8989_s4 + $0x18] ss:$0 sm:$0xff]  ;;  %5639 = vmatmul.mubr.msk.bf16.vlgmr.msra.gmra.mrb[44].mxu1 %vm134_vm1, %v6207_v2  ;;  %v7386_v2 = vld [vmem:[%s8987_s1 + $0x80] ss:$8 sps:$4 sm:$0xff]  }
 0x318   :  { %v1072_v29 = vpack.c.bf16 %v6781_v54, %v6775_v17  ;;  %v4334_v46 = vmul.f32 %v6809_v18, %v4297_v0  ;;  %v4335_v39 = vmul.f32 %v6809_v18, %v4298_v14  ;;  %5642 = vmatprep.mubr.msk.bf16.mxu1 %vm134_vm1, %v6214_v4  ;;  %v6087_v14 = vld [vmem:[%s8986_s0 + $0x20] sm:$0xff]  }
 0x319   :  { %v4303_v33 = vunpack.c.l.bf16 %v6087_v14  ;;  %v7380_v4 = vld [vmem:[%s8987_s1 + $0x84] ss:$8 sps:$4 sm:$0xff]  }
 0x31a   :  { %4893 = vmatprep.subr.bf16.mxu0 %v1072_v29  ;;  %v4373_v35 = vsel %vm134_vm1, %v4335_v39, 0.0 }
 0x31b   :  { %4894 = vmatpush3.bf16.msra.mxu0 %v1064_v53  ;;  %v4333_v53 = vmul.f32 %v6809_v18, %v4296_v59 }
 0x31c   :  { %4895 = vmatprep.subr.bf16.mxu0 %v1073_v32 }
 0x31d   :  { %v4367_v29 = vsel %vm134_vm1, %v4333_v53, 0.0 }
 0x31e   :  { %4368 = vadd.xlane.f32.xlu1 %v4367_v29 }
 0x31f   :  { %4896 = vmatpush3.bf16.msra.mxu0 %v1065_v3  ;;  %v4332_v3 = vmul.f32 %v6809_v18, %v4295_v19  ;;  %v4301_v19 = vunpack.c.l.bf16 %v6086_v13  ;;  %5643 = vmatmul.mubr.msk.bf16.gmra.mrb[48].mxu1 %vm134_vm1, %v6223_v5  ;;  %v7374_v5 = vld [vmem:[%s8987_s1 + $0x70] ss:$8 sps:$4 sm:$0xff]  }
 0x320   :  { %5646 = vmatprep.mubr.msk.bf16.mxu1 %vm134_vm1, %v6228_v6  ;;  %v7362_v6 = vld [vmem:[%s8987_s1 + $0x60] ss:$8 sps:$4 sm:$0xff]  }
 0x321   :  { %v4364_v32 = vsel %vm134_vm1, %v4332_v3, 0.0  ;;  %v4338_v0 = vmul.f32 %v6809_v18, %v4301_v19 }
 0x322   :  { %4365 = vadd.xlane.f32.xlu0 %v4364_v32  ;;  %4374 = vadd.xlane.f32.xlu1 %v4373_v35 }
 0x323   :  { %v6785_v1 = vpop.f32.mrb[80].mxu0 }
 0x324   :  { %v6787_v23 = vpop.f32.mrb[81].mxu0 }
 0x325   :  { %v6789_v47 = vpop.f32.mrb[82].mxu0 }
 0x326   :  { %v1075_v63 = vpack.c.bf16 %v6789_v47, %v6785_v1  ;;  %v6793_v15 = vpop.f32.mrb[83].mxu0 }
 0x327   :  { %v1074_v30 = vpack.c.bf16 %v6793_v15, %v6787_v23  ;;  %5647 = vmatmul.mubr.msk.bf16.gmra.mrb[52].mxu1 %vm134_vm1, %v6239_v7  ;;  %v7356_v7 = vld [vmem:[%s8987_s1 + $0x64] ss:$8 sps:$4 sm:$0xff]  }
 0x328   :  { %5650 = vmatprep.mubr.msk.bf16.mxu1 %vm134_vm1, %v6244_v8  ;;  %v7350_v8 = vld [vmem:[%s8987_s1 + $0x50] ss:$8 sps:$4 sm:$0xff]  }
 0x329   :  { %4897 = vmatprep.subr.bf16.mxu0 %v1074_v30 }
 0x32a   :  { %4898 = vmatpush3.bf16.msra.mxu0 %v1066_v36  ;;  %v6085_v36 = vld [vmem:[%s8986_s0 + $0x10] sm:$0xff]  }
 0x32b   :  { %4899 = vmatprep.subr.bf16.mxu0 %v1075_v63  ;;  %v4299_v27 = vunpack.c.l.bf16 %v6085_v36  ;;  %v4300_v58 = vunpack.c.h.bf16 %v6085_v36  ;;  %v4370_v63 = vsel %vm134_vm1, %v4334_v46, 0.0  ;;  %v4304_v46 = vunpack.c.h.bf16 %v6087_v14  ;;  %v6088_v36 = vld [vmem:[%s8986_s0 + $0x28] sm:$0xff]  }
 0x32c   :  { %4371 = vadd.xlane.f32.xlu0 %v4370_v63  ;;  %v4306_v32 = vunpack.c.h.bf16 %v6088_v36 }
 0x32d   :  { %v4336_v30 = vmul.f32 %v6809_v18, %v4299_v27  ;;  %v4337_v59 = vmul.f32 %v6809_v18, %v4300_v58  ;;  %v4305_v27 = vunpack.c.l.bf16 %v6088_v36  ;;  %v4341_v58 = vmul.f32 %v6809_v18, %v4304_v46 }
 0x32e   :  { %4900 = vmatpush3.bf16.msra.mxu0 %v1067_v26  ;;  %v4302_v26 = vunpack.c.h.bf16 %v6086_v13  ;;  %v4343_v35 = vmul.f32 %v6809_v18, %v4306_v32 }
 0x32f   :  { %v4376_v24 = vsel %vm134_vm1, %v4336_v30, 0.0  ;;  %v4379_v3 = vsel %vm134_vm1, %v4337_v59, 0.0  ;;  %v4342_v63 = vmul.f32 %v6809_v18, %v4305_v27  ;;  %v6089_v30 = vld [vmem:[%s8986_s0 + $0x30] sm:$0xff]   ;;  %v4391_v19 = vsel %vm134_vm1, %v4341_v58, 0.0  ;;  %v9117_v58 = vld [vmem:[#allocation9_spill] sm:$0xff] }
 0x330   :  { %v4339_v53 = vmul.f32 %v6809_v18, %v4302_v26  ;;  %4377 = vadd.xlane.f32.xlu0 %v4376_v24  ;;  %4380 = vadd.xlane.f32.xlu1 %v4379_v3  ;;  %v4307_v13 = vunpack.c.l.bf16 %v6089_v30  ;;  %v4308_v59 = vunpack.c.h.bf16 %v6089_v30  ;;  %v6090_v26 = vld [vmem:[%s8986_s0 + $0x38] sm:$0xff]   ;;  %v9116_v3 = vld [vmem:[#allocation23_spill] sm:$0xff] }
 0x331   :  { %1109 = vmatmul.mubr.bf16.vlgmr.msra.gmra.mrb[84].mxu0 %v6421_v25  ;;  %v4382_v25 = vsel %vm134_vm1, %v4338_v0, 0.0  ;;  %v4309_v24 = vunpack.c.l.bf16 %v6090_v26  ;;  %v4397_v0 = vsel %vm134_vm1, %v4343_v35, 0.0  ;;  %5651 = vmatmul.mubr.msk.bf16.gmra.mrb[56].mxu1 %vm134_vm1, %v9117_v58  ;;  %v7343_v58 = vld [vmem:[%s8987_s1 + $0x40] ss:$8 sps:$4 sm:$0xff]   ;;  %9150 = vst [vmem:[#allocation23_spill] sm:$0xff] %v7362_v6 }
 0x332   :  { %1116 = vmatprep.mubr.bf16.mxu0 %v6431_v31  ;;  %v4340_v31 = vmul.f32 %v6809_v18, %v4303_v33  ;;  %v4385_v39 = vsel %vm134_vm1, %v4339_v53, 0.0  ;;  %v4345_v14 = vmul.f32 %v6809_v18, %v4308_v59  ;;  %v4310_v33 = vunpack.c.h.bf16 %v6090_v26  ;;  %v9119_v59 = vld [vmem:[#allocation25_spill] sm:$0xff] }
 0x333   :  { %v4346_v46 = vmul.f32 %v6809_v18, %v4309_v24  ;;  %v6093_v24 = vld [vmem:[%s8986_s0 + $0x50] sm:$0xff]  }
 0x334   :  { %4383 = vadd.xlane.f32.xlu0 %v4382_v25  ;;  %4386 = vadd.xlane.f32.xlu1 %v4385_v39  ;;  %v4388_v29 = vsel %vm134_vm1, %v4340_v31, 0.0  ;;  %v6091_v25 = vld [vmem:[%s8986_s0 + $0x40] sm:$0xff]   ;;  %v4403_v36 = vsel %vm134_vm1, %v4345_v14, 0.0  ;;  %v4347_v27 = vmul.f32 %v6809_v18, %v4310_v33 }
 0x335   :  { %v4311_v31 = vunpack.c.l.bf16 %v6091_v25  ;;  %v4312_v39 = vunpack.c.h.bf16 %v6091_v25 }
 0x336   :  { %v4409_v30 = vsel %vm134_vm1, %v4347_v27, 0.0 }
 0x337   :  { %v4348_v32 = vmul.f32 %v6809_v18, %v4311_v31  ;;  %v6094_v31 = vld [vmem:[%s8986_s0 + $0x58] sm:$0xff]  }
 0x338   :  { %4389 = vadd.xlane.f32.xlu0 %v4388_v29  ;;  %4392 = vadd.xlane.f32.xlu1 %v4391_v19  ;;  %v6092_v29 = vld [vmem:[%s8986_s0 + $0x48] sm:$0xff]   ;;  %v9118_v19 = vld [vmem:[#allocation10_spill] sm:$0xff] }
 0x339   :  { %1117 = vmatmul.mubr.bf16.gmra.mrb[88].mxu0 %v6445_v37  ;;  %v4394_v37 = vsel %vm134_vm1, %v4342_v63, 0.0  ;;  %v4313_v63 = vunpack.c.l.bf16 %v6092_v29  ;;  %5654 = vmatprep.mubr.msk.bf16.mxu1 %vm134_vm1, %v9118_v19  ;;  %v4314_v35 = vunpack.c.h.bf16 %v6092_v29  ;;  %v9123_v29 = vld [vmem:[#allocation29_spill] sm:$0xff] }
 0x33a   :  { %1124 = vmatprep.mubr.bf16.mxu0 %v6455_v43  ;;  %v4344_v43 = vmul.f32 %v6809_v18, %v4307_v13  ;;  %v4349_v13 = vmul.f32 %v6809_v18, %v4312_v39  ;;  %9153 = vst [vmem:[#allocation29_spill] sm:$0xff] %v7380_v4 }
 0x33b   :  { %v4350_v26 = vmul.f32 %v6809_v18, %v4313_v63  ;;  %v4351_v33 = vmul.f32 %v6809_v18, %v4314_v35  ;;  %v6920_v63 = vld [vmem:[%s8987_s1 + $0x54] ss:$8 sps:$4 sm:$0xff]   ;;  %v6096_v35 = vld [vmem:[%s8986_s0 + $0x60] sm:$0xff]  }
 0x33c   :  { %4395 = vadd.xlane.f32.xlu0 %v4394_v37  ;;  %4398 = vadd.xlane.f32.xlu1 %v4397_v0  ;;  %v4400_v53 = vsel %vm134_vm1, %v4344_v43, 0.0  ;;  %v9120_v37 = vld [vmem:[#allocation27_spill] sm:$0xff]  ;;  %v4412_v43 = vsel %vm134_vm1, %v4348_v32, 0.0  ;;  %v4315_v0 = vunpack.c.l.bf16 %v6093_v24  ;;  %v4415_v14 = vsel %vm134_vm1, %v4349_v13, 0.0 }
 0x33d   :  { %v4421_v27 = vsel %vm134_vm1, %v4351_v33, 0.0  ;;  %v4318_v32 = vunpack.c.h.bf16 %v6094_v31  ;;  %v9125_v33 = vld [vmem:[#allocation14_spill] sm:$0xff]  ;;  %9152 = vst [vmem:[#allocation27_spill] sm:$0xff] %v7374_v5 }
 0x33e   :  { %v4352_v25 = vmul.f32 %v6809_v18, %v4315_v0 }
 0x340   :  { %4401 = vadd.xlane.f32.xlu0 %v4400_v53  ;;  %4404 = vadd.xlane.f32.xlu1 %v4403_v36  ;;  %v4418_v53 = vsel %vm134_vm1, %v4350_v26, 0.0  ;;  %v4317_v36 = vunpack.c.l.bf16 %v6094_v31  ;;  %v9128_v31 = vld [vmem:[#allocation15_spill] sm:$0xff] }
 0x341   :  { %1125 = vmatmul.mubr.bf16.gmra.mrb[92].mxu0 %v6469_v49  ;;  %v4406_v49 = vsel %vm134_vm1, %v4346_v46, 0.0  ;;  %v9121_v46 = vld [vmem:[#allocation11_spill] sm:$0xff] }
 0x342   :  { %1132 = vmatprep.mubr.bf16.mxu0 %v9116_v3  ;;  %v4316_v3 = vunpack.c.h.bf16 %v6093_v24  ;;  %5655 = vmatmul.mubr.msk.bf16.gmra.mrb[60].mxu1 %vm134_vm1, %v9121_v46  ;;  %v4354_v13 = vmul.f32 %v6809_v18, %v4317_v36  ;;  %v9124_v24 = vld [vmem:[#allocation13_spill] sm:$0xff]  ;;  %v9129_v36 = vld [vmem:[#allocation16_spill] sm:$0xff] }
 0x344   :  { %4407 = vadd.xlane.f32.xlu0 %v4406_v49  ;;  %4410 = vadd.xlane.f32.xlu1 %v4409_v30  ;;  %v4353_v39 = vmul.f32 %v6809_v18, %v4316_v3  ;;  %v9122_v49 = vld [vmem:[#allocation12_spill] sm:$0xff]  ;;  %v4424_v30 = vsel %vm134_vm1, %v4352_v25, 0.0  ;;  %v4430_v26 = vsel %vm134_vm1, %v4354_v13, 0.0  ;;  %v9126_v3 = vld [vmem:[#allocation18_spill] sm:$0xff] }
 0x345   :  { %5658 = vmatprep.mubr.msk.bf16.mxu1 %vm134_vm1, %v9122_v49  ;;  %v9135_v13 = vld [vmem:[#allocation26_spill] sm:$0xff]  ;;  %9154 = vst [vmem:[#allocation18_spill] sm:$0xff] %v7386_v2 }
 0x348   :  { %4413 = vadd.xlane.f32.xlu0 %v4412_v43  ;;  %4416 = vadd.xlane.f32.xlu1 %v4415_v14  ;;  %v4355_v43 = vmul.f32 %v6809_v18, %v4318_v32  ;;  %v9132_v32 = vld [vmem:[#allocation17_spill] sm:$0xff] }
 0x349   :  { %1133 = vmatmul.mubr.bf16.gmra.mrb[96].mxu0 %v9119_v59  ;;  %v4319_v59 = vunpack.c.l.bf16 %v6096_v35 }
 0x34a   :  { %1140 = vmatprep.mubr.bf16.mxu0 %v9120_v37  ;;  %v4427_v37 = vsel %vm134_vm1, %v4353_v39, 0.0  ;;  %5659 = vmatmul.mubr.msk.bf16.gmra.mrb[64].mxu1 %vm134_vm1, %v9124_v24  ;;  %v4433_v14 = vsel %vm134_vm1, %v4355_v43, 0.0  ;;  %v9131_v39 = vld [vmem:[#allocation21_spill] sm:$0xff]  ;;  %v9138_v43 = vld [vmem:[#allocation31_spill] sm:$0xff] }
 0x34b   :  { %v4356_v0 = vmul.f32 %v6809_v18, %v4319_v59  ;;  %5662 = vmatprep.mubr.msk.bf16.mxu1 %vm134_vm1, %v9125_v33  ;;  %v9136_v59 = vld [vmem:[#allocation28_spill] sm:$0xff] }
 0x34c   :  { %4419 = vadd.xlane.f32.xlu0 %v4418_v53  ;;  %4422 = vadd.xlane.f32.xlu1 %v4421_v27  ;;  %v9127_v53 = vld [vmem:[#allocation19_spill] sm:$0xff]  ;;  %v9130_v27 = vld [vmem:[#allocation20_spill] sm:$0xff] }
 0x34d   :  { %v4436_v25 = vsel %vm134_vm1, %v4356_v0, 0.0  ;;  %v4320_v0 = vunpack.c.h.bf16 %v6096_v35  ;;  %v6098_v35 = vld [vmem:[%s8986_s0 + $0x70] sm:$0xff]  }
 0x350   :  { %4425 = vadd.xlane.f32.xlu0 %v4424_v30  ;;  %4428 = vadd.xlane.f32.xlu1 %v4427_v37  ;;  %v9134_v30 = vld [vmem:[#allocation24_spill] sm:$0xff]  ;;  %v9137_v37 = vld [vmem:[#allocation30_spill] sm:$0xff] }
 0x351   :  { %1141 = vmatmul.mubr.bf16.gmra.mrb[100].mxu0 %v9123_v29  ;;  %v9133_v29 = vld [vmem:[#allocation22_spill] sm:$0xff] }
 0x352   :  { %1148 = vmatprep.mubr.bf16.mxu0 %v6920_v63  ;;  %5663 = vmatmul.mubr.msk.bf16.gmra.mrb[68].mxu1 %vm134_vm1, %v9128_v31 }
 0x353   :  { %5666 = vmatprep.mubr.msk.bf16.mxu1 %vm134_vm1, %v9129_v36 }
 0x354   :  { %4431 = vadd.xlane.f32.xlu0 %v4430_v26  ;;  %4434 = vadd.xlane.f32.xlu1 %v4433_v14  ;;  %v9139_v26 = vld [vmem:[#allocation32_spill] sm:$0xff]  ;;  %v9140_v14 = vld [vmem:[#allocation33_spill] sm:$0xff] }
 0x358   :  { %4437 = vadd.xlane.f32.xlu0 %v4436_v25 }
 0x359   :  { %1149 = vmatmul.mubr.bf16.gmra.mrb[104].mxu0 %v9126_v3  ;;  %v4357_v3 = vmul.f32 %v6809_v18, %v4320_v0  ;;  %v4324_v0 = vunpack.c.h.bf16 %v6098_v35 }
 0x35a   :  { %1156 = vmatprep.mubr.bf16.mxu0 %v9127_v53  ;;  %5667 = vmatmul.mubr.msk.bf16.gmra.mrb[72].mxu1 %vm134_vm1, %v9132_v32  ;;  %v6097_v53 = vld [vmem:[%s8986_s0 + $0x68] sm:$0xff]  }
 0x35b   :  { %v4321_v25 = vunpack.c.l.bf16 %v6097_v53 }
 0x361   :  { %1157 = vmatmul.mubr.bf16.gmra.mrb[108].mxu0 %v9130_v27  ;;  %v4439_v27 = vsel %vm134_vm1, %v4357_v3, 0.0 }
 0x362   :  { %1164 = vmatprep.mubr.bf16.mxu0 %v9131_v39  ;;  %v4358_v39 = vmul.f32 %v6809_v18, %v4321_v25  ;;  %4440 = vadd.xlane.f32.xlu1 %v4439_v27  ;;  %v9143_v27 = vld [vmem:[#allocation36_spill] sm:$0xff] }
 0x369   :  { %1165 = vmatmul.mubr.bf16.gmra.mrb[112].mxu0 %v9133_v29  ;;  %v4322_v29 = vunpack.c.h.bf16 %v6097_v53  ;;  %v4361_v53 = vmul.f32 %v6809_v18, %v4324_v0 }
 0x36a   :  { %1172 = vmatprep.mubr.bf16.mxu0 %v9134_v30  ;;  %v4442_v30 = vsel %vm134_vm1, %v4358_v39, 0.0  ;;  %v9144_v39 = vld [vmem:[#allocation37_spill] sm:$0xff] }
 0x36b   :  { %4443 = vadd.xlane.f32.xlu0 %v4442_v30  ;;  %v4451_v25 = vsel %vm134_vm1, %v4361_v53, 0.0 }
 0x371   :  { %1173 = vmatmul.mubr.bf16.gmra.mrb[116].mxu0 %v9135_v13  ;;  %v4359_v13 = vmul.f32 %v6809_v18, %v4322_v29  ;;  %v1322_v29 = vld [vmem:[%s8985_s2 + $0x18] sm:$0xf] }
 0x372   :  { %1180 = vmatprep.mubr.bf16.mxu0 %v9136_v59  ;;  %v4323_v59 = vunpack.c.l.bf16 %v6098_v35  ;;  %5992 = vmatprep.subr.msk.bf16.mxu1 %vm1537_vm3, %v1322_v29  ;;  %v1539_v30 = vsel %vm1537_vm3, %v1322_v29, 0  ;;  %v9147_v35 = vld [vmem:[#allocation40_spill] sm:$0xff] }
 0x373   :  { %5671 = vmatpush3.bf16.msra.mxu1 %v1539_v30  ;;  %v6998_v29 = vld [vmem:[%s8989_s4 + $0x10] ss:$0 sm:$0xff] }
 0x379   :  { %1181 = vmatmul.mubr.bf16.gmra.mrb[120].mxu0 %v9137_v37  ;;  %v9141_v37 = vld [vmem:[#allocation34_spill] sm:$0xff] }
 0x37a   :  { %1188 = vmatprep.mubr.bf16.mxu0 %v9138_v43  ;;  %v4445_v43 = vsel %vm134_vm1, %v4359_v13, 0.0  ;;  %v9145_v13 = vld [vmem:[#allocation38_spill] sm:$0xff] }
 0x37b   :  { %4446 = vadd.xlane.f32.xlu1 %v4445_v43  ;;  %v6099_v43 = vld [vmem:[%s8987_s1 + $0x4] ss:$8 sps:$4 sm:$0xff]  }
 0x37f   :  { %4452 = vadd.xlane.f32.xlu1 %v4451_v25  ;;  %v6992_v25 = vld [vmem:[%s8988_s3 + $0x8] ss:$0 sm:$0xff] }
 0x381   :  { %1189 = vmatmul.mubr.bf16.gmra.mrb[124].mxu0 %v9139_v26  ;;  %v4360_v26 = vmul.f32 %v6809_v18, %v4323_v59  ;;  %v9146_v18 = vld [vmem:[#allocation39_spill] sm:$0xff]  ;;  %v9148_v59 = vld [vmem:[#allocation41_spill] sm:$0xff] }
 0x382   :  { %1196 = vmatprep.mubr.bf16.mxu0 %v9140_v14  ;;  %v9142_v14 = vld [vmem:[#allocation35_spill] sm:$0xff] }
 0x383   :  { %v4448_v3 = vsel %vm134_vm1, %v4360_v26, 0.0 }
 0x384   :  { %4449 = vadd.xlane.f32.xlu0 %v4448_v3 }
 0x389   :  { %1197 = vmatmul.mubr.bf16.gmra.mrb[128].mxu0 %v9141_v37  ;;  %v9149_v37 = vld [vmem:[#allocation42_spill] sm:$0xff] }
 0x38a   :  { %1204 = vmatprep.mubr.bf16.mxu0 %v9142_v14 }
 0x391   :  { %1205 = vmatmul.mubr.bf16.gmra.mrb[132].mxu0 %v9143_v27 }
 0x392   :  { %1212 = vmatprep.mubr.bf16.mxu0 %v9144_v39 }
 0x399   :  { %1213 = vmatmul.mubr.bf16.gmra.mrb[136].mxu0 %v9145_v13 }
 0x39a   :  { %1220 = vmatprep.mubr.bf16.mxu0 %v9146_v18 }
 0x3a1   :  { %1221 = vmatmul.mubr.bf16.gmra.mrb[140].mxu0 %v9147_v35 }
 0x3a2   :  { %1228 = vmatprep.mubr.bf16.mxu0 %v9148_v59 }
 0x3a9   :  { %1229 = vmatmul.mubr.bf16.gmra.mrb[144].mxu0 %v9149_v37 }
 0x3aa   :  { %1750 = vmatprep.mubr.bf16.mxu0 %v6099_v43 }
 0x404   :  { %v4901_v26 = vpop.f32.mrb[84].mxu0 }
 0x405   :  { %v4902_v0 = vpop.f32.mrb[85].mxu0 }
 0x406   :  { %v4903_v14 = vadd.f32 %v4902_v0, %v4901_v26  ;;  %v4904_v3 = vpop.f32.mrb[86].mxu0 }
 0x407   :  { %v4905_v53 = vpop.f32.mrb[87].mxu0 }
 0x408   :  { %v1237_v27 = vadd.f32 %v4903_v14, %v6703_v62  ;;  %v4906_v39 = vadd.f32 %v4905_v53, %v4904_v3 }
 0x40a   :  { %v1238_v30 = vadd.f32 %v4906_v39, %v6709_v48  ;;  %v1274_v13 = vadd.f32 %v6992_v25, %v1237_v27 }
 0x40c   :  { %v1275_v18 = vadd.f32 %v6992_v25, %v1238_v30  ;;  %v4907_v35 = vpop.f32.mrb[88].mxu0  ;;  %v4135_v59 = vmul.f32 %v6998_v29, %v1274_v13 }
 0x40d   :  { %v4908_v37 = vpop.f32.mrb[89].mxu0 }
 0x40e   :  { %v4909_v43 = vadd.f32 %v4908_v37, %v4907_v35  ;;  %v4910_v26 = vpop.f32.mrb[90].mxu0  ;;  %v4167_v62 = vsel %vm1488_vm4, %v4135_v59, 0.0  ;;  %v7005_v0 = vpack.c.bf16 %v1275_v18, %v1274_v13  ;;  %v4136_v14 = vmul.f32 %v6998_v29, %v1275_v18 }
 0x40f   :  { %v4911_v3 = vpop.f32.mrb[91].mxu0  ;;  %4168 = vadd.xlane.f32.xlu0 %v4167_v62 }
 0x410   :  { %v1239_v48 = vadd.f32 %v6701_v50, %v4909_v43  ;;  %v4912_v53 = vadd.f32 %v4911_v3, %v4910_v26  ;;  %5672 = vmatprep.mubr.msk.bf16.mxu1 %vm1488_vm4, %v7005_v0  ;;  %v4170_v27 = vsel %vm1488_vm4, %v4136_v14, 0.0 }
 0x411   :  { %4171 = vadd.xlane.f32.xlu1 %v4170_v27 }
 0x412   :  { %v1240_v39 = vadd.f32 %v6705_v40, %v4912_v53  ;;  %v1276_v30 = vadd.f32 %v6992_v25, %v1239_v48 }
 0x414   :  { %v1277_v13 = vadd.f32 %v6992_v25, %v1240_v39  ;;  %v4913_v35 = vpop.f32.mrb[92].mxu0  ;;  %v4137_v18 = vmul.f32 %v6998_v29, %v1276_v30 }
 0x415   :  { %v4914_v59 = vpop.f32.mrb[93].mxu0 }
 0x416   :  { %v4915_v37 = vadd.f32 %v4914_v59, %v4913_v35  ;;  %v4916_v62 = vpop.f32.mrb[94].mxu0  ;;  %v7016_v50 = vpack.c.bf16 %v1277_v13, %v1276_v30  ;;  %v4173_v43 = vsel %vm1488_vm4, %v4137_v18, 0.0  ;;  %v4138_v26 = vmul.f32 %v6998_v29, %v1277_v13 }
 0x417   :  { %v4917_v14 = vpop.f32.mrb[95].mxu0  ;;  %4174 = vadd.xlane.f32.xlu0 %v4173_v43 }
 0x418   :  { %v1241_v40 = vadd.f32 %v4915_v37, %v6715_v52  ;;  %v4918_v3 = vadd.f32 %v4917_v14, %v4916_v62  ;;  %5673 = vmatmul.mubr.msk.bf16.vlgmr.msra.gmra.mrb[44].mxu1 %vm1488_vm4, %v7016_v50  ;;  %v4176_v48 = vsel %vm1488_vm4, %v4138_v26, 0.0 }
 0x419   :  { %4177 = vadd.xlane.f32.xlu1 %v4176_v48 }
 0x41a   :  { %v1242_v53 = vadd.f32 %v4918_v3, %v6721_v42  ;;  %v1278_v27 = vadd.f32 %v6992_v25, %v1241_v40 }
 0x41c   :  { %v1279_v39 = vadd.f32 %v6992_v25, %v1242_v53  ;;  %v4919_v30 = vpop.f32.mrb[96].mxu0  ;;  %v4139_v13 = vmul.f32 %v6998_v29, %v1278_v27 }
 0x41d   :  { %v4920_v35 = vpop.f32.mrb[97].mxu0 }
 0x41e   :  { %v4921_v18 = vadd.f32 %v4920_v35, %v4919_v30  ;;  %v4922_v59 = vpop.f32.mrb[98].mxu0  ;;  %v7028_v52 = vpack.c.bf16 %v1279_v39, %v1278_v27  ;;  %v4179_v37 = vsel %vm1488_vm4, %v4139_v13, 0.0  ;;  %v4140_v62 = vmul.f32 %v6998_v29, %v1279_v39 }
 0x41f   :  { %v4923_v43 = vpop.f32.mrb[99].mxu0  ;;  %4180 = vadd.xlane.f32.xlu0 %v4179_v37 }
 0x420   :  { %v1243_v42 = vadd.f32 %v6713_v11, %v4921_v18  ;;  %v4924_v26 = vadd.f32 %v4923_v43, %v4922_v59  ;;  %5676 = vmatprep.mubr.msk.bf16.mxu1 %vm1488_vm4, %v7028_v52  ;;  %v4182_v14 = vsel %vm1488_vm4, %v4140_v62, 0.0 }
 0x421   :  { %4183 = vadd.xlane.f32.xlu1 %v4182_v14 }
 0x422   :  { %v1244_v40 = vadd.f32 %v6717_v12, %v4924_v26  ;;  %v1280_v3 = vadd.f32 %v6992_v25, %v1243_v42 }
 0x424   :  { %v1281_v48 = vadd.f32 %v6992_v25, %v1244_v40  ;;  %v4925_v53 = vpop.f32.mrb[100].mxu0  ;;  %v4141_v27 = vmul.f32 %v6998_v29, %v1280_v3 }
 0x425   :  { %v4926_v39 = vpop.f32.mrb[101].mxu0 }
 0x426   :  { %v4927_v30 = vadd.f32 %v4926_v39, %v4925_v53  ;;  %v4928_v13 = vpop.f32.mrb[102].mxu0  ;;  %v7040_v11 = vpack.c.bf16 %v1281_v48, %v1280_v3  ;;  %v4185_v35 = vsel %vm1488_vm4, %v4141_v27, 0.0  ;;  %v4142_v18 = vmul.f32 %v6998_v29, %v1281_v48 }
 0x427   :  { %v4929_v59 = vpop.f32.mrb[103].mxu0  ;;  %4186 = vadd.xlane.f32.xlu0 %v4185_v35 }
 0x428   :  { %v1245_v12 = vadd.f32 %v4927_v30, %v6727_v34  ;;  %v4930_v37 = vadd.f32 %v4929_v59, %v4928_v13  ;;  %5677 = vmatmul.mubr.msk.bf16.gmra.mrb[48].mxu1 %vm1488_vm4, %v7040_v11  ;;  %v4188_v62 = vsel %vm1488_vm4, %v4142_v18, 0.0 }
 0x429   :  { %4189 = vadd.xlane.f32.xlu1 %v4188_v62 }
 0x42a   :  { %v1246_v43 = vadd.f32 %v4930_v37, %v6733_v16  ;;  %v1282_v42 = vadd.f32 %v6992_v25, %v1245_v12 }
 0x42c   :  { %v1283_v26 = vadd.f32 %v6992_v25, %v1246_v43  ;;  %v4931_v14 = vpop.f32.mrb[104].mxu0  ;;  %v4143_v40 = vmul.f32 %v6998_v29, %v1282_v42 }
 0x42d   :  { %v4932_v3 = vpop.f32.mrb[105].mxu0 }
 0x42e   :  { %v4933_v48 = vadd.f32 %v4932_v3, %v4931_v14  ;;  %v4934_v53 = vpop.f32.mrb[106].mxu0  ;;  %v7052_v34 = vpack.c.bf16 %v1283_v26, %v1282_v42  ;;  %v4191_v27 = vsel %vm1488_vm4, %v4143_v40, 0.0  ;;  %v4144_v39 = vmul.f32 %v6998_v29, %v1283_v26 }
 0x42f   :  { %v4935_v30 = vpop.f32.mrb[107].mxu0  ;;  %4192 = vadd.xlane.f32.xlu0 %v4191_v27 }
 0x430   :  { %v1247_v16 = vadd.f32 %v6725_v22, %v4933_v48  ;;  %v4936_v13 = vadd.f32 %v4935_v30, %v4934_v53  ;;  %5680 = vmatprep.mubr.msk.bf16.mxu1 %vm1488_vm4, %v7052_v34  ;;  %v4194_v35 = vsel %vm1488_vm4, %v4144_v39, 0.0 }
 0x431   :  { %4195 = vadd.xlane.f32.xlu1 %v4194_v35 }
 0x432   :  { %v1248_v18 = vadd.f32 %v6729_v44, %v4936_v13  ;;  %v1284_v59 = vadd.f32 %v6992_v25, %v1247_v16 }
 0x434   :  { %v1285_v12 = vadd.f32 %v6992_v25, %v1248_v18  ;;  %v4937_v37 = vpop.f32.mrb[108].mxu0  ;;  %v4145_v62 = vmul.f32 %v6998_v29, %v1284_v59 }
 0x435   :  { %v4938_v43 = vpop.f32.mrb[109].mxu0 }
 0x436   :  { %v4939_v42 = vadd.f32 %v4938_v43, %v4937_v37  ;;  %v4940_v26 = vpop.f32.mrb[110].mxu0  ;;  %v7064_v22 = vpack.c.bf16 %v1285_v12, %v1284_v59  ;;  %v4197_v14 = vsel %vm1488_vm4, %v4145_v62, 0.0  ;;  %v4146_v40 = vmul.f32 %v6998_v29, %v1285_v12 }
 0x437   :  { %v4941_v3 = vpop.f32.mrb[111].mxu0  ;;  %4198 = vadd.xlane.f32.xlu0 %v4197_v14 }
 0x438   :  { %v1249_v44 = vadd.f32 %v4939_v42, %v6739_v10  ;;  %v4942_v48 = vadd.f32 %v4941_v3, %v4940_v26  ;;  %5681 = vmatmul.mubr.msk.bf16.gmra.mrb[52].mxu1 %vm1488_vm4, %v7064_v22  ;;  %v4200_v53 = vsel %vm1488_vm4, %v4146_v40, 0.0 }
 0x439   :  { %4201 = vadd.xlane.f32.xlu1 %v4200_v53 }
 0x43a   :  { %v1250_v27 = vadd.f32 %v4942_v48, %v6745_v60  ;;  %v1286_v39 = vadd.f32 %v6992_v25, %v1249_v44 }
 0x43c   :  { %v1287_v30 = vadd.f32 %v6992_v25, %v1250_v27  ;;  %v4943_v16 = vpop.f32.mrb[112].mxu0  ;;  %v4147_v13 = vmul.f32 %v6998_v29, %v1286_v39 }
 0x43d   :  { %v4944_v35 = vpop.f32.mrb[113].mxu0 }
 0x43e   :  { %v4945_v18 = vadd.f32 %v4944_v35, %v4943_v16  ;;  %v4946_v59 = vpop.f32.mrb[114].mxu0  ;;  %v7076_v10 = vpack.c.bf16 %v1287_v30, %v1286_v39  ;;  %v4203_v12 = vsel %vm1488_vm4, %v4147_v13, 0.0  ;;  %v4148_v37 = vmul.f32 %v6998_v29, %v1287_v30 }
 0x43f   :  { %v4947_v62 = vpop.f32.mrb[115].mxu0  ;;  %4204 = vadd.xlane.f32.xlu0 %v4203_v12 }
 0x440   :  { %v1251_v60 = vadd.f32 %v6737_v57, %v4945_v18  ;;  %v4948_v43 = vadd.f32 %v4947_v62, %v4946_v59  ;;  %5684 = vmatprep.mubr.msk.bf16.mxu1 %vm1488_vm4, %v7076_v10  ;;  %v4206_v42 = vsel %vm1488_vm4, %v4148_v37, 0.0 }
 0x441   :  { %4207 = vadd.xlane.f32.xlu1 %v4206_v42 }
 0x442   :  { %v1252_v26 = vadd.f32 %v6741_v9, %v4948_v43  ;;  %v1288_v14 = vadd.f32 %v6992_v25, %v1251_v60 }
 0x444   :  { %v1289_v40 = vadd.f32 %v6992_v25, %v1252_v26  ;;  %v4949_v3 = vpop.f32.mrb[116].mxu0  ;;  %v4149_v44 = vmul.f32 %v6998_v29, %v1288_v14 }
 0x445   :  { %v4950_v48 = vpop.f32.mrb[117].mxu0 }
 0x446   :  { %v4951_v53 = vadd.f32 %v4950_v48, %v4949_v3  ;;  %v4952_v27 = vpop.f32.mrb[118].mxu0  ;;  %v7088_v57 = vpack.c.bf16 %v1289_v40, %v1288_v14  ;;  %v4209_v39 = vsel %vm1488_vm4, %v4149_v44, 0.0  ;;  %v4150_v30 = vmul.f32 %v6998_v29, %v1289_v40 }
 0x447   :  { %v4953_v16 = vpop.f32.mrb[119].mxu0  ;;  %4210 = vadd.xlane.f32.xlu0 %v4209_v39 }
 0x448   :  { %v1253_v9 = vadd.f32 %v4951_v53, %v6751_v61  ;;  %v4954_v13 = vadd.f32 %v4953_v16, %v4952_v27  ;;  %5685 = vmatmul.mubr.msk.bf16.gmra.mrb[56].mxu1 %vm1488_vm4, %v7088_v57  ;;  %v4212_v35 = vsel %vm1488_vm4, %v4150_v30, 0.0 }
 0x449   :  { %4213 = vadd.xlane.f32.xlu1 %v4212_v35 }
 0x44a   :  { %v1254_v18 = vadd.f32 %v4954_v13, %v6757_v41  ;;  %v1290_v59 = vadd.f32 %v6992_v25, %v1253_v9 }
 0x44c   :  { %v1291_v12 = vadd.f32 %v6992_v25, %v1254_v18  ;;  %v4955_v37 = vpop.f32.mrb[120].mxu0  ;;  %v4151_v62 = vmul.f32 %v6998_v29, %v1290_v59 }
 0x44d   :  { %v4956_v60 = vpop.f32.mrb[121].mxu0 }
 0x44e   :  { %v4957_v43 = vadd.f32 %v4956_v60, %v4955_v37  ;;  %v4958_v42 = vpop.f32.mrb[122].mxu0  ;;  %v7100_v61 = vpack.c.bf16 %v1291_v12, %v1290_v59  ;;  %v4215_v26 = vsel %vm1488_vm4, %v4151_v62, 0.0  ;;  %v4152_v14 = vmul.f32 %v6998_v29, %v1291_v12 }
 0x44f   :  { %v4959_v40 = vpop.f32.mrb[123].mxu0  ;;  %4216 = vadd.xlane.f32.xlu0 %v4215_v26 }
 0x450   :  { %v1255_v41 = vadd.f32 %v6749_v45, %v4957_v43  ;;  %v4960_v3 = vadd.f32 %v4959_v40, %v4958_v42  ;;  %5688 = vmatprep.mubr.msk.bf16.mxu1 %vm1488_vm4, %v7100_v61  ;;  %v4218_v44 = vsel %vm1488_vm4, %v4152_v14, 0.0 }
 0x451   :  { %4219 = vadd.xlane.f32.xlu1 %v4218_v44 }
 0x452   :  { %v1256_v48 = vadd.f32 %v6753_v55, %v4960_v3  ;;  %v1292_v53 = vadd.f32 %v6992_v25, %v1255_v41 }
 0x454   :  { %v1293_v27 = vadd.f32 %v6992_v25, %v1256_v48  ;;  %v4961_v39 = vpop.f32.mrb[124].mxu0  ;;  %v4153_v30 = vmul.f32 %v6998_v29, %v1292_v53 }
 0x455   :  { %v4962_v16 = vpop.f32.mrb[125].mxu0 }
 0x456   :  { %v4963_v9 = vadd.f32 %v4962_v16, %v4961_v39  ;;  %v4964_v13 = vpop.f32.mrb[126].mxu0  ;;  %v7112_v45 = vpack.c.bf16 %v1293_v27, %v1292_v53  ;;  %v4221_v35 = vsel %vm1488_vm4, %v4153_v30, 0.0  ;;  %v4154_v18 = vmul.f32 %v6998_v29, %v1293_v27 }
 0x457   :  { %v4965_v59 = vpop.f32.mrb[127].mxu0  ;;  %4222 = vadd.xlane.f32.xlu0 %v4221_v35 }
 0x458   :  { %v1257_v55 = vadd.f32 %v4963_v9, %v6763_v56  ;;  %v4966_v12 = vadd.f32 %v4965_v59, %v4964_v13  ;;  %5689 = vmatmul.mubr.msk.bf16.gmra.mrb[60].mxu1 %vm1488_vm4, %v7112_v45  ;;  %v4224_v37 = vsel %vm1488_vm4, %v4154_v18, 0.0 }
 0x459   :  { %4225 = vadd.xlane.f32.xlu1 %v4224_v37 }
 0x45a   :  { %v1258_v62 = vadd.f32 %v4966_v12, %v6769_v51  ;;  %v1294_v60 = vadd.f32 %v6992_v25, %v1257_v55 }
 0x45c   :  { %v1295_v43 = vadd.f32 %v6992_v25, %v1258_v62  ;;  %v4967_v42 = vpop.f32.mrb[128].mxu0  ;;  %v4155_v26 = vmul.f32 %v6998_v29, %v1294_v60 }
 0x45d   :  { %v4968_v14 = vpop.f32.mrb[129].mxu0 }
 0x45e   :  { %v4969_v40 = vadd.f32 %v4968_v14, %v4967_v42  ;;  %v4970_v41 = vpop.f32.mrb[130].mxu0  ;;  %v7124_v56 = vpack.c.bf16 %v1295_v43, %v1294_v60  ;;  %v4227_v3 = vsel %vm1488_vm4, %v4155_v26, 0.0  ;;  %v4156_v44 = vmul.f32 %v6998_v29, %v1295_v43 }
 0x45f   :  { %v4971_v48 = vpop.f32.mrb[131].mxu0  ;;  %4228 = vadd.xlane.f32.xlu0 %v4227_v3 }
 0x460   :  { %v1259_v51 = vadd.f32 %v6761_v38, %v4969_v40  ;;  %v4972_v53 = vadd.f32 %v4971_v48, %v4970_v41  ;;  %5692 = vmatprep.mubr.msk.bf16.mxu1 %vm1488_vm4, %v7124_v56  ;;  %v4230_v27 = vsel %vm1488_vm4, %v4156_v44, 0.0 }
 0x461   :  { %4231 = vadd.xlane.f32.xlu1 %v4230_v27 }
 0x462   :  { %v1260_v39 = vadd.f32 %v6765_v20, %v4972_v53  ;;  %v1296_v30 = vadd.f32 %v6992_v25, %v1259_v51 }
 0x464   :  { %v1297_v16 = vadd.f32 %v6992_v25, %v1260_v39  ;;  %v4973_v9 = vpop.f32.mrb[132].mxu0  ;;  %v4157_v13 = vmul.f32 %v6998_v29, %v1296_v30 }
 0x465   :  { %v4974_v35 = vpop.f32.mrb[133].mxu0 }
 0x466   :  { %v4975_v18 = vadd.f32 %v4974_v35, %v4973_v9  ;;  %v4976_v59 = vpop.f32.mrb[134].mxu0  ;;  %v7136_v38 = vpack.c.bf16 %v1297_v16, %v1296_v30  ;;  %v4233_v55 = vsel %vm1488_vm4, %v4157_v13, 0.0  ;;  %v4158_v12 = vmul.f32 %v6998_v29, %v1297_v16 }
 0x467   :  { %v4977_v37 = vpop.f32.mrb[135].mxu0  ;;  %4234 = vadd.xlane.f32.xlu0 %v4233_v55 }
 0x468   :  { %v1261_v20 = vadd.f32 %v4975_v18, %v6775_v17  ;;  %v4978_v62 = vadd.f32 %v4977_v37, %v4976_v59  ;;  %5693 = vmatmul.mubr.msk.bf16.gmra.mrb[64].mxu1 %vm1488_vm4, %v7136_v38  ;;  %v4236_v60 = vsel %vm1488_vm4, %v4158_v12, 0.0 }
 0x469   :  { %4237 = vadd.xlane.f32.xlu1 %v4236_v60 }
 0x46a   :  { %v1262_v43 = vadd.f32 %v4978_v62, %v6781_v54  ;;  %v1298_v42 = vadd.f32 %v6992_v25, %v1261_v20 }
 0x46c   :  { %v1299_v26 = vadd.f32 %v6992_v25, %v1262_v43  ;;  %v4979_v14 = vpop.f32.mrb[136].mxu0  ;;  %v4159_v40 = vmul.f32 %v6998_v29, %v1298_v42 }
 0x46d   :  { %v4980_v41 = vpop.f32.mrb[137].mxu0 }
 0x46e   :  { %v4981_v3 = vadd.f32 %v4980_v41, %v4979_v14  ;;  %v4982_v44 = vpop.f32.mrb[138].mxu0  ;;  %v7148_v17 = vpack.c.bf16 %v1299_v26, %v1298_v42  ;;  %v4239_v48 = vsel %vm1488_vm4, %v4159_v40, 0.0  ;;  %v4160_v51 = vmul.f32 %v6998_v29, %v1299_v26 }
 0x46f   :  { %v4983_v53 = vpop.f32.mrb[139].mxu0  ;;  %4240 = vadd.xlane.f32.xlu0 %v4239_v48 }
 0x470   :  { %v1263_v54 = vadd.f32 %v6773_v28, %v4981_v3  ;;  %v4984_v27 = vadd.f32 %v4983_v53, %v4982_v44  ;;  %5696 = vmatprep.mubr.msk.bf16.mxu1 %vm1488_vm4, %v7148_v17  ;;  %v4242_v39 = vsel %vm1488_vm4, %v4160_v51, 0.0 }
 0x471   :  { %4243 = vadd.xlane.f32.xlu1 %v4242_v39 }
 0x472   :  { %v1264_v30 = vadd.f32 %v6777_v21, %v4984_v27  ;;  %v1300_v16 = vadd.f32 %v6992_v25, %v1263_v54 }
 0x474   :  { %v1301_v9 = vadd.f32 %v6992_v25, %v1264_v30  ;;  %v4985_v13 = vpop.f32.mrb[140].mxu0  ;;  %v4161_v35 = vmul.f32 %v6998_v29, %v1300_v16 }
 0x475   :  { %v4986_v18 = vpop.f32.mrb[141].mxu0 }
 0x476   :  { %v4987_v59 = vadd.f32 %v4986_v18, %v4985_v13  ;;  %v4988_v55 = vpop.f32.mrb[142].mxu0  ;;  %v7160_v28 = vpack.c.bf16 %v1301_v9, %v1300_v16  ;;  %v4245_v12 = vsel %vm1488_vm4, %v4161_v35, 0.0  ;;  %v4162_v37 = vmul.f32 %v6998_v29, %v1301_v9 }
 0x477   :  { %v4989_v20 = vpop.f32.mrb[143].mxu0  ;;  %4246 = vadd.xlane.f32.xlu0 %v4245_v12 }
 0x478   :  { %v1265_v21 = vadd.f32 %v4987_v59, %v6787_v23  ;;  %v4990_v62 = vadd.f32 %v4989_v20, %v4988_v55  ;;  %5697 = vmatmul.mubr.msk.bf16.gmra.mrb[68].mxu1 %vm1488_vm4, %v7160_v28  ;;  %v4248_v60 = vsel %vm1488_vm4, %v4162_v37, 0.0 }
 0x479   :  { %4249 = vadd.xlane.f32.xlu1 %v4248_v60 }
 0x47a   :  { %v1266_v43 = vadd.f32 %v4990_v62, %v6793_v15  ;;  %v1302_v42 = vadd.f32 %v6992_v25, %v1265_v21 }
 0x47c   :  { %v1303_v26 = vadd.f32 %v6992_v25, %v1266_v43  ;;  %v4991_v14 = vpop.f32.mrb[144].mxu0  ;;  %v4163_v40 = vmul.f32 %v6998_v29, %v1302_v42 }
 0x47d   :  { %v4992_v41 = vpop.f32.mrb[145].mxu0 }
 0x47e   :  { %v4993_v3 = vadd.f32 %v4992_v41, %v4991_v14  ;;  %v4994_v44 = vpop.f32.mrb[146].mxu0  ;;  %v7172_v23 = vpack.c.bf16 %v1303_v26, %v1302_v42  ;;  %v4251_v48 = vsel %vm1488_vm4, %v4163_v40, 0.0  ;;  %v4164_v51 = vmul.f32 %v6998_v29, %v1303_v26 }
 0x47f   :  { %v4995_v53 = vpop.f32.mrb[147].mxu0  ;;  %4252 = vadd.xlane.f32.xlu0 %v4251_v48 }
 0x480   :  { %v1267_v15 = vadd.f32 %v6785_v1, %v4993_v3  ;;  %v4996_v54 = vadd.f32 %v4995_v53, %v4994_v44  ;;  %5700 = vmatprep.mubr.msk.bf16.mxu1 %vm1488_vm4, %v7172_v23  ;;  %v4254_v27 = vsel %vm1488_vm4, %v4164_v51, 0.0 }
 0x481   :  { %4255 = vadd.xlane.f32.xlu1 %v4254_v27 }
 0x482   :  { %v1268_v39 = vadd.f32 %v6789_v47, %v4996_v54  ;;  %v1304_v30 = vadd.f32 %v6992_v25, %v1267_v15 }
 0x484   :  { %v1305_v16 = vadd.f32 %v6992_v25, %v1268_v39  ;;  %v4165_v9 = vmul.f32 %v6998_v29, %v1304_v30 }
 0x486   :  { %v7184_v13 = vpack.c.bf16 %v1305_v16, %v1304_v30  ;;  %v4257_v35 = vsel %vm1488_vm4, %v4165_v9, 0.0  ;;  %v4166_v1 = vmul.f32 %v6998_v29, %v1305_v16 }
 0x487   :  { %4258 = vadd.xlane.f32.xlu0 %v4257_v35 }
 0x488   :  { %5701 = vmatmul.mubr.msk.bf16.gmra.mrb[72].mxu1 %vm1488_vm4, %v7184_v13  ;;  %v4260_v18 = vsel %vm1488_vm4, %v4166_v1, 0.0 }
 0x489   :  { %4261 = vadd.xlane.f32.xlu1 %v4260_v18 }
 0x4eb   :  { %v7191_v47 = vpop.f32.mrb[44].mxu1 }
 0x4ec   :  { %v7193_v59 = vpop.f32.mrb[45].mxu1 }
 0x4ed   :  { %v7195_v25 = vpop.f32.mrb[46].mxu1 }
 0x4ee   :  { %v1703_v55 = vpack.c.bf16 %v7195_v25, %v7191_v47  ;;  %v7199_v12 = vpop.f32.mrb[47].mxu1 }
 0x4ef   :  { %v1702_v29 = vpack.c.bf16 %v7199_v12, %v7193_v59 }
 0x4fb   :  { %v7203_v37 = vpop.f32.mrb[48].mxu1 }
 0x4fc   :  { %v7205_v20 = vpop.f32.mrb[49].mxu1 }
 0x4fd   :  { %v7207_v21 = vpop.f32.mrb[50].mxu1 }
 0x4fe   :  { %v1705_v62 = vpack.c.bf16 %v7207_v21, %v7203_v37  ;;  %v7211_v60 = vpop.f32.mrb[51].mxu1 }
 0x4ff   :  { %v1704_v43 = vpack.c.bf16 %v7211_v60, %v7205_v20 }
 0x50b   :  { %v7215_v42 = vpop.f32.mrb[52].mxu1 }
 0x50c   :  { %v7217_v26 = vpop.f32.mrb[53].mxu1 }
 0x50d   :  { %v7219_v14 = vpop.f32.mrb[54].mxu1 }
 0x50e   :  { %v1707_v40 = vpack.c.bf16 %v7219_v14, %v7215_v42  ;;  %v7223_v41 = vpop.f32.mrb[55].mxu1 }
 0x50f   :  { %v1706_v3 = vpack.c.bf16 %v7223_v41, %v7217_v26 }
 0x51b   :  { %v7227_v44 = vpop.f32.mrb[56].mxu1 }
 0x51c   :  { %v7229_v48 = vpop.f32.mrb[57].mxu1 }
 0x51d   :  { %v7231_v51 = vpop.f32.mrb[58].mxu1 }
 0x51e   :  { %v1709_v53 = vpack.c.bf16 %v7231_v51, %v7227_v44  ;;  %v7235_v15 = vpop.f32.mrb[59].mxu1 }
 0x51f   :  { %v1708_v54 = vpack.c.bf16 %v7235_v15, %v7229_v48 }
 0x52b   :  { %v7239_v27 = vpop.f32.mrb[60].mxu1 }
 0x52c   :  { %v7241_v39 = vpop.f32.mrb[61].mxu1 }
 0x52d   :  { %v7243_v30 = vpop.f32.mrb[62].mxu1 }
 0x52e   :  { %v1711_v16 = vpack.c.bf16 %v7243_v30, %v7239_v27  ;;  %v7247_v9 = vpop.f32.mrb[63].mxu1 }
 0x52f   :  { %v1710_v35 = vpack.c.bf16 %v7247_v9, %v7241_v39 }
 0x531   :  { %5031 = vmatprep.subr.bf16.mxu0 %v1710_v35 }
 0x532   :  { %5032 = vmatpush3.bf16.msra.mxu0 %v1702_v29 }
 0x533   :  { %5033 = vmatprep.subr.bf16.mxu0 %v1711_v16 }
 0x536   :  { %5034 = vmatpush3.bf16.msra.mxu0 %v1703_v55 }
 0x53b   :  { %v7251_v1 = vpop.f32.mrb[64].mxu1 }
 0x53c   :  { %v7253_v18 = vpop.f32.mrb[65].mxu1 }
 0x53d   :  { %v7255_v32 = vpop.f32.mrb[66].mxu1 }
 0x53e   :  { %v1713_v36 = vpack.c.bf16 %v7255_v32, %v7251_v1  ;;  %v7259_v31 = vpop.f32.mrb[67].mxu1 }
 0x53f   :  { %v1712_v33 = vpack.c.bf16 %v7259_v31, %v7253_v18 }
 0x541   :  { %5035 = vmatprep.subr.bf16.mxu0 %v1712_v33 }
 0x542   :  { %5036 = vmatpush3.bf16.msra.mxu0 %v1704_v43 }
 0x543   :  { %5037 = vmatprep.subr.bf16.mxu0 %v1713_v36 }
 0x546   :  { %5038 = vmatpush3.bf16.msra.mxu0 %v1705_v62 }
 0x54b   :  { %v7263_v29 = vpop.f32.mrb[68].mxu1 }
 0x54c   :  { %v7265_v55 = vpop.f32.mrb[69].mxu1 }
 0x54d   :  { %v7267_v16 = vpop.f32.mrb[70].mxu1 }
 0x54e   :  { %v1715_v35 = vpack.c.bf16 %v7267_v16, %v7263_v29  ;;  %v7271_v24 = vpop.f32.mrb[71].mxu1 }
 0x54f   :  { %v1714_v49 = vpack.c.bf16 %v7271_v24, %v7265_v55 }
 0x551   :  { %5039 = vmatprep.subr.bf16.mxu0 %v1714_v49  ;;  %v2485_v49 = vld [vmem:[%s8985_s2 + $0x40] sm:$0xf] }
 0x552   :  { %5040 = vmatpush3.bf16.msra.mxu0 %v1706_v3  ;;  %v7295_v3 = vld [vmem:[%s8987_s1] ss:$8 sps:$4 sm:$0xff]  }
 0x553   :  { %5041 = vmatprep.subr.bf16.mxu0 %v1715_v35  ;;  %v7319_v35 = vld [vmem:[%s8987_s1 + $0x20] ss:$8 sps:$4 sm:$0xff]  }
 0x556   :  { %5042 = vmatpush3.bf16.msra.mxu0 %v1707_v40  ;;  %v2487_v40 = vsel %vm1537_vm3, %v2485_v49, 0 }
 0x55b   :  { %v7275_v33 = vpop.f32.mrb[72].mxu1 }
 0x55c   :  { %v7277_v36 = vpop.f32.mrb[73].mxu1 }
 0x55d   :  { %v7279_v62 = vpop.f32.mrb[74].mxu1 }
 0x55e   :  { %v1717_v43 = vpack.c.bf16 %v7279_v62, %v7275_v33  ;;  %v7283_v46 = vpop.f32.mrb[75].mxu1 }
 0x55f   :  { %v1716_v19 = vpack.c.bf16 %v7283_v46, %v7277_v36 }
 0x561   :  { %5043 = vmatprep.subr.bf16.mxu0 %v1716_v19  ;;  %v7301_v19 = vld [vmem:[%s8987_s1 + $0x14] ss:$8 sps:$4 sm:$0xff]  }
 0x562   :  { %5044 = vmatpush3.bf16.msra.mxu0 %v1708_v54  ;;  %v7313_v54 = vld [vmem:[%s8987_s1 + $0x24] ss:$8 sps:$4 sm:$0xff]  }
 0x563   :  { %5045 = vmatprep.subr.bf16.mxu0 %v1717_v43  ;;  %v7325_v43 = vld [vmem:[%s8987_s1 + $0x34] ss:$8 sps:$4 sm:$0xff]  }
 0x566   :  { %5046 = vmatpush3.bf16.msra.mxu0 %v1709_v53  ;;  %v7307_v53 = vld [vmem:[%s8987_s1 + $0x10] ss:$8 sps:$4 sm:$0xff]  }
 0x567   :  { %5993 = vmatprep.subr.msk.bf16.mxu0 %vm1537_vm3, %v2485_v49  ;;  %v7331_v49 = vld [vmem:[%s8987_s1 + $0x30] ss:$8 sps:$4 sm:$0xff]  }
 0x569   :  { %1751 = vmatmul.mubr.bf16.vlgmr.msra.gmra.mrb[148].mxu0 %v7295_v3 }
 0x56a   :  { %1758 = vmatprep.mubr.bf16.mxu0 %v7301_v19  ;;  %5741 = vmatpush3.bf16.msra.mxu0 %v2487_v40  ;;  %v7337_v40 = vld [vmem:[%s8987_s1 + $0x44] ss:$8 sps:$4 sm:$0xff]  }
 0x571   :  { %1759 = vmatmul.mubr.bf16.gmra.mrb[152].mxu0 %v7307_v53 }
 0x572   :  { %1766 = vmatprep.mubr.bf16.mxu0 %v7313_v54 }
 0x579   :  { %1767 = vmatmul.mubr.bf16.gmra.mrb[156].mxu0 %v7319_v35 }
 0x57a   :  { %1774 = vmatprep.mubr.bf16.mxu0 %v7325_v43 }
 0x581   :  { %1775 = vmatmul.mubr.bf16.gmra.mrb[160].mxu0 %v7331_v49 }
 0x582   :  { %1782 = vmatprep.mubr.bf16.mxu0 %v7337_v40 }
 0x589   :  { %1783 = vmatmul.mubr.bf16.gmra.mrb[164].mxu0 %v7343_v58 }
 0x58a   :  { %1790 = vmatprep.mubr.bf16.mxu0 %v6920_v63  ;;  %v7368_v63 = vld [vmem:[%s8987_s1 + $0x74] ss:$8 sps:$4 sm:$0xff]  }
 0x58b   :  { %9151 = vst [vmem:[#allocation25_spill] sm:$0xff] %v7368_v63 }
 0x591   :  { %1791 = vmatmul.mubr.bf16.gmra.mrb[168].mxu0 %v7350_v8 }
 0x592   :  { %1798 = vmatprep.mubr.bf16.mxu0 %v7356_v7 }
 0x599   :  { %1799 = vmatmul.mubr.bf16.gmra.mrb[172].mxu0 %v7362_v6  ;;  %v7458_v6 = vld [vmem:[%s8987_s1 + $0xe4] ss:$8 sps:$4 sm:$0xff]  }
 0x59a   :  { %1806 = vmatprep.mubr.bf16.mxu0 %v7368_v63  ;;  %v7392_v63 = vld [vmem:[%s8987_s1 + $0x94] ss:$8 sps:$4 sm:$0xff]  }
 0x59b   :  { %9155 = vst [vmem:[#allocation19_spill] sm:$0xff] %v7392_v63 }
 0x5a1   :  { %1807 = vmatmul.mubr.bf16.gmra.mrb[176].mxu0 %v7374_v5  ;;  %v7398_v5 = vld [vmem:[%s8987_s1 + $0x90] ss:$8 sps:$4 sm:$0xff]  }
 0x5a2   :  { %1814 = vmatprep.mubr.bf16.mxu0 %v7380_v4  ;;  %9156 = vst [vmem:[#allocation20_spill] sm:$0xff] %v7398_v5  ;;  %v7404_v4 = vld [vmem:[%s8987_s1 + $0xa4] ss:$8 sps:$4 sm:$0xff]  }
 0x5a3   :  { %9157 = vst [vmem:[#allocation21_spill] sm:$0xff] %v7404_v4 }
 0x5a9   :  { %1815 = vmatmul.mubr.bf16.gmra.mrb[180].mxu0 %v7386_v2  ;;  %v7410_v2 = vld [vmem:[%s8987_s1 + $0xa0] ss:$8 sps:$4 sm:$0xff]  }
 0x5aa   :  { %1822 = vmatprep.mubr.bf16.mxu0 %v7392_v63  ;;  %9158 = vst [vmem:[#allocation22_spill] sm:$0xff] %v7410_v2  ;;  %v7416_v63 = vld [vmem:[%s8987_s1 + $0xb4] ss:$8 sps:$4 sm:$0xff]  }
 0x5ab   :  { %9159 = vst [vmem:[#allocation24_spill] sm:$0xff] %v7416_v63 }
 0x5b1   :  { %1823 = vmatmul.mubr.bf16.gmra.mrb[184].mxu0 %v7398_v5  ;;  %v7422_v5 = vld [vmem:[%s8987_s1 + $0xb0] ss:$8 sps:$4 sm:$0xff]  }
 0x5b2   :  { %1830 = vmatprep.mubr.bf16.mxu0 %v7404_v4  ;;  %9160 = vst [vmem:[#allocation26_spill] sm:$0xff] %v7422_v5  ;;  %v7428_v4 = vld [vmem:[%s8987_s1 + $0xc4] ss:$8 sps:$4 sm:$0xff]  }
 0x5b3   :  { %9161 = vst [vmem:[#allocation28_spill] sm:$0xff] %v7428_v4 }
 0x5b9   :  { %1831 = vmatmul.mubr.bf16.gmra.mrb[188].mxu0 %v7410_v2  ;;  %v7434_v2 = vld [vmem:[%s8987_s1 + $0xc0] ss:$8 sps:$4 sm:$0xff]  }
 0x5ba   :  { %1838 = vmatprep.mubr.bf16.mxu0 %v7416_v63  ;;  %9162 = vst [vmem:[#allocation30_spill] sm:$0xff] %v7434_v2  ;;  %v6062_v63 = vld [vmem:[%s8985_s2 + $0x28] sm:$0xff]  }
 0x5bb   :  { %5704 = vmatprep.subr.bf16.mxu1 %v6062_v63 }
 0x5bc   :  { %5705 = vmatpush3.bf16.msra.mxu1 %v6062_v63  ;;  %v7464_v63 = vld [vmem:[%s8987_s1 + $0xe0] ss:$8 sps:$4 sm:$0xff]  }
 0x5bd   :  { %9164 = vst [vmem:[#allocation32_spill] sm:$0xff] %v7464_v63 }
 0x5c1   :  { %1839 = vmatmul.mubr.bf16.gmra.mrb[192].mxu0 %v7422_v5  ;;  %v7443_v5 = vld [vmem:[%s8987_s1 + $0xd4] ss:$8 sps:$4 sm:$0xff]  }
 0x5c2   :  { %1846 = vmatprep.mubr.bf16.mxu0 %v7428_v4  ;;  %v6063_v4 = vld [vmem:[%s8985_s2 + $0x30] sm:$0xff]  }
 0x5c3   :  { %5706 = vmatprep.subr.bf16.mxu1 %v6063_v4 }
 0x5c4   :  { %5707 = vmatpush3.bf16.msra.mxu1 %v6063_v4  ;;  %v7470_v4 = vld [vmem:[%s8987_s1 + $0xf4] ss:$8 sps:$4 sm:$0xff]  }
 0x5c5   :  { %9165 = vst [vmem:[#allocation33_spill] sm:$0xff] %v7470_v4 }
 0x5c9   :  { %1847 = vmatmul.mubr.bf16.gmra.mrb[196].mxu0 %v7434_v2  ;;  %v7452_v2 = vld [vmem:[%s8987_s1 + $0xd0] ss:$8 sps:$4 sm:$0xff]  }
 0x5ca   :  { %1854 = vmatprep.mubr.bf16.mxu0 %v7443_v5  ;;  %9163 = vst [vmem:[#allocation31_spill] sm:$0xff] %v7452_v2 }
 0x5d1   :  { %1855 = vmatmul.mubr.bf16.gmra.mrb[200].mxu0 %v7452_v2  ;;  %v7476_v2 = vld [vmem:[%s8987_s1 + $0xf0] ss:$8 sps:$4 sm:$0xff]  }
 0x5d2   :  { %1862 = vmatprep.mubr.bf16.mxu0 %v7458_v6  ;;  %9166 = vst [vmem:[#allocation34_spill] sm:$0xff] %v7476_v2 }
 0x5d9   :  { %1863 = vmatmul.mubr.bf16.gmra.mrb[204].mxu0 %v7464_v63 }
 0x5da   :  { %1870 = vmatprep.mubr.bf16.mxu0 %v7470_v4 }
 0x5e1   :  { %1871 = vmatmul.mubr.bf16.gmra.mrb[208].mxu0 %v7476_v2 }
 0x5e2   :  { %5742 = vmatprep.mubr.msk.bf16.mxu0 %vm1488_vm4, %v7005_v0 }
 0x5e9   :  { %5743 = vmatmul.mubr.msk.bf16.vlgmr.msra.gmra.mrb[212].mxu0 %vm1488_vm4, %v7016_v50 }
 0x5ea   :  { %5746 = vmatprep.mubr.msk.bf16.mxu0 %vm1488_vm4, %v7028_v52 }
 0x5f1   :  { %5747 = vmatmul.mubr.msk.bf16.gmra.mrb[216].mxu0 %vm1488_vm4, %v7040_v11 }
 0x5f2   :  { %5750 = vmatprep.mubr.msk.bf16.mxu0 %vm1488_vm4, %v7052_v34  ;;  %v7514_v34 = vld [vmem:[%s8988_s3 + $0x10] ss:$0 sm:$0xff] }
 0x5f9   :  { %5751 = vmatmul.mubr.msk.bf16.gmra.mrb[220].mxu0 %vm1488_vm4, %v7064_v22 }
 0x5fa   :  { %5754 = vmatprep.mubr.msk.bf16.mxu0 %vm1488_vm4, %v7076_v10 }
 0x601   :  { %5755 = vmatmul.mubr.msk.bf16.gmra.mrb[224].mxu0 %vm1488_vm4, %v7088_v57 }
 0x602   :  { %5758 = vmatprep.mubr.msk.bf16.mxu0 %vm1488_vm4, %v7100_v61 }
 0x609   :  { %5759 = vmatmul.mubr.msk.bf16.gmra.mrb[228].mxu0 %vm1488_vm4, %v7112_v45 }
 0x60a   :  { %5762 = vmatprep.mubr.msk.bf16.mxu0 %vm1488_vm4, %v7124_v56 }
 0x611   :  { %5763 = vmatmul.mubr.msk.bf16.gmra.mrb[232].mxu0 %vm1488_vm4, %v7136_v38 }
 0x612   :  { %5766 = vmatprep.mubr.msk.bf16.mxu0 %vm1488_vm4, %v7148_v17 }
 0x619   :  { %5767 = vmatmul.mubr.msk.bf16.gmra.mrb[236].mxu0 %vm1488_vm4, %v7160_v28 }
 0x61a   :  { %5770 = vmatprep.mubr.msk.bf16.mxu0 %vm1488_vm4, %v7172_v23 }
 0x621   :  { %5771 = vmatmul.mubr.msk.bf16.gmra.mrb[240].mxu0 %vm1488_vm4, %v7184_v13 }
 0x63c   :  { %v5047_v0 = vpop.f32.mrb[148].mxu0 }
 0x63d   :  { %v5048_v50 = vpop.f32.mrb[149].mxu0 }
 0x63e   :  { %v5049_v52 = vadd.f32 %v5048_v50, %v5047_v0  ;;  %v5050_v11 = vpop.f32.mrb[150].mxu0 }
 0x63f   :  { %v5051_v22 = vpop.f32.mrb[151].mxu0 }
 0x640   :  { %v1879_v10 = vadd.f32 %v5049_v52, %v7193_v59  ;;  %v5052_v57 = vadd.f32 %v5051_v22, %v5050_v11 }
 0x642   :  { %v1916_v61 = vadd.f32 %v7514_v34, %v1879_v10  ;;  %v1880_v45 = vadd.f32 %v5052_v57, %v7199_v12 }
 0x644   :  { %v1917_v56 = vadd.f32 %v7514_v34, %v1880_v45  ;;  %v5053_v38 = vpop.f32.mrb[152].mxu0  ;;  %v1948_v28 = vmax.f32 %v1916_v61, 0.0 }
 0x645   :  { %v5054_v17 = vpop.f32.mrb[153].mxu0 }
 0x646   :  { %v1949_v23 = vmax.f32 %v1917_v56, 0.0  ;;  %v5055_v13 = vadd.f32 %v5054_v17, %v5053_v38  ;;  %v5056_v0 = vpop.f32.mrb[154].mxu0 }
 0x647   :  { %v5057_v50 = vpop.f32.mrb[155].mxu0 }
 0x648   :  { %v1980_v2 = vpack.c.bf16 %v1949_v23, %v1948_v28  ;;  %v1881_v4 = vadd.f32 %v7191_v47, %v5055_v13  ;;  %v5058_v63 = vadd.f32 %v5057_v50, %v5056_v0 }
 0x64a   :  { %v1918_v59 = vadd.f32 %v7514_v34, %v1881_v4  ;;  %v1882_v52 = vadd.f32 %v7195_v25, %v5058_v63  ;;  %5708 = vmatprep.mubr.msk.bf16.mxu1 %vm850_vm2, %v1980_v2 }
 0x64c   :  { %v1919_v12 = vadd.f32 %v7514_v34, %v1882_v52  ;;  %v5059_v11 = vpop.f32.mrb[156].mxu0  ;;  %v1950_v10 = vmax.f32 %v1918_v59, 0.0 }
 0x64d   :  { %v5060_v22 = vpop.f32.mrb[157].mxu0 }
 0x64e   :  { %v1951_v57 = vmax.f32 %v1919_v12, 0.0  ;;  %v5061_v61 = vadd.f32 %v5060_v22, %v5059_v11  ;;  %v5062_v45 = vpop.f32.mrb[158].mxu0 }
 0x64f   :  { %v5063_v56 = vpop.f32.mrb[159].mxu0 }
 0x650   :  { %v1981_v38 = vpack.c.bf16 %v1951_v57, %v1950_v10  ;;  %v1883_v17 = vadd.f32 %v5061_v61, %v7205_v20  ;;  %v5064_v47 = vadd.f32 %v5063_v56, %v5062_v45 }
 0x652   :  { %v1920_v28 = vadd.f32 %v7514_v34, %v1883_v17  ;;  %v1884_v4 = vadd.f32 %v5064_v47, %v7211_v60  ;;  %5709 = vmatmul.mubr.msk.bf16.vlgmr.msra.gmra.mrb[76].mxu1 %vm850_vm2, %v1981_v38 }
 0x654   :  { %v1921_v2 = vadd.f32 %v7514_v34, %v1884_v4  ;;  %v5065_v25 = vpop.f32.mrb[160].mxu0  ;;  %v1952_v23 = vmax.f32 %v1920_v28, 0.0 }
 0x655   :  { %v5066_v63 = vpop.f32.mrb[161].mxu0 }
 0x656   :  { %v1953_v13 = vmax.f32 %v1921_v2, 0.0  ;;  %v5067_v0 = vadd.f32 %v5066_v63, %v5065_v25  ;;  %v5068_v50 = vpop.f32.mrb[162].mxu0 }
 0x657   :  { %v5069_v59 = vpop.f32.mrb[163].mxu0 }
 0x658   :  { %v1982_v52 = vpack.c.bf16 %v1953_v13, %v1952_v23  ;;  %v1885_v12 = vadd.f32 %v7203_v37, %v5067_v0  ;;  %v5070_v20 = vadd.f32 %v5069_v59, %v5068_v50 }
 0x65a   :  { %v1922_v11 = vadd.f32 %v7514_v34, %v1885_v12  ;;  %v1886_v22 = vadd.f32 %v7207_v21, %v5070_v20  ;;  %5712 = vmatprep.mubr.msk.bf16.mxu1 %vm850_vm2, %v1982_v52 }
 0x65c   :  { %v1923_v60 = vadd.f32 %v7514_v34, %v1886_v22  ;;  %v5071_v10 = vpop.f32.mrb[164].mxu0  ;;  %v1954_v61 = vmax.f32 %v1922_v11, 0.0 }
 0x65d   :  { %v5072_v57 = vpop.f32.mrb[165].mxu0 }
 0x65e   :  { %v1955_v45 = vmax.f32 %v1923_v60, 0.0  ;;  %v5073_v56 = vadd.f32 %v5072_v57, %v5071_v10  ;;  %v5074_v38 = vpop.f32.mrb[166].mxu0 }
 0x65f   :  { %v5075_v17 = vpop.f32.mrb[167].mxu0 }
 0x660   :  { %v1983_v47 = vpack.c.bf16 %v1955_v45, %v1954_v61  ;;  %v1887_v28 = vadd.f32 %v5073_v56, %v7217_v26  ;;  %v5076_v37 = vadd.f32 %v5075_v17, %v5074_v38 }
 0x662   :  { %v1924_v4 = vadd.f32 %v7514_v34, %v1887_v28  ;;  %v1888_v2 = vadd.f32 %v5076_v37, %v7223_v41  ;;  %5713 = vmatmul.mubr.msk.bf16.gmra.mrb[80].mxu1 %vm850_vm2, %v1983_v47 }
 0x664   :  { %v1925_v21 = vadd.f32 %v7514_v34, %v1888_v2  ;;  %v5077_v25 = vpop.f32.mrb[168].mxu0  ;;  %v1956_v23 = vmax.f32 %v1924_v4, 0.0 }
 0x665   :  { %v5078_v63 = vpop.f32.mrb[169].mxu0 }
 0x666   :  { %v1957_v13 = vmax.f32 %v1925_v21, 0.0  ;;  %v5079_v0 = vadd.f32 %v5078_v63, %v5077_v25  ;;  %v5080_v50 = vpop.f32.mrb[170].mxu0 }
 0x667   :  { %v5081_v59 = vpop.f32.mrb[171].mxu0 }
 0x668   :  { %v1984_v52 = vpack.c.bf16 %v1957_v13, %v1956_v23  ;;  %v1889_v12 = vadd.f32 %v7215_v42, %v5079_v0  ;;  %v5082_v26 = vadd.f32 %v5081_v59, %v5080_v50 }
 0x66a   :  { %v1926_v20 = vadd.f32 %v7514_v34, %v1889_v12  ;;  %v1890_v11 = vadd.f32 %v7219_v14, %v5082_v26  ;;  %5716 = vmatprep.mubr.msk.bf16.mxu1 %vm850_vm2, %v1984_v52 }
 0x66c   :  { %v1927_v41 = vadd.f32 %v7514_v34, %v1890_v11  ;;  %v5083_v22 = vpop.f32.mrb[172].mxu0  ;;  %v1958_v10 = vmax.f32 %v1926_v20, 0.0 }
 0x66d   :  { %v5084_v60 = vpop.f32.mrb[173].mxu0 }
 0x66e   :  { %v1959_v57 = vmax.f32 %v1927_v41, 0.0  ;;  %v5085_v61 = vadd.f32 %v5084_v60, %v5083_v22  ;;  %v5086_v45 = vpop.f32.mrb[174].mxu0 }
 0x66f   :  { %v5087_v56 = vpop.f32.mrb[175].mxu0 }
 0x670   :  { %v1985_v38 = vpack.c.bf16 %v1959_v57, %v1958_v10  ;;  %v1891_v17 = vadd.f32 %v5085_v61, %v7229_v48  ;;  %v5088_v42 = vadd.f32 %v5087_v56, %v5086_v45 }
 0x672   :  { %v1928_v47 = vadd.f32 %v7514_v34, %v1891_v17  ;;  %v1892_v28 = vadd.f32 %v5088_v42, %v7235_v15  ;;  %5717 = vmatmul.mubr.msk.bf16.gmra.mrb[84].mxu1 %vm850_vm2, %v1985_v38 }
 0x674   :  { %v1929_v14 = vadd.f32 %v7514_v34, %v1892_v28  ;;  %v5089_v37 = vpop.f32.mrb[176].mxu0  ;;  %v1960_v2 = vmax.f32 %v1928_v47, 0.0 }
 0x675   :  { %v5090_v4 = vpop.f32.mrb[177].mxu0 }
 0x676   :  { %v1961_v21 = vmax.f32 %v1929_v14, 0.0  ;;  %v5091_v25 = vadd.f32 %v5090_v4, %v5089_v37  ;;  %v5092_v63 = vpop.f32.mrb[178].mxu0 }
 0x677   :  { %v5093_v23 = vpop.f32.mrb[179].mxu0 }
 0x678   :  { %v1986_v13 = vpack.c.bf16 %v1961_v21, %v1960_v2  ;;  %v1893_v0 = vadd.f32 %v7227_v44, %v5091_v25  ;;  %v5094_v48 = vadd.f32 %v5093_v23, %v5092_v63 }
 0x67a   :  { %v1930_v50 = vadd.f32 %v7514_v34, %v1893_v0  ;;  %v1894_v59 = vadd.f32 %v7231_v51, %v5094_v48  ;;  %5720 = vmatprep.mubr.msk.bf16.mxu1 %vm850_vm2, %v1986_v13 }
 0x67c   :  { %v1931_v15 = vadd.f32 %v7514_v34, %v1894_v59  ;;  %v5095_v52 = vpop.f32.mrb[180].mxu0  ;;  %v1962_v26 = vmax.f32 %v1930_v50, 0.0 }
 0x67d   :  { %v5096_v12 = vpop.f32.mrb[181].mxu0 }
 0x67e   :  { %v1963_v20 = vmax.f32 %v1931_v15, 0.0  ;;  %v5097_v11 = vadd.f32 %v5096_v12, %v5095_v52  ;;  %v5098_v41 = vpop.f32.mrb[182].mxu0 }
 0x67f   :  { %v5099_v22 = vpop.f32.mrb[183].mxu0 }
 0x680   :  { %v1987_v60 = vpack.c.bf16 %v1963_v20, %v1962_v26  ;;  %v1895_v10 = vadd.f32 %v5097_v11, %v7241_v39  ;;  %v5100_v44 = vadd.f32 %v5099_v22, %v5098_v41 }
 0x682   :  { %v1932_v57 = vadd.f32 %v7514_v34, %v1895_v10  ;;  %v1896_v61 = vadd.f32 %v5100_v44, %v7247_v9  ;;  %5721 = vmatmul.mubr.msk.bf16.gmra.mrb[88].mxu1 %vm850_vm2, %v1987_v60 }
 0x684   :  { %v1933_v51 = vadd.f32 %v7514_v34, %v1896_v61  ;;  %v5101_v45 = vpop.f32.mrb[184].mxu0  ;;  %v1964_v38 = vmax.f32 %v1932_v57, 0.0 }
 0x685   :  { %v5102_v56 = vpop.f32.mrb[185].mxu0 }
 0x686   :  { %v1965_v17 = vmax.f32 %v1933_v51, 0.0  ;;  %v5103_v42 = vadd.f32 %v5102_v56, %v5101_v45  ;;  %v5104_v47 = vpop.f32.mrb[186].mxu0 }
 0x687   :  { %v5105_v28 = vpop.f32.mrb[187].mxu0 }
 0x688   :  { %v1988_v14 = vpack.c.bf16 %v1965_v17, %v1964_v38  ;;  %v1897_v37 = vadd.f32 %v7239_v27, %v5103_v42  ;;  %v5106_v39 = vadd.f32 %v5105_v28, %v5104_v47 }
 0x68a   :  { %v1934_v4 = vadd.f32 %v7514_v34, %v1897_v37  ;;  %v1898_v2 = vadd.f32 %v7243_v30, %v5106_v39  ;;  %5724 = vmatprep.mubr.msk.bf16.mxu1 %vm850_vm2, %v1988_v14 }
 0x68c   :  { %v1935_v9 = vadd.f32 %v7514_v34, %v1898_v2  ;;  %v5107_v21 = vpop.f32.mrb[188].mxu0  ;;  %v1966_v63 = vmax.f32 %v1934_v4, 0.0 }
 0x68d   :  { %v5108_v25 = vpop.f32.mrb[189].mxu0 }
 0x68e   :  { %v1967_v23 = vmax.f32 %v1935_v9, 0.0  ;;  %v5109_v13 = vadd.f32 %v5108_v25, %v5107_v21  ;;  %v5110_v0 = vpop.f32.mrb[190].mxu0 }
 0x68f   :  { %v5111_v48 = vpop.f32.mrb[191].mxu0 }
 0x690   :  { %v1989_v50 = vpack.c.bf16 %v1967_v23, %v1966_v63  ;;  %v1899_v59 = vadd.f32 %v5109_v13, %v7253_v18  ;;  %v5112_v27 = vadd.f32 %v5111_v48, %v5110_v0 }
 0x692   :  { %v1936_v15 = vadd.f32 %v7514_v34, %v1899_v59  ;;  %v1900_v52 = vadd.f32 %v5112_v27, %v7259_v31  ;;  %5725 = vmatmul.mubr.msk.bf16.gmra.mrb[92].mxu1 %vm850_vm2, %v1989_v50 }
 0x694   :  { %v1937_v30 = vadd.f32 %v7514_v34, %v1900_v52  ;;  %v5113_v12 = vpop.f32.mrb[192].mxu0  ;;  %v1968_v20 = vmax.f32 %v1936_v15, 0.0 }
 0x695   :  { %v5114_v26 = vpop.f32.mrb[193].mxu0 }
 0x696   :  { %v1969_v11 = vmax.f32 %v1937_v30, 0.0  ;;  %v5115_v41 = vadd.f32 %v5114_v26, %v5113_v12  ;;  %v5116_v22 = vpop.f32.mrb[194].mxu0 }
 0x697   :  { %v5117_v60 = vpop.f32.mrb[195].mxu0 }
 0x698   :  { %v1990_v10 = vpack.c.bf16 %v1969_v11, %v1968_v20  ;;  %v1901_v44 = vadd.f32 %v7251_v1, %v5115_v41  ;;  %v5118_v18 = vadd.f32 %v5117_v60, %v5116_v22 }
 0x69a   :  { %v1938_v57 = vadd.f32 %v7514_v34, %v1901_v44  ;;  %v1902_v61 = vadd.f32 %v7255_v32, %v5118_v18  ;;  %5728 = vmatprep.mubr.msk.bf16.mxu1 %vm850_vm2, %v1990_v10 }
 0x69c   :  { %v1939_v31 = vadd.f32 %v7514_v34, %v1902_v61  ;;  %v5119_v51 = vpop.f32.mrb[196].mxu0  ;;  %v1970_v56 = vmax.f32 %v1938_v57, 0.0 }
 0x69d   :  { %v5120_v45 = vpop.f32.mrb[197].mxu0 }
 0x69e   :  { %v1971_v38 = vmax.f32 %v1939_v31, 0.0  ;;  %v5121_v17 = vadd.f32 %v5120_v45, %v5119_v51  ;;  %v5122_v42 = vpop.f32.mrb[198].mxu0 }
 0x69f   :  { %v5123_v47 = vpop.f32.mrb[199].mxu0 }
 0x6a0   :  { %v1991_v28 = vpack.c.bf16 %v1971_v38, %v1970_v56  ;;  %v1903_v14 = vadd.f32 %v5121_v17, %v7265_v55  ;;  %v5124_v1 = vadd.f32 %v5123_v47, %v5122_v42 }
 0x6a2   :  { %v1940_v37 = vadd.f32 %v7514_v34, %v1903_v14  ;;  %v1904_v39 = vadd.f32 %v5124_v1, %v7271_v24  ;;  %5729 = vmatmul.mubr.msk.bf16.gmra.mrb[96].mxu1 %vm850_vm2, %v1991_v28  ;;  %v7599_v28 = vld [vmem:[%s8987_s1 + $0x4] ss:$8 sps:$4 sm:$0xff]  }
 0x6a4   :  { %v1941_v32 = vadd.f32 %v7514_v34, %v1904_v39  ;;  %v5125_v4 = vpop.f32.mrb[200].mxu0  ;;  %v1972_v9 = vmax.f32 %v1940_v37, 0.0 }
 0x6a5   :  { %v5126_v2 = vpop.f32.mrb[201].mxu0 }
 0x6a6   :  { %v1973_v21 = vmax.f32 %v1941_v32, 0.0  ;;  %v5127_v25 = vadd.f32 %v5126_v2, %v5125_v4  ;;  %v5128_v63 = vpop.f32.mrb[202].mxu0 }
 0x6a7   :  { %v5129_v23 = vpop.f32.mrb[203].mxu0 }
 0x6a8   :  { %v1992_v13 = vpack.c.bf16 %v1973_v21, %v1972_v9  ;;  %v1905_v0 = vadd.f32 %v7263_v29, %v5127_v25  ;;  %v5130_v55 = vadd.f32 %v5129_v23, %v5128_v63 }
 0x6aa   :  { %v1942_v48 = vadd.f32 %v7514_v34, %v1905_v0  ;;  %v1906_v50 = vadd.f32 %v7267_v16, %v5130_v55  ;;  %5732 = vmatprep.mubr.msk.bf16.mxu1 %vm850_vm2, %v1992_v13 }
 0x6ac   :  { %v1943_v24 = vadd.f32 %v7514_v34, %v1906_v50  ;;  %v5131_v59 = vpop.f32.mrb[204].mxu0  ;;  %v1974_v15 = vmax.f32 %v1942_v48, 0.0 }
 0x6ad   :  { %v5132_v27 = vpop.f32.mrb[205].mxu0 }
 0x6ae   :  { %v1975_v52 = vmax.f32 %v1943_v24, 0.0  ;;  %v5133_v30 = vadd.f32 %v5132_v27, %v5131_v59  ;;  %v5134_v12 = vpop.f32.mrb[206].mxu0 }
 0x6af   :  { %v5135_v26 = vpop.f32.mrb[207].mxu0 }
 0x6b0   :  { %v1993_v20 = vpack.c.bf16 %v1975_v52, %v1974_v15  ;;  %v1907_v11 = vadd.f32 %v5133_v30, %v7277_v36  ;;  %v5136_v29 = vadd.f32 %v5135_v26, %v5134_v12 }
 0x6b2   :  { %v1944_v41 = vadd.f32 %v7514_v34, %v1907_v11  ;;  %v1908_v22 = vadd.f32 %v5136_v29, %v7283_v46  ;;  %5733 = vmatmul.mubr.msk.bf16.gmra.mrb[100].mxu1 %vm850_vm2, %v1993_v20 }
 0x6b4   :  { %v1945_v16 = vadd.f32 %v7514_v34, %v1908_v22  ;;  %v5137_v60 = vpop.f32.mrb[208].mxu0  ;;  %v1976_v44 = vmax.f32 %v1944_v41, 0.0 }
 0x6b5   :  { %v5138_v10 = vpop.f32.mrb[209].mxu0 }
 0x6b6   :  { %v1977_v18 = vmax.f32 %v1945_v16, 0.0  ;;  %v5139_v57 = vadd.f32 %v5138_v10, %v5137_v60  ;;  %v5140_v61 = vpop.f32.mrb[210].mxu0 }
 0x6b7   :  { %v5141_v31 = vpop.f32.mrb[211].mxu0 }
 0x6b8   :  { %v1994_v51 = vpack.c.bf16 %v1977_v18, %v1976_v44  ;;  %v1909_v45 = vadd.f32 %v7275_v33, %v5139_v57  ;;  %v5142_v36 = vadd.f32 %v5141_v31, %v5140_v61 }
 0x6ba   :  { %v1946_v56 = vadd.f32 %v7514_v34, %v1909_v45  ;;  %v1910_v38 = vadd.f32 %v7279_v62, %v5142_v36  ;;  %5736 = vmatprep.mubr.msk.bf16.mxu1 %vm850_vm2, %v1994_v51 }
 0x6bc   :  { %v1947_v46 = vadd.f32 %v7514_v34, %v1910_v38  ;;  %v1978_v17 = vmax.f32 %v1946_v56, 0.0 }
 0x6be   :  { %v1979_v42 = vmax.f32 %v1947_v46, 0.0 }
 0x6c0   :  { %v1995_v47 = vpack.c.bf16 %v1979_v42, %v1978_v17  ;;  %v9175_v42 = vld [vmem:[#allocation22_spill] sm:$0xff] }
 0x6c2   :  { %5737 = vmatmul.mubr.msk.bf16.gmra.mrb[104].mxu1 %vm850_vm2, %v1995_v47  ;;  %v9178_v47 = vld [vmem:[#allocation28_spill] sm:$0xff] }
 0x6c3   :  { %2269 = vmatprep.mubr.bf16.mxu1 %v7599_v28 }
 0x725   :  { %v7602_v33 = vpop.f32.mrb[76].mxu1 }
 0x726   :  { %v7604_v14 = vpop.f32.mrb[77].mxu1 }
 0x727   :  { %v7606_v62 = vpop.f32.mrb[78].mxu1 }
 0x728   :  { %v2222_v34 = vpack.c.bf16 %v7606_v62, %v7602_v33  ;;  %v7610_v1 = vpop.f32.mrb[79].mxu1 }
 0x729   :  { %v2221_v37 = vpack.c.bf16 %v7610_v1, %v7604_v14 }
 0x735   :  { %v7614_v39 = vpop.f32.mrb[80].mxu1 }
 0x736   :  { %v7616_v32 = vpop.f32.mrb[81].mxu1 }
 0x737   :  { %v7618_v4 = vpop.f32.mrb[82].mxu1 }
 0x738   :  { %v2224_v2 = vpack.c.bf16 %v7618_v4, %v7614_v39  ;;  %v7622_v9 = vpop.f32.mrb[83].mxu1 }
 0x739   :  { %v2223_v21 = vpack.c.bf16 %v7622_v9, %v7616_v32 }
 0x745   :  { %v7626_v25 = vpop.f32.mrb[84].mxu1 }
 0x746   :  { %v7628_v63 = vpop.f32.mrb[85].mxu1 }
 0x747   :  { %v7630_v23 = vpop.f32.mrb[86].mxu1 }
 0x748   :  { %v2226_v13 = vpack.c.bf16 %v7630_v23, %v7626_v25  ;;  %v7634_v0 = vpop.f32.mrb[87].mxu1 }
 0x749   :  { %v2225_v55 = vpack.c.bf16 %v7634_v0, %v7628_v63 }
 0x755   :  { %v7638_v48 = vpop.f32.mrb[88].mxu1 }
 0x756   :  { %v7640_v50 = vpop.f32.mrb[89].mxu1 }
 0x757   :  { %v7642_v24 = vpop.f32.mrb[90].mxu1 }
 0x758   :  { %v2228_v59 = vpack.c.bf16 %v7642_v24, %v7638_v48  ;;  %v7646_v27 = vpop.f32.mrb[91].mxu1 }
 0x759   :  { %v2227_v15 = vpack.c.bf16 %v7646_v27, %v7640_v50 }
 0x765   :  { %v7650_v52 = vpop.f32.mrb[92].mxu1 }
 0x766   :  { %v7652_v30 = vpop.f32.mrb[93].mxu1 }
 0x767   :  { %v7654_v12 = vpop.f32.mrb[94].mxu1 }
 0x768   :  { %v2230_v26 = vpack.c.bf16 %v7654_v12, %v7650_v52  ;;  %v7658_v20 = vpop.f32.mrb[95].mxu1 }
 0x769   :  { %v2229_v11 = vpack.c.bf16 %v7658_v20, %v7652_v30 }
 0x76b   :  { %5161 = vmatprep.subr.bf16.mxu1 %v2229_v11 }
 0x76c   :  { %5162 = vmatpush3.bf16.msra.mxu1 %v2221_v37  ;;  %v6064_v37 = vld [vmem:[%s8985_s2 + $0x38] sm:$0x3f]  }
 0x76d   :  { %5163 = vmatprep.subr.bf16.mxu1 %v2230_v26  ;;  %5994 = vmatprep.subr.msk.bf16.mxu0 %vm2704_vm5, %v6064_v37 }
 0x770   :  { %5164 = vmatpush3.bf16.msra.mxu1 %v2222_v34  ;;  %v9179_v34 = vld [vmem:[#allocation30_spill] sm:$0xff] }
 0x775   :  { %v7662_v29 = vpop.f32.mrb[96].mxu1 }
 0x776   :  { %v7664_v41 = vpop.f32.mrb[97].mxu1 }
 0x777   :  { %v7666_v22 = vpop.f32.mrb[98].mxu1 }
 0x778   :  { %v2232_v16 = vpack.c.bf16 %v7666_v22, %v7662_v29  ;;  %v7670_v60 = vpop.f32.mrb[99].mxu1 }
 0x779   :  { %v2231_v10 = vpack.c.bf16 %v7670_v60, %v7664_v41 }
 0x77b   :  { %5165 = vmatprep.subr.bf16.mxu1 %v2231_v10  ;;  %v7741_v10 = vld [vmem:[%s8988_s3 + $0x18] ss:$0 sm:$0xff] }
 0x77c   :  { %5166 = vmatpush3.bf16.msra.mxu1 %v2223_v21  ;;  %v9180_v21 = vld [vmem:[#allocation31_spill] sm:$0xff] }
 0x77d   :  { %5167 = vmatprep.subr.bf16.mxu1 %v2232_v16 }
 0x780   :  { %5168 = vmatpush3.bf16.msra.mxu1 %v2224_v2  ;;  %v2706_v2 = vsel %vm2704_vm5, %v6064_v37, 0 }
 0x781   :  { %5775 = vmatpush3.bf16.msra.mxu0 %v2706_v2 }
 0x785   :  { %v7674_v44 = vpop.f32.mrb[100].mxu1 }
 0x786   :  { %v7676_v18 = vpop.f32.mrb[101].mxu1 }
 0x787   :  { %v7678_v57 = vpop.f32.mrb[102].mxu1 }
 0x788   :  { %v2234_v61 = vpack.c.bf16 %v7678_v57, %v7674_v44  ;;  %v7682_v31 = vpop.f32.mrb[103].mxu1 }
 0x789   :  { %v2233_v51 = vpack.c.bf16 %v7682_v31, %v7676_v18 }
 0x78b   :  { %5169 = vmatprep.subr.bf16.mxu1 %v2233_v51  ;;  %v7747_v51 = vld [vmem:[%s8989_s4 + $0x8] ss:$0 sm:$0xff] }
 0x78c   :  { %5170 = vmatpush3.bf16.msra.mxu1 %v2225_v55  ;;  %v9182_v55 = vld [vmem:[#allocation33_spill] sm:$0xff] }
 0x78d   :  { %5171 = vmatprep.subr.bf16.mxu1 %v2234_v61 }
 0x790   :  { %5172 = vmatpush3.bf16.msra.mxu1 %v2226_v13  ;;  %v9181_v13 = vld [vmem:[#allocation32_spill] sm:$0xff] }
 0x795   :  { %v7686_v45 = vpop.f32.mrb[104].mxu1 }
 0x796   :  { %v7688_v36 = vpop.f32.mrb[105].mxu1 }
 0x797   :  { %v7690_v56 = vpop.f32.mrb[106].mxu1 }
 0x798   :  { %v2236_v38 = vpack.c.bf16 %v7690_v56, %v7686_v45  ;;  %v7694_v46 = vpop.f32.mrb[107].mxu1 }
 0x799   :  { %v2235_v17 = vpack.c.bf16 %v7694_v46, %v7688_v36 }
 0x79b   :  { %5173 = vmatprep.subr.bf16.mxu1 %v2235_v17 }
 0x79c   :  { %5174 = vmatpush3.bf16.msra.mxu1 %v2227_v15 }
 0x79d   :  { %5175 = vmatprep.subr.bf16.mxu1 %v2236_v38 }
 0x7a0   :  { %5176 = vmatpush3.bf16.msra.mxu1 %v2228_v59  ;;  %v9183_v59 = vld [vmem:[#allocation34_spill] sm:$0xff] }
 0x7a3   :  { %2270 = vmatmul.mubr.bf16.vlgmr.msra.gmra.mrb[108].mxu1 %v7295_v3  ;;  %v7710_v3 = vld [vmem:[%s8987_s1 + $0x54] ss:$8 sps:$4 sm:$0xff]  }
 0x7a4   :  { %2277 = vmatprep.mubr.bf16.mxu1 %v7301_v19  ;;  %v9167_v19 = vld [vmem:[#allocation23_spill] sm:$0xff] }
 0x7ab   :  { %2278 = vmatmul.mubr.bf16.gmra.mrb[112].mxu1 %v7307_v53  ;;  %v9168_v53 = vld [vmem:[#allocation25_spill] sm:$0xff] }
 0x7ac   :  { %2285 = vmatprep.mubr.bf16.mxu1 %v7313_v54  ;;  %v9169_v54 = vld [vmem:[#allocation27_spill] sm:$0xff] }
 0x7b3   :  { %2286 = vmatmul.mubr.bf16.gmra.mrb[116].mxu1 %v7319_v35  ;;  %v9170_v35 = vld [vmem:[#allocation29_spill] sm:$0xff] }
 0x7b4   :  { %2293 = vmatprep.mubr.bf16.mxu1 %v7325_v43  ;;  %v9172_v43 = vld [vmem:[#allocation19_spill] sm:$0xff] }
 0x7bb   :  { %2294 = vmatmul.mubr.bf16.gmra.mrb[120].mxu1 %v7331_v49  ;;  %v9173_v49 = vld [vmem:[#allocation20_spill] sm:$0xff] }
 0x7bc   :  { %2301 = vmatprep.mubr.bf16.mxu1 %v7337_v40  ;;  %v9174_v40 = vld [vmem:[#allocation21_spill] sm:$0xff] }
 0x7c3   :  { %2302 = vmatmul.mubr.bf16.gmra.mrb[124].mxu1 %v7343_v58  ;;  %v9171_v58 = vld [vmem:[#allocation18_spill] sm:$0xff] }
 0x7c4   :  { %2309 = vmatprep.mubr.bf16.mxu1 %v7710_v3 }
 0x7cb   :  { %2310 = vmatmul.mubr.bf16.gmra.mrb[128].mxu1 %v7350_v8  ;;  %v9176_v8 = vld [vmem:[#allocation24_spill] sm:$0xff] }
 0x7cc   :  { %2317 = vmatprep.mubr.bf16.mxu1 %v7356_v7  ;;  %v9177_v7 = vld [vmem:[#allocation26_spill] sm:$0xff] }
 0x7d3   :  { %2318 = vmatmul.mubr.bf16.gmra.mrb[132].mxu1 %v9167_v19 }
 0x7d4   :  { %2325 = vmatprep.mubr.bf16.mxu1 %v9168_v53 }
 0x7db   :  { %2326 = vmatmul.mubr.bf16.gmra.mrb[136].mxu1 %v9169_v54 }
 0x7dc   :  { %2333 = vmatprep.mubr.bf16.mxu1 %v9170_v35 }
 0x7e3   :  { %2334 = vmatmul.mubr.bf16.gmra.mrb[140].mxu1 %v9171_v58 }
 0x7e4   :  { %2341 = vmatprep.mubr.bf16.mxu1 %v9172_v43 }
 0x7eb   :  { %2342 = vmatmul.mubr.bf16.gmra.mrb[144].mxu1 %v9173_v49 }
 0x7ec   :  { %2349 = vmatprep.mubr.bf16.mxu1 %v9174_v40 }
 0x7f3   :  { %2350 = vmatmul.mubr.bf16.gmra.mrb[148].mxu1 %v9175_v42 }
 0x7f4   :  { %2357 = vmatprep.mubr.bf16.mxu1 %v9176_v8 }
 0x7fb   :  { %2358 = vmatmul.mubr.bf16.gmra.mrb[152].mxu1 %v9177_v7 }
 0x7fc   :  { %2365 = vmatprep.mubr.bf16.mxu1 %v9178_v47 }
 0x803   :  { %2366 = vmatmul.mubr.bf16.gmra.mrb[156].mxu1 %v9179_v34 }
 0x804   :  { %2373 = vmatprep.mubr.bf16.mxu1 %v7443_v5 }
 0x80b   :  { %2374 = vmatmul.mubr.bf16.gmra.mrb[160].mxu1 %v9180_v21 }
 0x80c   :  { %2381 = vmatprep.mubr.bf16.mxu1 %v7458_v6 }
 0x813   :  { %2382 = vmatmul.mubr.bf16.gmra.mrb[164].mxu1 %v9181_v13 }
 0x814   :  { %2389 = vmatprep.mubr.bf16.mxu1 %v9182_v55 }
 0x81b   :  { %2390 = vmatmul.mubr.bf16.gmra.mrb[168].mxu1 %v9183_v59 }
 0x81c   :  { %3114 = vmatprep.mubr.bf16.mxu1 %v7599_v28  ;;  %v2869_v28 = vld [vmem:[%s8985_s2 + $0x48] sm:$0x3] }
 0x81d   :  { %5995 = vmatprep.subr.msk.bf16.mxu0 %vm183_vm0, %v2869_v28  ;;  %v2871_v55 = vsel %vm183_vm0, %v2869_v28, 0 }
 0x876   :  { %v5177_v5 = vpop.f32.mrb[108].mxu1 }
 0x877   :  { %v5178_v15 = vpop.f32.mrb[109].mxu1 }
 0x878   :  { %v5179_v26 = vadd.f32 %v5178_v15, %v5177_v5  ;;  %v5180_v11 = vpop.f32.mrb[110].mxu1 }
 0x879   :  { %v5181_v16 = vpop.f32.mrb[111].mxu1 }
 0x87a   :  { %v2398_v6 = vadd.f32 %v5179_v26, %v7604_v14  ;;  %v5182_v61 = vadd.f32 %v5181_v16, %v5180_v11 }
 0x87c   :  { %v2399_v38 = vadd.f32 %v5182_v61, %v7610_v1  ;;  %v2435_v17 = vadd.f32 %v7741_v10, %v2398_v6 }
 0x87e   :  { %v2436_v19 = vadd.f32 %v7741_v10, %v2399_v38  ;;  %v5183_v14 = vpop.f32.mrb[112].mxu1  ;;  %v3970_v53 = vmul.f32 %v7747_v51, %v2435_v17 }
 0x87f   :  { %v5184_v54 = vpop.f32.mrb[113].mxu1 }
 0x880   :  { %v5185_v35 = vadd.f32 %v5184_v54, %v5183_v14  ;;  %v5186_v58 = vpop.f32.mrb[114].mxu1  ;;  %v4002_v43 = vsel %vm2655_vm6, %v3970_v53, 0.0  ;;  %v2467_v49 = vpack.c.bf16 %v2436_v19, %v2435_v17  ;;  %v3971_v40 = vmul.f32 %v7747_v51, %v2436_v19 }
 0x881   :  { %v5187_v42 = vpop.f32.mrb[115].mxu1  ;;  %4003 = vadd.xlane.f32.xlu0 %v4002_v43 }
 0x882   :  { %v2400_v1 = vadd.f32 %v7602_v33, %v5185_v35  ;;  %v5188_v8 = vadd.f32 %v5187_v42, %v5186_v58  ;;  %5776 = vmatprep.mubr.msk.bf16.mxu0 %vm2655_vm6, %v2467_v49  ;;  %v4005_v7 = vsel %vm2655_vm6, %v3971_v40, 0.0 }
 0x883   :  { %4006 = vadd.xlane.f32.xlu1 %v4005_v7 }
 0x884   :  { %v2401_v47 = vadd.f32 %v7606_v62, %v5188_v8  ;;  %v2437_v34 = vadd.f32 %v7741_v10, %v2400_v1 }
 0x886   :  { %v2438_v37 = vadd.f32 %v7741_v10, %v2401_v47  ;;  %v5189_v2 = vpop.f32.mrb[116].mxu1  ;;  %v3972_v21 = vmul.f32 %v7747_v51, %v2437_v34 }
 0x887   :  { %v5190_v13 = vpop.f32.mrb[117].mxu1 }
 0x888   :  { %v5191_v59 = vadd.f32 %v5190_v13, %v5189_v2  ;;  %v5192_v33 = vpop.f32.mrb[118].mxu1  ;;  %v2468_v5 = vpack.c.bf16 %v2438_v37, %v2437_v34  ;;  %v4008_v15 = vsel %vm2655_vm6, %v3972_v21, 0.0  ;;  %v3973_v26 = vmul.f32 %v7747_v51, %v2438_v37 }
 0x889   :  { %v5193_v11 = vpop.f32.mrb[119].mxu1  ;;  %4009 = vadd.xlane.f32.xlu0 %v4008_v15 }
 0x88a   :  { %v2402_v62 = vadd.f32 %v5191_v59, %v7616_v32  ;;  %v5194_v16 = vadd.f32 %v5193_v11, %v5192_v33  ;;  %5777 = vmatmul.mubr.msk.bf16.vlgmr.msra.gmra.mrb[212].mxu0 %vm2655_vm6, %v2468_v5  ;;  %v4011_v6 = vsel %vm2655_vm6, %v3973_v26, 0.0 }
 0x88b   :  { %4012 = vadd.xlane.f32.xlu1 %v4011_v6  ;;  %5809 = vmatpush3.bf16.msra.mxu0 %v2871_v55 }
 0x88c   :  { %v2403_v61 = vadd.f32 %v5194_v16, %v7622_v9  ;;  %v2439_v28 = vadd.f32 %v7741_v10, %v2402_v62 }
 0x88e   :  { %v2440_v38 = vadd.f32 %v7741_v10, %v2403_v61  ;;  %v5195_v17 = vpop.f32.mrb[120].mxu1  ;;  %v3974_v19 = vmul.f32 %v7747_v51, %v2439_v28 }
 0x88f   :  { %v5196_v14 = vpop.f32.mrb[121].mxu1 }
 0x890   :  { %v5197_v53 = vadd.f32 %v5196_v14, %v5195_v17  ;;  %v5198_v54 = vpop.f32.mrb[122].mxu1  ;;  %v2469_v32 = vpack.c.bf16 %v2440_v38, %v2439_v28  ;;  %v4014_v35 = vsel %vm2655_vm6, %v3974_v19, 0.0  ;;  %v3975_v58 = vmul.f32 %v7747_v51, %v2440_v38 }
 0x891   :  { %v5199_v43 = vpop.f32.mrb[123].mxu1  ;;  %4015 = vadd.xlane.f32.xlu0 %v4014_v35 }
 0x892   :  { %v2404_v49 = vadd.f32 %v7614_v39, %v5197_v53  ;;  %v5200_v9 = vadd.f32 %v5199_v43, %v5198_v54  ;;  %5780 = vmatprep.mubr.msk.bf16.mxu0 %vm2655_vm6, %v2469_v32  ;;  %v4017_v40 = vsel %vm2655_vm6, %v3975_v58, 0.0 }
 0x893   :  { %4018 = vadd.xlane.f32.xlu1 %v4017_v40 }
 0x894   :  { %v2405_v42 = vadd.f32 %v7618_v4, %v5200_v9  ;;  %v2441_v1 = vadd.f32 %v7741_v10, %v2404_v49 }
 0x896   :  { %v2442_v8 = vadd.f32 %v7741_v10, %v2405_v42  ;;  %v5201_v7 = vpop.f32.mrb[124].mxu1  ;;  %v3976_v47 = vmul.f32 %v7747_v51, %v2441_v1 }
 0x897   :  { %v5202_v34 = vpop.f32.mrb[125].mxu1 }
 0x898   :  { %v5203_v37 = vadd.f32 %v5202_v34, %v5201_v7  ;;  %v5204_v2 = vpop.f32.mrb[126].mxu1  ;;  %v2470_v21 = vpack.c.bf16 %v2442_v8, %v2441_v1  ;;  %v4020_v39 = vsel %vm2655_vm6, %v3976_v47, 0.0  ;;  %v3977_v13 = vmul.f32 %v7747_v51, %v2442_v8 }
 0x899   :  { %v5205_v55 = vpop.f32.mrb[127].mxu1  ;;  %4021 = vadd.xlane.f32.xlu0 %v4020_v39 }
 0x89a   :  { %v2406_v59 = vadd.f32 %v5203_v37, %v7628_v63  ;;  %v5206_v4 = vadd.f32 %v5205_v55, %v5204_v2  ;;  %5781 = vmatmul.mubr.msk.bf16.gmra.mrb[216].mxu0 %vm2655_vm6, %v2470_v21  ;;  %v4023_v33 = vsel %vm2655_vm6, %v3977_v13, 0.0 }
 0x89b   :  { %4024 = vadd.xlane.f32.xlu1 %v4023_v33 }
 0x89c   :  { %v2407_v5 = vadd.f32 %v5206_v4, %v7634_v0  ;;  %v2443_v15 = vadd.f32 %v7741_v10, %v2406_v59 }
 0x89e   :  { %v2444_v26 = vadd.f32 %v7741_v10, %v2407_v5  ;;  %v5207_v11 = vpop.f32.mrb[128].mxu1  ;;  %v3978_v62 = vmul.f32 %v7747_v51, %v2443_v15 }
 0x89f   :  { %v5208_v16 = vpop.f32.mrb[129].mxu1 }
 0x8a0   :  { %v5209_v6 = vadd.f32 %v5208_v16, %v5207_v11  ;;  %v5210_v61 = vpop.f32.mrb[130].mxu1  ;;  %v2471_v28 = vpack.c.bf16 %v2444_v26, %v2443_v15  ;;  %v4026_v63 = vsel %vm2655_vm6, %v3978_v62, 0.0  ;;  %v3979_v38 = vmul.f32 %v7747_v51, %v2444_v26 }
 0x8a1   :  { %v5211_v17 = vpop.f32.mrb[131].mxu1  ;;  %4027 = vadd.xlane.f32.xlu0 %v4026_v63 }
 0x8a2   :  { %v2408_v19 = vadd.f32 %v7626_v25, %v5209_v6  ;;  %v5212_v0 = vadd.f32 %v5211_v17, %v5210_v61  ;;  %5784 = vmatprep.mubr.msk.bf16.mxu0 %vm2655_vm6, %v2471_v28  ;;  %v4029_v14 = vsel %vm2655_vm6, %v3979_v38, 0.0 }
 0x8a3   :  { %4030 = vadd.xlane.f32.xlu1 %v4029_v14 }
 0x8a4   :  { %v2409_v53 = vadd.f32 %v7630_v23, %v5212_v0  ;;  %v2445_v54 = vadd.f32 %v7741_v10, %v2408_v19 }
 0x8a6   :  { %v2446_v32 = vadd.f32 %v7741_v10, %v2409_v53  ;;  %v5213_v35 = vpop.f32.mrb[132].mxu1  ;;  %v3980_v58 = vmul.f32 %v7747_v51, %v2445_v54 }
 0x8a7   :  { %v5214_v43 = vpop.f32.mrb[133].mxu1 }
 0x8a8   :  { %v5215_v49 = vadd.f32 %v5214_v43, %v5213_v35  ;;  %v5216_v9 = vpop.f32.mrb[134].mxu1  ;;  %v2472_v40 = vpack.c.bf16 %v2446_v32, %v2445_v54  ;;  %v4032_v25 = vsel %vm2655_vm6, %v3980_v58, 0.0  ;;  %v3981_v42 = vmul.f32 %v7747_v51, %v2446_v32 }
 0x8a9   :  { %v5217_v1 = vpop.f32.mrb[135].mxu1  ;;  %4033 = vadd.xlane.f32.xlu0 %v4032_v25 }
 0x8aa   :  { %v2410_v8 = vadd.f32 %v5215_v49, %v7640_v50  ;;  %v5218_v23 = vadd.f32 %v5217_v1, %v5216_v9  ;;  %5785 = vmatmul.mubr.msk.bf16.gmra.mrb[220].mxu0 %vm2655_vm6, %v2472_v40  ;;  %v4035_v7 = vsel %vm2655_vm6, %v3981_v42, 0.0 }
 0x8ab   :  { %4036 = vadd.xlane.f32.xlu1 %v4035_v7 }
 0x8ac   :  { %v2411_v47 = vadd.f32 %v5218_v23, %v7646_v27  ;;  %v2447_v34 = vadd.f32 %v7741_v10, %v2410_v8 }
 0x8ae   :  { %v2448_v37 = vadd.f32 %v7741_v10, %v2411_v47  ;;  %v5219_v2 = vpop.f32.mrb[136].mxu1  ;;  %v3982_v21 = vmul.f32 %v7747_v51, %v2447_v34 }
 0x8af   :  { %v5220_v39 = vpop.f32.mrb[137].mxu1 }
 0x8b0   :  { %v5221_v13 = vadd.f32 %v5220_v39, %v5219_v2  ;;  %v5222_v55 = vpop.f32.mrb[138].mxu1  ;;  %v2473_v59 = vpack.c.bf16 %v2448_v37, %v2447_v34  ;;  %v4038_v50 = vsel %vm2655_vm6, %v3982_v21, 0.0  ;;  %v3983_v4 = vmul.f32 %v7747_v51, %v2448_v37 }
 0x8b1   :  { %v5223_v33 = vpop.f32.mrb[139].mxu1  ;;  %4039 = vadd.xlane.f32.xlu0 %v4038_v50 }
 0x8b2   :  { %v2412_v5 = vadd.f32 %v7638_v48, %v5221_v13  ;;  %v5224_v27 = vadd.f32 %v5223_v33, %v5222_v55  ;;  %5788 = vmatprep.mubr.msk.bf16.mxu0 %vm2655_vm6, %v2473_v59  ;;  %v4041_v15 = vsel %vm2655_vm6, %v3983_v4, 0.0 }
 0x8b3   :  { %4042 = vadd.xlane.f32.xlu1 %v4041_v15 }
 0x8b4   :  { %v2413_v26 = vadd.f32 %v7642_v24, %v5224_v27  ;;  %v2449_v11 = vadd.f32 %v7741_v10, %v2412_v5 }
 0x8b6   :  { %v2450_v62 = vadd.f32 %v7741_v10, %v2413_v26  ;;  %v5225_v16 = vpop.f32.mrb[140].mxu1  ;;  %v3984_v6 = vmul.f32 %v7747_v51, %v2449_v11 }
 0x8b7   :  { %v5226_v61 = vpop.f32.mrb[141].mxu1 }
 0x8b8   :  { %v5227_v28 = vadd.f32 %v5226_v61, %v5225_v16  ;;  %v5228_v63 = vpop.f32.mrb[142].mxu1  ;;  %v2474_v38 = vpack.c.bf16 %v2450_v62, %v2449_v11  ;;  %v4044_v48 = vsel %vm2655_vm6, %v3984_v6, 0.0  ;;  %v3985_v17 = vmul.f32 %v7747_v51, %v2450_v62 }
 0x8b9   :  { %v5229_v19 = vpop.f32.mrb[143].mxu1  ;;  %4045 = vadd.xlane.f32.xlu0 %v4044_v48 }
 0x8ba   :  { %v2414_v0 = vadd.f32 %v5227_v28, %v7652_v30  ;;  %v5230_v24 = vadd.f32 %v5229_v19, %v5228_v63  ;;  %5789 = vmatmul.mubr.msk.bf16.gmra.mrb[224].mxu0 %vm2655_vm6, %v2474_v38  ;;  %v4047_v14 = vsel %vm2655_vm6, %v3985_v17, 0.0 }
 0x8bb   :  { %4048 = vadd.xlane.f32.xlu1 %v4047_v14 }
 0x8bc   :  { %v2415_v53 = vadd.f32 %v5230_v24, %v7658_v20  ;;  %v2451_v54 = vadd.f32 %v7741_v10, %v2414_v0 }
 0x8be   :  { %v2452_v32 = vadd.f32 %v7741_v10, %v2415_v53  ;;  %v5231_v35 = vpop.f32.mrb[144].mxu1  ;;  %v3986_v58 = vmul.f32 %v7747_v51, %v2451_v54 }
 0x8bf   :  { %v5232_v43 = vpop.f32.mrb[145].mxu1 }
 0x8c0   :  { %v5233_v49 = vadd.f32 %v5232_v43, %v5231_v35  ;;  %v5234_v9 = vpop.f32.mrb[146].mxu1  ;;  %v2475_v40 = vpack.c.bf16 %v2452_v32, %v2451_v54  ;;  %v4050_v30 = vsel %vm2655_vm6, %v3986_v58, 0.0  ;;  %v3987_v25 = vmul.f32 %v7747_v51, %v2452_v32 }
 0x8c1   :  { %v5235_v42 = vpop.f32.mrb[147].mxu1  ;;  %4051 = vadd.xlane.f32.xlu0 %v4050_v30 }
 0x8c2   :  { %v2416_v1 = vadd.f32 %v7650_v52, %v5233_v49  ;;  %v5236_v20 = vadd.f32 %v5235_v42, %v5234_v9  ;;  %5792 = vmatprep.mubr.msk.bf16.mxu0 %vm2655_vm6, %v2475_v40  ;;  %v4053_v8 = vsel %vm2655_vm6, %v3987_v25, 0.0 }
 0x8c3   :  { %4054 = vadd.xlane.f32.xlu1 %v4053_v8 }
 0x8c4   :  { %v2417_v23 = vadd.f32 %v7654_v12, %v5236_v20  ;;  %v2453_v7 = vadd.f32 %v7741_v10, %v2416_v1 }
 0x8c6   :  { %v2454_v47 = vadd.f32 %v7741_v10, %v2417_v23  ;;  %v5237_v34 = vpop.f32.mrb[148].mxu1  ;;  %v3988_v37 = vmul.f32 %v7747_v51, %v2453_v7 }
 0x8c7   :  { %v5238_v2 = vpop.f32.mrb[149].mxu1 }
 0x8c8   :  { %v5239_v21 = vadd.f32 %v5238_v2, %v5237_v34  ;;  %v5240_v39 = vpop.f32.mrb[150].mxu1  ;;  %v2476_v13 = vpack.c.bf16 %v2454_v47, %v2453_v7  ;;  %v4056_v52 = vsel %vm2655_vm6, %v3988_v37, 0.0  ;;  %v3989_v55 = vmul.f32 %v7747_v51, %v2454_v47 }
 0x8c9   :  { %v5241_v59 = vpop.f32.mrb[151].mxu1  ;;  %4057 = vadd.xlane.f32.xlu0 %v4056_v52 }
 0x8ca   :  { %v2418_v50 = vadd.f32 %v5239_v21, %v7664_v41  ;;  %v5242_v12 = vadd.f32 %v5241_v59, %v5240_v39  ;;  %5793 = vmatmul.mubr.msk.bf16.gmra.mrb[228].mxu0 %vm2655_vm6, %v2476_v13  ;;  %v4059_v4 = vsel %vm2655_vm6, %v3989_v55, 0.0 }
 0x8cb   :  { %4060 = vadd.xlane.f32.xlu1 %v4059_v4 }
 0x8cc   :  { %v2419_v33 = vadd.f32 %v5242_v12, %v7670_v60  ;;  %v2455_v5 = vadd.f32 %v7741_v10, %v2418_v50 }
 0x8ce   :  { %v2456_v27 = vadd.f32 %v7741_v10, %v2419_v33  ;;  %v5243_v15 = vpop.f32.mrb[152].mxu1  ;;  %v3990_v26 = vmul.f32 %v7747_v51, %v2455_v5 }
 0x8cf   :  { %v5244_v11 = vpop.f32.mrb[153].mxu1 }
 0x8d0   :  { %v5245_v62 = vadd.f32 %v5244_v11, %v5243_v15  ;;  %v5246_v16 = vpop.f32.mrb[154].mxu1  ;;  %v2477_v6 = vpack.c.bf16 %v2456_v27, %v2455_v5  ;;  %v4062_v41 = vsel %vm2655_vm6, %v3990_v26, 0.0  ;;  %v3991_v61 = vmul.f32 %v7747_v51, %v2456_v27 }
 0x8d1   :  { %v5247_v28 = vpop.f32.mrb[155].mxu1  ;;  %4063 = vadd.xlane.f32.xlu0 %v4062_v41 }
 0x8d2   :  { %v2420_v63 = vadd.f32 %v7662_v29, %v5245_v62  ;;  %v5248_v60 = vadd.f32 %v5247_v28, %v5246_v16  ;;  %5796 = vmatprep.mubr.msk.bf16.mxu0 %vm2655_vm6, %v2477_v6  ;;  %v4065_v38 = vsel %vm2655_vm6, %v3991_v61, 0.0 }
 0x8d3   :  { %4066 = vadd.xlane.f32.xlu1 %v4065_v38 }
 0x8d4   :  { %v2421_v48 = vadd.f32 %v7666_v22, %v5248_v60  ;;  %v2457_v17 = vadd.f32 %v7741_v10, %v2420_v63 }
 0x8d6   :  { %v2458_v19 = vadd.f32 %v7741_v10, %v2421_v48  ;;  %v5249_v0 = vpop.f32.mrb[156].mxu1  ;;  %v3992_v24 = vmul.f32 %v7747_v51, %v2457_v17 }
 0x8d7   :  { %v5250_v14 = vpop.f32.mrb[157].mxu1 }
 0x8d8   :  { %v5251_v53 = vadd.f32 %v5250_v14, %v5249_v0  ;;  %v5252_v54 = vpop.f32.mrb[158].mxu1  ;;  %v2478_v32 = vpack.c.bf16 %v2458_v19, %v2457_v17  ;;  %v4068_v29 = vsel %vm2655_vm6, %v3992_v24, 0.0  ;;  %v3993_v35 = vmul.f32 %v7747_v51, %v2458_v19 }
 0x8d9   :  { %v5253_v58 = vpop.f32.mrb[159].mxu1  ;;  %4069 = vadd.xlane.f32.xlu0 %v4068_v29  ;;  %v9187_v29 = vld [vmem:[#allocation5_spill] sm:$0xff] }
 0x8da   :  { %v2422_v43 = vadd.f32 %v5251_v53, %v7676_v18  ;;  %v5254_v22 = vadd.f32 %v5253_v58, %v5252_v54  ;;  %5797 = vmatmul.mubr.msk.bf16.gmra.mrb[232].mxu0 %vm2655_vm6, %v2478_v32  ;;  %v4071_v49 = vsel %vm2655_vm6, %v3993_v35, 0.0  ;;  %v9184_v32 = vld [vmem:[#allocation2_spill] sm:$0xff]  ;;  %v9190_v58 = vld [vmem:[#allocation8_spill] sm:$0xff] }
 0x8db   :  { %4072 = vadd.xlane.f32.xlu1 %v4071_v49  ;;  %v9188_v35 = vld [vmem:[#allocation6_spill] sm:$0xff]  ;;  %v9193_v49 = vld [vmem:[#allocation11_spill] sm:$0xff] }
 0x8dc   :  { %v2423_v9 = vadd.f32 %v5254_v22, %v7682_v31  ;;  %v2459_v40 = vadd.f32 %v7741_v10, %v2422_v43  ;;  %v9191_v43 = vld [vmem:[#allocation9_spill] sm:$0xff]  ;;  %v9192_v22 = vld [vmem:[#allocation10_spill] sm:$0xff] }
 0x8de   :  { %v2460_v30 = vadd.f32 %v7741_v10, %v2423_v9  ;;  %v5255_v25 = vpop.f32.mrb[160].mxu1  ;;  %v3994_v42 = vmul.f32 %v7747_v51, %v2459_v40  ;;  %v9194_v9 = vld [vmem:[#allocation12_spill] sm:$0xff] }
 0x8df   :  { %v5256_v1 = vpop.f32.mrb[161].mxu1 }
 0x8e0   :  { %v5257_v20 = vadd.f32 %v5256_v1, %v5255_v25  ;;  %v5258_v8 = vpop.f32.mrb[162].mxu1  ;;  %v2479_v23 = vpack.c.bf16 %v2460_v30, %v2459_v40  ;;  %v4074_v18 = vsel %vm2655_vm6, %v3994_v42, 0.0  ;;  %v3995_v7 = vmul.f32 %v7747_v51, %v2460_v30  ;;  %v9195_v40 = vld [vmem:[#allocation13_spill] sm:$0xff]  ;;  %v9196_v30 = vld [vmem:[#allocation14_spill] sm:$0xff]  ;;  %v9197_v25 = vld [vmem:[#allocation15_spill] sm:$0xff] }
 0x8e1   :  { %v5259_v47 = vpop.f32.mrb[163].mxu1  ;;  %4075 = vadd.xlane.f32.xlu0 %v4074_v18  ;;  %v9198_v42 = vld [vmem:[#allocation16_spill] sm:$0xff]  ;;  %v9199_v1 = vld [vmem:[#allocation17_spill] sm:$0xff] }
 0x8e2   :  { %v2424_v34 = vadd.f32 %v7674_v44, %v5257_v20  ;;  %v5260_v31 = vadd.f32 %v5259_v47, %v5258_v8  ;;  %5800 = vmatprep.mubr.msk.bf16.mxu0 %vm2655_vm6, %v2479_v23  ;;  %v4077_v37 = vsel %vm2655_vm6, %v3995_v7, 0.0 }
 0x8e3   :  { %4078 = vadd.xlane.f32.xlu1 %v4077_v37 }
 0x8e4   :  { %v2425_v2 = vadd.f32 %v7678_v57, %v5260_v31  ;;  %v2461_v21 = vadd.f32 %v7741_v10, %v2424_v34 }
 0x8e6   :  { %v2462_v39 = vadd.f32 %v7741_v10, %v2425_v2  ;;  %v5261_v13 = vpop.f32.mrb[164].mxu1  ;;  %v3996_v52 = vmul.f32 %v7747_v51, %v2461_v21 }
 0x8e7   :  { %v5262_v55 = vpop.f32.mrb[165].mxu1 }
 0x8e8   :  { %v5263_v59 = vadd.f32 %v5262_v55, %v5261_v13  ;;  %v5264_v50 = vpop.f32.mrb[166].mxu1  ;;  %v2480_v12 = vpack.c.bf16 %v2462_v39, %v2461_v21  ;;  %v4080_v44 = vsel %vm2655_vm6, %v3996_v52, 0.0  ;;  %v3997_v4 = vmul.f32 %v7747_v51, %v2462_v39 }
 0x8e9   :  { %v5265_v33 = vpop.f32.mrb[167].mxu1  ;;  %4081 = vadd.xlane.f32.xlu0 %v4080_v44 }
 0x8ea   :  { %v2426_v5 = vadd.f32 %v5263_v59, %v7688_v36  ;;  %v5266_v57 = vadd.f32 %v5265_v33, %v5264_v50  ;;  %5801 = vmatmul.mubr.msk.bf16.gmra.mrb[236].mxu0 %vm2655_vm6, %v2480_v12  ;;  %v4083_v27 = vsel %vm2655_vm6, %v3997_v4, 0.0 }
 0x8eb   :  { %4084 = vadd.xlane.f32.xlu1 %v4083_v27 }
 0x8ec   :  { %v2427_v15 = vadd.f32 %v5266_v57, %v7694_v46  ;;  %v2463_v26 = vadd.f32 %v7741_v10, %v2426_v5 }
 0x8ee   :  { %v2464_v11 = vadd.f32 %v7741_v10, %v2427_v15  ;;  %v5267_v62 = vpop.f32.mrb[168].mxu1  ;;  %v3998_v16 = vmul.f32 %v7747_v51, %v2463_v26 }
 0x8ef   :  { %v5268_v6 = vpop.f32.mrb[169].mxu1 }
 0x8f0   :  { %v5269_v41 = vadd.f32 %v5268_v6, %v5267_v62  ;;  %v5270_v61 = vpop.f32.mrb[170].mxu1  ;;  %v2481_v28 = vpack.c.bf16 %v2464_v11, %v2463_v26  ;;  %v4086_v36 = vsel %vm2655_vm6, %v3998_v16, 0.0  ;;  %v3999_v63 = vmul.f32 %v7747_v51, %v2464_v11 }
 0x8f1   :  { %v5271_v60 = vpop.f32.mrb[171].mxu1  ;;  %4087 = vadd.xlane.f32.xlu0 %v4086_v36 }
 0x8f2   :  { %v2428_v38 = vadd.f32 %v7686_v45, %v5269_v41  ;;  %v5272_v46 = vadd.f32 %v5271_v60, %v5270_v61  ;;  %5804 = vmatprep.mubr.msk.bf16.mxu0 %vm2655_vm6, %v2481_v28  ;;  %v4089_v48 = vsel %vm2655_vm6, %v3999_v63, 0.0 }
 0x8f3   :  { %4090 = vadd.xlane.f32.xlu1 %v4089_v48 }
 0x8f4   :  { %v2429_v17 = vadd.f32 %v7690_v56, %v5272_v46  ;;  %v2465_v19 = vadd.f32 %v7741_v10, %v2428_v38  ;;  %v9185_v56 = vld [vmem:[#allocation3_spill] sm:$0xff] }
 0x8f6   :  { %v2466_v0 = vadd.f32 %v7741_v10, %v2429_v17  ;;  %v4000_v24 = vmul.f32 %v7747_v51, %v2465_v19  ;;  %v9186_v10 = vld [vmem:[#allocation4_spill] sm:$0xff] }
 0x8f8   :  { %v2482_v14 = vpack.c.bf16 %v2466_v0, %v2465_v19  ;;  %v4092_v53 = vsel %vm2655_vm6, %v4000_v24, 0.0  ;;  %v4001_v54 = vmul.f32 %v7747_v51, %v2466_v0  ;;  %v9189_v51 = vld [vmem:[#allocation7_spill] sm:$0xff] }
 0x8f9   :  { %4093 = vadd.xlane.f32.xlu0 %v4092_v53 }
 0x8fa   :  { %5805 = vmatmul.mubr.msk.bf16.gmra.mrb[240].mxu0 %vm2655_vm6, %v2482_v14  ;;  %v4095_v45 = vsel %vm2655_vm6, %v4001_v54, 0.0 }
 0x8fb   :  { %4096 = vadd.xlane.f32.xlu1 %v4095_v45  ;;  %5810 = vmatprep.mubr.msk.bf16.mxu0 %vm134_vm1, %v9184_v32 }
 0x902   :  { %5811 = vmatmul.mubr.msk.bf16.vlgmr.msra.gmra.mrb[212].mxu0 %vm134_vm1, %v9185_v56  ;;  %v8028_v56 = vld [vmem:[%s8987_s1] ss:$8 sps:$4 sm:$0xff]  }
 0x903   :  { %5814 = vmatprep.mubr.msk.bf16.mxu0 %vm134_vm1, %v9186_v10  ;;  %v8034_v10 = vld [vmem:[%s8987_s1 + $0x14] ss:$8 sps:$4 sm:$0xff]  }
 0x90a   :  { %5815 = vmatmul.mubr.msk.bf16.gmra.mrb[216].mxu0 %vm134_vm1, %v9187_v29  ;;  %v8040_v29 = vld [vmem:[%s8987_s1 + $0x10] ss:$8 sps:$4 sm:$0xff]  }
 0x90b   :  { %5818 = vmatprep.mubr.msk.bf16.mxu0 %vm134_vm1, %v9188_v35  ;;  %v8046_v35 = vld [vmem:[%s8987_s1 + $0x24] ss:$8 sps:$4 sm:$0xff]  }
 0x912   :  { %5819 = vmatmul.mubr.msk.bf16.gmra.mrb[220].mxu0 %vm134_vm1, %v9189_v51  ;;  %v8052_v51 = vld [vmem:[%s8987_s1 + $0x20] ss:$8 sps:$4 sm:$0xff]  }
 0x913   :  { %5822 = vmatprep.mubr.msk.bf16.mxu0 %vm134_vm1, %v9190_v58  ;;  %v8058_v58 = vld [vmem:[%s8987_s1 + $0x34] ss:$8 sps:$4 sm:$0xff]  }
 0x91a   :  { %5823 = vmatmul.mubr.msk.bf16.gmra.mrb[224].mxu0 %vm134_vm1, %v9191_v43  ;;  %v8064_v43 = vld [vmem:[%s8987_s1 + $0x30] ss:$8 sps:$4 sm:$0xff]  }
 0x91b   :  { %5826 = vmatprep.mubr.msk.bf16.mxu0 %vm134_vm1, %v9192_v22  ;;  %v8070_v22 = vld [vmem:[%s8987_s1 + $0x44] ss:$8 sps:$4 sm:$0xff]  }
 0x922   :  { %5827 = vmatmul.mubr.msk.bf16.gmra.mrb[228].mxu0 %vm134_vm1, %v9193_v49  ;;  %v8076_v49 = vld [vmem:[%s8987_s1 + $0x40] ss:$8 sps:$4 sm:$0xff]  }
 0x923   :  { %5830 = vmatprep.mubr.msk.bf16.mxu0 %vm134_vm1, %v9194_v9  ;;  %v8083_v9 = vld [vmem:[%s8987_s1 + $0x50] ss:$8 sps:$4 sm:$0xff]  }
 0x92a   :  { %5831 = vmatmul.mubr.msk.bf16.gmra.mrb[232].mxu0 %vm134_vm1, %v9195_v40  ;;  %v8089_v40 = vld [vmem:[%s8987_s1 + $0x64] ss:$8 sps:$4 sm:$0xff]  }
 0x92b   :  { %5834 = vmatprep.mubr.msk.bf16.mxu0 %vm134_vm1, %v9196_v30  ;;  %v8095_v30 = vld [vmem:[%s8987_s1 + $0x60] ss:$8 sps:$4 sm:$0xff]  }
 0x932   :  { %5835 = vmatmul.mubr.msk.bf16.gmra.mrb[236].mxu0 %vm134_vm1, %v9197_v25  ;;  %v8107_v25 = vld [vmem:[%s8987_s1 + $0x70] ss:$8 sps:$4 sm:$0xff]  }
 0x933   :  { %5838 = vmatprep.mubr.msk.bf16.mxu0 %vm134_vm1, %v9198_v42  ;;  %9200 = vst [vmem:[#allocation35_spill] sm:$0xff] %v8107_v25  ;;  %v8113_v42 = vld [vmem:[%s8987_s1 + $0x84] ss:$8 sps:$4 sm:$0xff]  }
 0x934   :  { %9201 = vst [vmem:[#allocation36_spill] sm:$0xff] %v8113_v42 }
 0x93a   :  { %5839 = vmatmul.mubr.msk.bf16.gmra.mrb[240].mxu0 %vm134_vm1, %v9199_v1  ;;  %v8119_v1 = vld [vmem:[%s8987_s1 + $0x80] ss:$8 sps:$4 sm:$0xff]  }
 0x93b   :  { %9202 = vst [vmem:[#allocation37_spill] sm:$0xff] %v8119_v1 }
 0x9d5   :  { %v7929_v20 = vpop.f32.mrb[212].mxu0 }
 0x9d6   :  { %v7931_v8 = vpop.f32.mrb[213].mxu0 }
 0x9d7   :  { %v7933_v23 = vpop.f32.mrb[214].mxu0 }
 0x9d8   :  { %v3067_v18 = vpack.c.bf16 %v7933_v23, %v7929_v20  ;;  %v7937_v7 = vpop.f32.mrb[215].mxu0 }
 0x9d9   :  { %v3066_v47 = vpack.c.bf16 %v7937_v7, %v7931_v8 }
 0x9dd   :  { %v7941_v34 = vpop.f32.mrb[216].mxu0 }
 0x9de   :  { %v7943_v31 = vpop.f32.mrb[217].mxu0 }
 0x9df   :  { %v7945_v37 = vpop.f32.mrb[218].mxu0 }
 0x9e0   :  { %v3069_v2 = vpack.c.bf16 %v7945_v37, %v7941_v34  ;;  %v7949_v21 = vpop.f32.mrb[219].mxu0 }
 0x9e1   :  { %v3068_v39 = vpack.c.bf16 %v7949_v21, %v7943_v31 }
 0x9e5   :  { %v7953_v13 = vpop.f32.mrb[220].mxu0 }
 0x9e6   :  { %v7955_v52 = vpop.f32.mrb[221].mxu0 }
 0x9e7   :  { %v7957_v55 = vpop.f32.mrb[222].mxu0 }
 0x9e8   :  { %v3071_v59 = vpack.c.bf16 %v7957_v55, %v7953_v13  ;;  %v7961_v50 = vpop.f32.mrb[223].mxu0 }
 0x9e9   :  { %v3070_v12 = vpack.c.bf16 %v7961_v50, %v7955_v52 }
 0x9ed   :  { %v7965_v44 = vpop.f32.mrb[224].mxu0 }
 0x9ee   :  { %v7967_v4 = vpop.f32.mrb[225].mxu0 }
 0x9ef   :  { %v7969_v33 = vpop.f32.mrb[226].mxu0 }
 0x9f0   :  { %v3073_v5 = vpack.c.bf16 %v7969_v33, %v7965_v44  ;;  %v7973_v57 = vpop.f32.mrb[227].mxu0 }
 0x9f1   :  { %v3072_v27 = vpack.c.bf16 %v7973_v57, %v7967_v4 }
 0x9f5   :  { %v7977_v15 = vpop.f32.mrb[228].mxu0 }
 0x9f6   :  { %v7979_v26 = vpop.f32.mrb[229].mxu0 }
 0x9f7   :  { %v7981_v11 = vpop.f32.mrb[230].mxu0 }
 0x9f8   :  { %v3075_v62 = vpack.c.bf16 %v7981_v11, %v7977_v15  ;;  %v7985_v16 = vpop.f32.mrb[231].mxu0 }
 0x9f9   :  { %v3074_v6 = vpack.c.bf16 %v7985_v16, %v7979_v26 }
 0x9fb   :  { %5324 = vmatprep.subr.bf16.mxu1 %v3074_v6  ;;  %v8176_v6 = vld [vmem:[%s8987_s1 + $0xd4] ss:$8 sps:$4 sm:$0xff]  }
 0x9fc   :  { %5325 = vmatpush3.bf16.msra.mxu1 %v3066_v47  ;;  %v8131_v47 = vld [vmem:[%s8987_s1 + $0x90] ss:$8 sps:$4 sm:$0xff]   ;;  %9211 = vst [vmem:[#allocation29_spill] sm:$0xff] %v8176_v6 }
 0x9fd   :  { %v7989_v41 = vpop.f32.mrb[232].mxu0  ;;  %5326 = vmatprep.subr.bf16.mxu1 %v3075_v62  ;;  %9204 = vst [vmem:[#allocation39_spill] sm:$0xff] %v8131_v47  ;;  %v6065_v62 = vld [vmem:[%s8985_s2 + $0x50] sm:$0xff]  }
 0x9fe   :  { %v7991_v61 = vpop.f32.mrb[233].mxu0  ;;  %5842 = vmatprep.subr.bf16.mxu0 %v6065_v62 }
 0x9ff   :  { %v7993_v28 = vpop.f32.mrb[234].mxu0  ;;  %5843 = vmatpush3.bf16.msra.mxu0 %v6065_v62  ;;  %v6162_v62 = vld [vmem:[%s8987_s1 + $0x4] ss:$8 sps:$4 sm:$0xff]  }
 0xa00   :  { %v3077_v36 = vpack.c.bf16 %v7993_v28, %v7989_v41  ;;  %v7997_v63 = vpop.f32.mrb[235].mxu0  ;;  %5327 = vmatpush3.bf16.msra.mxu1 %v3067_v18  ;;  %v8125_v18 = vld [vmem:[%s8987_s1 + $0x94] ss:$8 sps:$4 sm:$0xff]  }
 0xa01   :  { %v3076_v60 = vpack.c.bf16 %v7997_v63, %v7991_v61  ;;  %9203 = vst [vmem:[#allocation38_spill] sm:$0xff] %v8125_v18 }
 0xa03   :  { %5328 = vmatprep.subr.bf16.mxu1 %v3076_v60  ;;  %v8185_v60 = vld [vmem:[%s8987_s1 + $0xd0] ss:$8 sps:$4 sm:$0xff]  }
 0xa04   :  { %5329 = vmatpush3.bf16.msra.mxu1 %v3068_v39  ;;  %v8143_v39 = vld [vmem:[%s8987_s1 + $0xa0] ss:$8 sps:$4 sm:$0xff]   ;;  %9212 = vst [vmem:[#allocation18_spill] sm:$0xff] %v8185_v60 }
 0xa05   :  { %v8001_v38 = vpop.f32.mrb[236].mxu0  ;;  %5330 = vmatprep.subr.bf16.mxu1 %v3077_v36  ;;  %9206 = vst [vmem:[#allocation41_spill] sm:$0xff] %v8143_v39  ;;  %v6066_v36 = vld [vmem:[%s8985_s2 + $0x58] sm:$0xff]  }
 0xa06   :  { %v8003_v46 = vpop.f32.mrb[237].mxu0  ;;  %5844 = vmatprep.subr.bf16.mxu0 %v6066_v36 }
 0xa07   :  { %v8005_v48 = vpop.f32.mrb[238].mxu0  ;;  %5845 = vmatpush3.bf16.msra.mxu0 %v6066_v36 }
 0xa08   :  { %v3079_v17 = vpack.c.bf16 %v8005_v48, %v8001_v38  ;;  %v8009_v19 = vpop.f32.mrb[239].mxu0  ;;  %5331 = vmatpush3.bf16.msra.mxu1 %v3069_v2  ;;  %v8137_v2 = vld [vmem:[%s8987_s1 + $0xa4] ss:$8 sps:$4 sm:$0xff]  }
 0xa09   :  { %v3078_v0 = vpack.c.bf16 %v8009_v19, %v8003_v46  ;;  %9205 = vst [vmem:[#allocation40_spill] sm:$0xff] %v8137_v2 }
 0xa0b   :  { %5332 = vmatprep.subr.bf16.mxu1 %v3078_v0  ;;  %v8197_v0 = vld [vmem:[%s8987_s1 + $0xe0] ss:$8 sps:$4 sm:$0xff]  }
 0xa0c   :  { %5333 = vmatpush3.bf16.msra.mxu1 %v3070_v12  ;;  %v8155_v12 = vld [vmem:[%s8987_s1 + $0xb0] ss:$8 sps:$4 sm:$0xff]   ;;  %9214 = vst [vmem:[#allocation20_spill] sm:$0xff] %v8197_v0 }
 0xa0d   :  { %v8013_v24 = vpop.f32.mrb[240].mxu0  ;;  %5334 = vmatprep.subr.bf16.mxu1 %v3079_v17  ;;  %9208 = vst [vmem:[#allocation23_spill] sm:$0xff] %v8155_v12  ;;  %v8191_v17 = vld [vmem:[%s8987_s1 + $0xe4] ss:$8 sps:$4 sm:$0xff]  }
 0xa0e   :  { %v8015_v14 = vpop.f32.mrb[241].mxu0  ;;  %9213 = vst [vmem:[#allocation19_spill] sm:$0xff] %v8191_v17 }
 0xa0f   :  { %v8017_v53 = vpop.f32.mrb[242].mxu0 }
 0xa10   :  { %v3081_v54 = vpack.c.bf16 %v8017_v53, %v8013_v24  ;;  %v8021_v45 = vpop.f32.mrb[243].mxu0  ;;  %5335 = vmatpush3.bf16.msra.mxu1 %v3071_v59  ;;  %v8149_v59 = vld [vmem:[%s8987_s1 + $0xb4] ss:$8 sps:$4 sm:$0xff]  }
 0xa11   :  { %v3080_v32 = vpack.c.bf16 %v8021_v45, %v8015_v14  ;;  %9207 = vst [vmem:[#allocation42_spill] sm:$0xff] %v8149_v59 }
 0xa13   :  { %5336 = vmatprep.subr.bf16.mxu1 %v3080_v32  ;;  %v8209_v32 = vld [vmem:[%s8987_s1 + $0xf0] ss:$8 sps:$4 sm:$0xff]  }
 0xa14   :  { %5337 = vmatpush3.bf16.msra.mxu1 %v3072_v27  ;;  %v8167_v27 = vld [vmem:[%s8987_s1 + $0xc0] ss:$8 sps:$4 sm:$0xff]   ;;  %9216 = vst [vmem:[#allocation22_spill] sm:$0xff] %v8209_v32 }
 0xa15   :  { %5338 = vmatprep.subr.bf16.mxu1 %v3081_v54  ;;  %9210 = vst [vmem:[#allocation27_spill] sm:$0xff] %v8167_v27  ;;  %v8203_v54 = vld [vmem:[%s8987_s1 + $0xf4] ss:$8 sps:$4 sm:$0xff]  }
 0xa16   :  { %9215 = vst [vmem:[#allocation21_spill] sm:$0xff] %v8203_v54 }
 0xa18   :  { %5339 = vmatpush3.bf16.msra.mxu1 %v3073_v5  ;;  %v8161_v5 = vld [vmem:[%s8987_s1 + $0xc4] ss:$8 sps:$4 sm:$0xff]  }
 0xa19   :  { %9209 = vst [vmem:[#allocation25_spill] sm:$0xff] %v8161_v5 }
 0xa1b   :  { %3115 = vmatmul.mubr.bf16.vlgmr.msra.gmra.mrb[172].mxu1 %v8028_v56 }
 0xa1c   :  { %3122 = vmatprep.mubr.bf16.mxu1 %v8034_v10 }
 0xa23   :  { %3123 = vmatmul.mubr.bf16.gmra.mrb[176].mxu1 %v8040_v29 }
 0xa24   :  { %3130 = vmatprep.mubr.bf16.mxu1 %v8046_v35 }
 0xa2b   :  { %3131 = vmatmul.mubr.bf16.gmra.mrb[180].mxu1 %v8052_v51 }
 0xa2c   :  { %3138 = vmatprep.mubr.bf16.mxu1 %v8058_v58 }
 0xa33   :  { %3139 = vmatmul.mubr.bf16.gmra.mrb[184].mxu1 %v8064_v43 }
 0xa34   :  { %3146 = vmatprep.mubr.bf16.mxu1 %v8070_v22 }
 0xa3b   :  { %3147 = vmatmul.mubr.bf16.gmra.mrb[188].mxu1 %v8076_v49 }
 0xa3c   :  { %3154 = vmatprep.mubr.bf16.mxu1 %v7710_v3  ;;  %v8101_v3 = vld [vmem:[%s8987_s1 + $0x74] ss:$8 sps:$4 sm:$0xff]  }
 0xa43   :  { %3155 = vmatmul.mubr.bf16.gmra.mrb[192].mxu1 %v8083_v9 }
 0xa44   :  { %3162 = vmatprep.mubr.bf16.mxu1 %v8089_v40 }
 0xa4b   :  { %3163 = vmatmul.mubr.bf16.gmra.mrb[196].mxu1 %v8095_v30 }
 0xa4c   :  { %3170 = vmatprep.mubr.bf16.mxu1 %v8101_v3 }
 0xa53   :  { %3171 = vmatmul.mubr.bf16.gmra.mrb[200].mxu1 %v8107_v25 }
 0xa54   :  { %3178 = vmatprep.mubr.bf16.mxu1 %v8113_v42 }
 0xa5b   :  { %3179 = vmatmul.mubr.bf16.gmra.mrb[204].mxu1 %v8119_v1 }
 0xa5c   :  { %3186 = vmatprep.mubr.bf16.mxu1 %v8125_v18 }
 0xa63   :  { %3187 = vmatmul.mubr.bf16.gmra.mrb[208].mxu1 %v8131_v47 }
 0xa64   :  { %3194 = vmatprep.mubr.bf16.mxu1 %v8137_v2 }
 0xa6b   :  { %3195 = vmatmul.mubr.bf16.gmra.mrb[212].mxu1 %v8143_v39 }
 0xa6c   :  { %3202 = vmatprep.mubr.bf16.mxu1 %v8149_v59 }
 0xa73   :  { %3203 = vmatmul.mubr.bf16.gmra.mrb[216].mxu1 %v8155_v12 }
 0xa74   :  { %3210 = vmatprep.mubr.bf16.mxu1 %v8161_v5 }
 0xa7b   :  { %3211 = vmatmul.mubr.bf16.gmra.mrb[220].mxu1 %v8167_v27 }
 0xa7c   :  { %3218 = vmatprep.mubr.bf16.mxu1 %v8176_v6 }
 0xa83   :  { %3219 = vmatmul.mubr.bf16.gmra.mrb[224].mxu1 %v8185_v60 }
 0xa84   :  { %3226 = vmatprep.mubr.bf16.mxu1 %v8191_v17 }
 0xa8b   :  { %3227 = vmatmul.mubr.bf16.gmra.mrb[228].mxu1 %v8197_v0 }
 0xa8c   :  { %3234 = vmatprep.mubr.bf16.mxu1 %v8203_v54  ;;  %v8218_v54 = vld [vmem:[%s8988_s3 + $0x20] ss:$0 sm:$0xff] }
 0xa93   :  { %3235 = vmatmul.mubr.bf16.gmra.mrb[232].mxu1 %v8209_v32 }
 0xa94   :  { %3633 = vmatprep.mubr.bf16.mxu1 %v6162_v62 }
 0xaee   :  { %v5340_v36 = vpop.f32.mrb[172].mxu1 }
 0xaef   :  { %v5341_v0 = vpop.f32.mrb[173].mxu1 }
 0xaf0   :  { %v5342_v17 = vadd.f32 %v5341_v0, %v5340_v36  ;;  %v5343_v60 = vpop.f32.mrb[174].mxu1 }
 0xaf1   :  { %v5344_v6 = vpop.f32.mrb[175].mxu1 }
 0xaf2   :  { %v3243_v27 = vadd.f32 %v5342_v17, %v7931_v8  ;;  %v5345_v5 = vadd.f32 %v5344_v6, %v5343_v60 }
 0xaf4   :  { %v3280_v32 = vadd.f32 %v8218_v54, %v3243_v27  ;;  %v3244_v12 = vadd.f32 %v5345_v5, %v7937_v7 }
 0xaf6   :  { %v3281_v59 = vadd.f32 %v8218_v54, %v3244_v12  ;;  %v5346_v62 = vpop.f32.mrb[176].mxu1  ;;  %v3312_v2 = vmax.f32 %v3280_v32, 0.0 }
 0xaf7   :  { %v5347_v39 = vpop.f32.mrb[177].mxu1 }
 0xaf8   :  { %v3313_v0 = vmax.f32 %v3281_v59, 0.0  ;;  %v5348_v36 = vadd.f32 %v5347_v39, %v5346_v62  ;;  %v5349_v47 = vpop.f32.mrb[178].mxu1 }
 0xaf9   :  { %v5350_v18 = vpop.f32.mrb[179].mxu1 }
 0xafa   :  { %v3344_v1 = vpack.c.bf16 %v3313_v0, %v3312_v2  ;;  %v3245_v42 = vadd.f32 %v7929_v20, %v5348_v36  ;;  %v5351_v25 = vadd.f32 %v5350_v18, %v5349_v47 }
 0xafc   :  { %v3282_v8 = vadd.f32 %v8218_v54, %v3245_v42  ;;  %v3246_v6 = vadd.f32 %v7933_v23, %v5351_v25  ;;  %5846 = vmatprep.mubr.msk.bf16.mxu0 %vm850_vm2, %v3344_v1 }
 0xafe   :  { %v3283_v7 = vadd.f32 %v8218_v54, %v3246_v6  ;;  %v5352_v12 = vpop.f32.mrb[180].mxu1  ;;  %v3314_v27 = vmax.f32 %v3282_v8, 0.0 }
 0xaff   :  { %v5353_v5 = vpop.f32.mrb[181].mxu1 }
 0xb00   :  { %v3315_v60 = vmax.f32 %v3283_v7, 0.0  ;;  %v5354_v59 = vadd.f32 %v5353_v5, %v5352_v12  ;;  %v5355_v39 = vpop.f32.mrb[182].mxu1 }
 0xb01   :  { %v5356_v17 = vpop.f32.mrb[183].mxu1 }
 0xb02   :  { %v3345_v32 = vpack.c.bf16 %v3315_v60, %v3314_v27  ;;  %v3247_v2 = vadd.f32 %v5354_v59, %v7943_v31  ;;  %v5357_v20 = vadd.f32 %v5356_v17, %v5355_v39 }
 0xb04   :  { %v3284_v18 = vadd.f32 %v8218_v54, %v3247_v2  ;;  %v3248_v42 = vadd.f32 %v5357_v20, %v7949_v21  ;;  %5847 = vmatmul.mubr.msk.bf16.vlgmr.msra.gmra.mrb[244].mxu0 %vm850_vm2, %v3345_v32 }
 0xb06   :  { %v3285_v23 = vadd.f32 %v8218_v54, %v3248_v42  ;;  %v5358_v25 = vpop.f32.mrb[184].mxu1  ;;  %v3316_v47 = vmax.f32 %v3284_v18, 0.0 }
 0xb07   :  { %v5359_v1 = vpop.f32.mrb[185].mxu1 }
 0xb08   :  { %v3317_v62 = vmax.f32 %v3285_v23, 0.0  ;;  %v5360_v0 = vadd.f32 %v5359_v1, %v5358_v25  ;;  %v5361_v36 = vpop.f32.mrb[186].mxu1 }
 0xb09   :  { %v5362_v8 = vpop.f32.mrb[187].mxu1 }
 0xb0a   :  { %v3346_v6 = vpack.c.bf16 %v3317_v62, %v3316_v47  ;;  %v3249_v7 = vadd.f32 %v7941_v34, %v5360_v0  ;;  %v5363_v31 = vadd.f32 %v5362_v8, %v5361_v36 }
 0xb0c   :  { %v3286_v12 = vadd.f32 %v8218_v54, %v3249_v7  ;;  %v3250_v5 = vadd.f32 %v7945_v37, %v5363_v31  ;;  %5850 = vmatprep.mubr.msk.bf16.mxu0 %vm850_vm2, %v3346_v6 }
 0xb0e   :  { %v3287_v21 = vadd.f32 %v8218_v54, %v3250_v5  ;;  %v5364_v27 = vpop.f32.mrb[188].mxu1  ;;  %v3318_v59 = vmax.f32 %v3286_v12, 0.0 }
 0xb0f   :  { %v5365_v60 = vpop.f32.mrb[189].mxu1 }
 0xb10   :  { %v3319_v39 = vmax.f32 %v3287_v21, 0.0  ;;  %v5366_v17 = vadd.f32 %v5365_v60, %v5364_v27  ;;  %v5367_v32 = vpop.f32.mrb[190].mxu1 }
 0xb11   :  { %v5368_v2 = vpop.f32.mrb[191].mxu1 }
 0xb12   :  { %v3347_v20 = vpack.c.bf16 %v3319_v39, %v3318_v59  ;;  %v3251_v18 = vadd.f32 %v5366_v17, %v7955_v52  ;;  %v5369_v34 = vadd.f32 %v5368_v2, %v5367_v32 }
 0xb14   :  { %v3288_v42 = vadd.f32 %v8218_v54, %v3251_v18  ;;  %v3252_v23 = vadd.f32 %v5369_v34, %v7961_v50  ;;  %5851 = vmatmul.mubr.msk.bf16.gmra.mrb[248].mxu0 %vm850_vm2, %v3347_v20 }
 0xb16   :  { %v3289_v37 = vadd.f32 %v8218_v54, %v3252_v23  ;;  %v5370_v25 = vpop.f32.mrb[192].mxu1  ;;  %v3320_v47 = vmax.f32 %v3288_v42, 0.0 }
 0xb17   :  { %v5371_v1 = vpop.f32.mrb[193].mxu1 }
 0xb18   :  { %v3321_v62 = vmax.f32 %v3289_v37, 0.0  ;;  %v5372_v0 = vadd.f32 %v5371_v1, %v5370_v25  ;;  %v5373_v36 = vpop.f32.mrb[194].mxu1 }
 0xb19   :  { %v5374_v8 = vpop.f32.mrb[195].mxu1 }
 0xb1a   :  { %v3348_v6 = vpack.c.bf16 %v3321_v62, %v3320_v47  ;;  %v3253_v7 = vadd.f32 %v7953_v13, %v5372_v0  ;;  %v5375_v52 = vadd.f32 %v5374_v8, %v5373_v36 }
 0xb1c   :  { %v3290_v31 = vadd.f32 %v8218_v54, %v3253_v7  ;;  %v3254_v12 = vadd.f32 %v7957_v55, %v5375_v52  ;;  %5854 = vmatprep.mubr.msk.bf16.mxu0 %vm850_vm2, %v3348_v6 }
 0xb1e   :  { %v3291_v50 = vadd.f32 %v8218_v54, %v3254_v12  ;;  %v5376_v5 = vpop.f32.mrb[196].mxu1  ;;  %v3322_v27 = vmax.f32 %v3290_v31, 0.0 }
 0xb1f   :  { %v5377_v21 = vpop.f32.mrb[197].mxu1 }
 0xb20   :  { %v3323_v60 = vmax.f32 %v3291_v50, 0.0  ;;  %v5378_v59 = vadd.f32 %v5377_v21, %v5376_v5  ;;  %v5379_v39 = vpop.f32.mrb[198].mxu1 }
 0xb21   :  { %v5380_v17 = vpop.f32.mrb[199].mxu1 }
 0xb22   :  { %v3349_v32 = vpack.c.bf16 %v3323_v60, %v3322_v27  ;;  %v3255_v2 = vadd.f32 %v5378_v59, %v7967_v4  ;;  %v5381_v13 = vadd.f32 %v5380_v17, %v5379_v39 }
 0xb24   :  { %v3292_v20 = vadd.f32 %v8218_v54, %v3255_v2  ;;  %v3256_v18 = vadd.f32 %v5381_v13, %v7973_v57  ;;  %5855 = vmatmul.mubr.msk.bf16.gmra.mrb[252].mxu0 %vm850_vm2, %v3349_v32 }
 0xb26   :  { %v3293_v55 = vadd.f32 %v8218_v54, %v3256_v18  ;;  %v5382_v34 = vpop.f32.mrb[200].mxu1  ;;  %v3324_v23 = vmax.f32 %v3292_v20, 0.0 }
 0xb27   :  { %v5383_v42 = vpop.f32.mrb[201].mxu1 }
 0xb28   :  { %v3325_v37 = vmax.f32 %v3293_v55, 0.0  ;;  %v5384_v25 = vadd.f32 %v5383_v42, %v5382_v34  ;;  %v5385_v1 = vpop.f32.mrb[202].mxu1 }
 0xb29   :  { %v5386_v47 = vpop.f32.mrb[203].mxu1 }
 0xb2a   :  { %v3350_v62 = vpack.c.bf16 %v3325_v37, %v3324_v23  ;;  %v3257_v0 = vadd.f32 %v7965_v44, %v5384_v25  ;;  %v5387_v4 = vadd.f32 %v5386_v47, %v5385_v1 }
 0xb2c   :  { %v3294_v36 = vadd.f32 %v8218_v54, %v3257_v0  ;;  %v3258_v8 = vadd.f32 %v7969_v33, %v5387_v4  ;;  %5858 = vmatprep.mubr.msk.bf16.mxu0 %vm850_vm2, %v3350_v62 }
 0xb2e   :  { %v3295_v57 = vadd.f32 %v8218_v54, %v3258_v8  ;;  %v5388_v6 = vpop.f32.mrb[204].mxu1  ;;  %v3326_v52 = vmax.f32 %v3294_v36, 0.0 }
 0xb2f   :  { %v5389_v7 = vpop.f32.mrb[205].mxu1 }
 0xb30   :  { %v3327_v31 = vmax.f32 %v3295_v57, 0.0  ;;  %v5390_v12 = vadd.f32 %v5389_v7, %v5388_v6  ;;  %v5391_v50 = vpop.f32.mrb[206].mxu1 }
 0xb31   :  { %v5392_v5 = vpop.f32.mrb[207].mxu1 }
 0xb32   :  { %v3351_v21 = vpack.c.bf16 %v3327_v31, %v3326_v52  ;;  %v3259_v27 = vadd.f32 %v5390_v12, %v7979_v26  ;;  %v5393_v44 = vadd.f32 %v5392_v5, %v5391_v50 }
 0xb34   :  { %v3296_v60 = vadd.f32 %v8218_v54, %v3259_v27  ;;  %v3260_v59 = vadd.f32 %v5393_v44, %v7985_v16  ;;  %5859 = vmatmul.mubr.msk.bf16.gmra.mrb[0].mxu0 %vm850_vm2, %v3351_v21 }
 0xb36   :  { %v3297_v33 = vadd.f32 %v8218_v54, %v3260_v59  ;;  %v5394_v39 = vpop.f32.mrb[208].mxu1  ;;  %v3328_v32 = vmax.f32 %v3296_v60, 0.0 }
 0xb37   :  { %v5395_v17 = vpop.f32.mrb[209].mxu1 }
 0xb38   :  { %v3329_v2 = vmax.f32 %v3297_v33, 0.0  ;;  %v5396_v13 = vadd.f32 %v5395_v17, %v5394_v39  ;;  %v5397_v20 = vpop.f32.mrb[210].mxu1 }
 0xb39   :  { %v5398_v18 = vpop.f32.mrb[211].mxu1 }
 0xb3a   :  { %v3352_v55 = vpack.c.bf16 %v3329_v2, %v3328_v32  ;;  %v3261_v34 = vadd.f32 %v7977_v15, %v5396_v13  ;;  %v5399_v26 = vadd.f32 %v5398_v18, %v5397_v20 }
 0xb3c   :  { %v3298_v42 = vadd.f32 %v8218_v54, %v3261_v34  ;;  %v3262_v23 = vadd.f32 %v7981_v11, %v5399_v26  ;;  %5862 = vmatprep.mubr.msk.bf16.mxu0 %vm850_vm2, %v3352_v55 }
 0xb3e   :  { %v3299_v16 = vadd.f32 %v8218_v54, %v3262_v23  ;;  %v5400_v37 = vpop.f32.mrb[212].mxu1  ;;  %v3330_v1 = vmax.f32 %v3298_v42, 0.0 }
 0xb3f   :  { %v5401_v25 = vpop.f32.mrb[213].mxu1 }
 0xb40   :  { %v3331_v47 = vmax.f32 %v3299_v16, 0.0  ;;  %v5402_v62 = vadd.f32 %v5401_v25, %v5400_v37  ;;  %v5403_v0 = vpop.f32.mrb[214].mxu1 }
 0xb41   :  { %v5404_v4 = vpop.f32.mrb[215].mxu1 }
 0xb42   :  { %v3353_v36 = vpack.c.bf16 %v3331_v47, %v3330_v1  ;;  %v3263_v8 = vadd.f32 %v5402_v62, %v7991_v61  ;;  %v5405_v15 = vadd.f32 %v5404_v4, %v5403_v0 }
 0xb44   :  { %v3300_v57 = vadd.f32 %v8218_v54, %v3263_v8  ;;  %v3264_v6 = vadd.f32 %v5405_v15, %v7997_v63  ;;  %5863 = vmatmul.mubr.msk.bf16.gmra.mrb[4].mxu0 %vm850_vm2, %v3353_v36 }
 0xb46   :  { %v3301_v11 = vadd.f32 %v8218_v54, %v3264_v6  ;;  %v5406_v7 = vpop.f32.mrb[216].mxu1  ;;  %v3332_v31 = vmax.f32 %v3300_v57, 0.0 }
 0xb47   :  { %v5407_v52 = vpop.f32.mrb[217].mxu1 }
 0xb48   :  { %v3333_v12 = vmax.f32 %v3301_v11, 0.0  ;;  %v5408_v50 = vadd.f32 %v5407_v52, %v5406_v7  ;;  %v5409_v5 = vpop.f32.mrb[218].mxu1 }
 0xb49   :  { %v5410_v21 = vpop.f32.mrb[219].mxu1 }
 0xb4a   :  { %v3354_v27 = vpack.c.bf16 %v3333_v12, %v3332_v31  ;;  %v3265_v44 = vadd.f32 %v7989_v41, %v5408_v50  ;;  %v5411_v61 = vadd.f32 %v5410_v21, %v5409_v5 }
 0xb4c   :  { %v3302_v60 = vadd.f32 %v8218_v54, %v3265_v44  ;;  %v3266_v59 = vadd.f32 %v7993_v28, %v5411_v61  ;;  %5866 = vmatprep.mubr.msk.bf16.mxu0 %vm850_vm2, %v3354_v27 }
 0xb4e   :  { %v3303_v63 = vadd.f32 %v8218_v54, %v3266_v59  ;;  %v5412_v33 = vpop.f32.mrb[220].mxu1  ;;  %v3334_v17 = vmax.f32 %v3302_v60, 0.0 }
 0xb4f   :  { %v5413_v39 = vpop.f32.mrb[221].mxu1 }
 0xb50   :  { %v3335_v32 = vmax.f32 %v3303_v63, 0.0  ;;  %v5414_v2 = vadd.f32 %v5413_v39, %v5412_v33  ;;  %v5415_v13 = vpop.f32.mrb[222].mxu1 }
 0xb51   :  { %v5416_v20 = vpop.f32.mrb[223].mxu1 }
 0xb52   :  { %v3355_v18 = vpack.c.bf16 %v3335_v32, %v3334_v17  ;;  %v3267_v55 = vadd.f32 %v5414_v2, %v8003_v46  ;;  %v5417_v41 = vadd.f32 %v5416_v20, %v5415_v13 }
 0xb54   :  { %v3304_v34 = vadd.f32 %v8218_v54, %v3267_v55  ;;  %v3268_v26 = vadd.f32 %v5417_v41, %v8009_v19  ;;  %5867 = vmatmul.mubr.msk.bf16.gmra.mrb[8].mxu0 %vm850_vm2, %v3355_v18 }
 0xb56   :  { %v3305_v28 = vadd.f32 %v8218_v54, %v3268_v26  ;;  %v5418_v42 = vpop.f32.mrb[224].mxu1  ;;  %v3336_v16 = vmax.f32 %v3304_v34, 0.0 }
 0xb57   :  { %v5419_v23 = vpop.f32.mrb[225].mxu1 }
 0xb58   :  { %v3337_v37 = vmax.f32 %v3305_v28, 0.0  ;;  %v5420_v25 = vadd.f32 %v5419_v23, %v5418_v42  ;;  %v5421_v1 = vpop.f32.mrb[226].mxu1 }
 0xb59   :  { %v5422_v47 = vpop.f32.mrb[227].mxu1 }
 0xb5a   :  { %v3356_v62 = vpack.c.bf16 %v3337_v37, %v3336_v16  ;;  %v3269_v0 = vadd.f32 %v8001_v38, %v5420_v25  ;;  %v5423_v46 = vadd.f32 %v5422_v47, %v5421_v1 }
 0xb5c   :  { %v3306_v4 = vadd.f32 %v8218_v54, %v3269_v0  ;;  %v3270_v36 = vadd.f32 %v8005_v48, %v5423_v46  ;;  %5870 = vmatprep.mubr.msk.bf16.mxu0 %vm850_vm2, %v3356_v62 }
 0xb5e   :  { %v3307_v19 = vadd.f32 %v8218_v54, %v3270_v36  ;;  %v5424_v8 = vpop.f32.mrb[228].mxu1  ;;  %v3338_v57 = vmax.f32 %v3306_v4, 0.0 }
 0xb5f   :  { %v5425_v15 = vpop.f32.mrb[229].mxu1 }
 0xb60   :  { %v3339_v6 = vmax.f32 %v3307_v19, 0.0  ;;  %v5426_v11 = vadd.f32 %v5425_v15, %v5424_v8  ;;  %v5427_v7 = vpop.f32.mrb[230].mxu1 }
 0xb61   :  { %v5428_v52 = vpop.f32.mrb[231].mxu1 }
 0xb62   :  { %v3357_v31 = vpack.c.bf16 %v3339_v6, %v3338_v57  ;;  %v3271_v12 = vadd.f32 %v5426_v11, %v8015_v14  ;;  %v5429_v38 = vadd.f32 %v5428_v52, %v5427_v7 }
 0xb64   :  { %v3308_v50 = vadd.f32 %v8218_v54, %v3271_v12  ;;  %v3272_v5 = vadd.f32 %v5429_v38, %v8021_v45  ;;  %5871 = vmatmul.mubr.msk.bf16.gmra.mrb[12].mxu0 %vm850_vm2, %v3357_v31 }
 0xb66   :  { %v3309_v48 = vadd.f32 %v8218_v54, %v3272_v5  ;;  %v5430_v21 = vpop.f32.mrb[232].mxu1  ;;  %v3340_v44 = vmax.f32 %v3308_v50, 0.0 }
 0xb67   :  { %v5431_v27 = vpop.f32.mrb[233].mxu1 }
 0xb68   :  { %v3341_v61 = vmax.f32 %v3309_v48, 0.0  ;;  %v5432_v60 = vadd.f32 %v5431_v27, %v5430_v21  ;;  %v5433_v59 = vpop.f32.mrb[234].mxu1 }
 0xb69   :  { %v5434_v63 = vpop.f32.mrb[235].mxu1 }
 0xb6a   :  { %v3358_v33 = vpack.c.bf16 %v3341_v61, %v3340_v44  ;;  %v3273_v39 = vadd.f32 %v8013_v24, %v5432_v60  ;;  %v5435_v14 = vadd.f32 %v5434_v63, %v5433_v59 }
 0xb6c   :  { %v3310_v17 = vadd.f32 %v8218_v54, %v3273_v39  ;;  %v3274_v32 = vadd.f32 %v8017_v53, %v5435_v14  ;;  %5874 = vmatprep.mubr.msk.bf16.mxu0 %vm850_vm2, %v3358_v33 }
 0xb6e   :  { %v3311_v45 = vadd.f32 %v8218_v54, %v3274_v32  ;;  %v3342_v2 = vmax.f32 %v3310_v17, 0.0 }
 0xb70   :  { %v3343_v13 = vmax.f32 %v3311_v45, 0.0 }
 0xb72   :  { %v3359_v20 = vpack.c.bf16 %v3343_v13, %v3342_v2  ;;  %v9229_v2 = vld [vmem:[#allocation18_spill] sm:$0xff]  ;;  %v9230_v13 = vld [vmem:[#allocation19_spill] sm:$0xff] }
 0xb74   :  { %5875 = vmatmul.mubr.msk.bf16.gmra.mrb[16].mxu0 %vm850_vm2, %v3359_v20  ;;  %v9231_v20 = vld [vmem:[#allocation20_spill] sm:$0xff] }
 0xbd7   :  { %v8300_v18 = vpop.f32.mrb[244].mxu0 }
 0xbd8   :  { %v8302_v55 = vpop.f32.mrb[245].mxu0 }
 0xbd9   :  { %v8304_v41 = vpop.f32.mrb[246].mxu0 }
 0xbda   :  { %v3586_v24 = vpack.c.bf16 %v8304_v41, %v8300_v18  ;;  %v8308_v34 = vpop.f32.mrb[247].mxu0 }
 0xbdb   :  { %v3585_v53 = vpack.c.bf16 %v8308_v34, %v8302_v55 }
 0xbe7   :  { %v8312_v54 = vpop.f32.mrb[248].mxu0 }
 0xbe8   :  { %v8314_v26 = vpop.f32.mrb[249].mxu0 }
 0xbe9   :  { %v8316_v28 = vpop.f32.mrb[250].mxu0 }
 0xbea   :  { %v3588_v42 = vpack.c.bf16 %v8316_v28, %v8312_v54  ;;  %v8320_v23 = vpop.f32.mrb[251].mxu0 }
 0xbeb   :  { %v3587_v16 = vpack.c.bf16 %v8320_v23, %v8314_v26 }
 0xbf7   :  { %v8324_v37 = vpop.f32.mrb[252].mxu0 }
 0xbf8   :  { %v8326_v25 = vpop.f32.mrb[253].mxu0 }
 0xbf9   :  { %v8328_v1 = vpop.f32.mrb[254].mxu0 }
 0xbfa   :  { %v3590_v47 = vpack.c.bf16 %v8328_v1, %v8324_v37  ;;  %v8332_v62 = vpop.f32.mrb[255].mxu0 }
 0xbfb   :  { %v3589_v0 = vpack.c.bf16 %v8332_v62, %v8326_v25 }
 0xc07   :  { %v8336_v46 = vpop.f32.mrb[0].mxu0 }
 0xc08   :  { %v8338_v4 = vpop.f32.mrb[1].mxu0 }
 0xc09   :  { %v8340_v36 = vpop.f32.mrb[2].mxu0 }
 0xc0a   :  { %v3592_v19 = vpack.c.bf16 %v8340_v36, %v8336_v46  ;;  %v8344_v8 = vpop.f32.mrb[3].mxu0 }
 0xc0b   :  { %v3591_v15 = vpack.c.bf16 %v8344_v8, %v8338_v4 }
 0xc17   :  { %v8348_v57 = vpop.f32.mrb[4].mxu0 }
 0xc18   :  { %v8350_v6 = vpop.f32.mrb[5].mxu0 }
 0xc19   :  { %v8352_v11 = vpop.f32.mrb[6].mxu0 }
 0xc1a   :  { %v3594_v7 = vpack.c.bf16 %v8352_v11, %v8348_v57  ;;  %v8356_v52 = vpop.f32.mrb[7].mxu0 }
 0xc1b   :  { %v3593_v31 = vpack.c.bf16 %v8356_v52, %v8350_v6 }
 0xc1d   :  { %5454 = vmatprep.subr.bf16.mxu1 %v3593_v31 }
 0xc1e   :  { %5455 = vmatpush3.bf16.msra.mxu1 %v3585_v53  ;;  %v9233_v53 = vld [vmem:[#allocation22_spill] sm:$0xff] }
 0xc1f   :  { %5456 = vmatprep.subr.bf16.mxu1 %v3594_v7 }
 0xc22   :  { %5457 = vmatpush3.bf16.msra.mxu1 %v3586_v24  ;;  %v9232_v24 = vld [vmem:[#allocation21_spill] sm:$0xff] }
 0xc27   :  { %v8360_v12 = vpop.f32.mrb[8].mxu0 }
 0xc28   :  { %v8362_v38 = vpop.f32.mrb[9].mxu0 }
 0xc29   :  { %v8364_v50 = vpop.f32.mrb[10].mxu0 }
 0xc2a   :  { %v3596_v5 = vpack.c.bf16 %v8364_v50, %v8360_v12  ;;  %v8368_v48 = vpop.f32.mrb[11].mxu0 }
 0xc2b   :  { %v3595_v21 = vpack.c.bf16 %v8368_v48, %v8362_v38 }
 0xc2d   :  { %5458 = vmatprep.subr.bf16.mxu1 %v3595_v21 }
 0xc2e   :  { %5459 = vmatpush3.bf16.msra.mxu1 %v3587_v16 }
 0xc2f   :  { %5460 = vmatprep.subr.bf16.mxu1 %v3596_v5 }
 0xc32   :  { %5461 = vmatpush3.bf16.msra.mxu1 %v3588_v42  ;;  %v8429_v42 = vpop.xlane.xlu0 %4365 }
 0xc36   :  { %v8431_v16 = vpop.xlane.xlu0 %4371 }
 0xc37   :  { %v8372_v27 = vpop.f32.mrb[12].mxu0 }
 0xc38   :  { %v8374_v44 = vpop.f32.mrb[13].mxu0 }
 0xc39   :  { %v8376_v61 = vpop.f32.mrb[14].mxu0 }
 0xc3a   :  { %v3598_v60 = vpack.c.bf16 %v8376_v61, %v8372_v27  ;;  %v8380_v59 = vpop.f32.mrb[15].mxu0 }
 0xc3b   :  { %v3597_v63 = vpack.c.bf16 %v8380_v59, %v8374_v44 }
 0xc3d   :  { %5462 = vmatprep.subr.bf16.mxu1 %v3597_v63 }
 0xc3e   :  { %5463 = vmatpush3.bf16.msra.mxu1 %v3589_v0  ;;  %v8435_v0 = vpop.xlane.xlu0 %4377 }
 0xc3f   :  { %5464 = vmatprep.subr.bf16.mxu1 %v3598_v60 }
 0xc42   :  { %5465 = vmatpush3.bf16.msra.mxu1 %v3590_v47  ;;  %v8433_v47 = vpop.xlane.xlu1 %4368 }
 0xc47   :  { %v8384_v33 = vpop.f32.mrb[16].mxu0 }
 0xc48   :  { %v8386_v39 = vpop.f32.mrb[17].mxu0 }
 0xc49   :  { %v8388_v14 = vpop.f32.mrb[18].mxu0 }
 0xc4a   :  { %v3600_v17 = vpack.c.bf16 %v8388_v14, %v8384_v33  ;;  %v8392_v32 = vpop.f32.mrb[19].mxu0 }
 0xc4b   :  { %v3599_v45 = vpack.c.bf16 %v8392_v32, %v8386_v39 }
 0xc4d   :  { %5466 = vmatprep.subr.bf16.mxu1 %v3599_v45 }
 0xc4e   :  { %5467 = vmatpush3.bf16.msra.mxu1 %v3591_v15  ;;  %v8439_v15 = vpop.xlane.xlu0 %4383 }
 0xc4f   :  { %5468 = vmatprep.subr.bf16.mxu1 %v3600_v17 }
 0xc52   :  { %5469 = vmatpush3.bf16.msra.mxu1 %v3592_v19  ;;  %v8437_v19 = vpop.xlane.xlu1 %4374  ;;  %v8443_v31 = vpop.xlane.xlu0 %4389 }
 0xc55   :  { %3634 = vmatmul.mubr.bf16.vlgmr.msra.gmra.mrb[236].mxu1 %v8028_v56  ;;  %v6163_v56 = vld [vmem:[%s8987_s1 + $0x54] ss:$8 sps:$4 sm:$0xff]  }
 0xc56   :  { %3641 = vmatprep.mubr.bf16.mxu1 %v8034_v10  ;;  %v9217_v10 = vld [vmem:[#allocation35_spill] sm:$0xff]  ;;  %v8441_v7 = vpop.xlane.xlu1 %4380  ;;  %v8447_v21 = vpop.xlane.xlu0 %4395 }
 0xc5a   :  { %v8445_v5 = vpop.xlane.xlu1 %4386  ;;  %v8451_v63 = vpop.xlane.xlu0 %4401 }
 0xc5d   :  { %3642 = vmatmul.mubr.bf16.gmra.mrb[240].mxu1 %v8040_v29  ;;  %v9218_v29 = vld [vmem:[#allocation36_spill] sm:$0xff] }
 0xc5e   :  { %3649 = vmatprep.mubr.bf16.mxu1 %v8046_v35  ;;  %v9219_v35 = vld [vmem:[#allocation37_spill] sm:$0xff]  ;;  %v8449_v60 = vpop.xlane.xlu1 %4392  ;;  %v8455_v45 = vpop.xlane.xlu0 %4407 }
 0xc5f   :  { %9234 = vst [vmem:[#allocation24_spill] sm:$0xff] %v8455_v45 }
 0xc62   :  { %v8453_v17 = vpop.xlane.xlu1 %4398 }
 0xc65   :  { %3650 = vmatmul.mubr.bf16.gmra.mrb[244].mxu1 %v8052_v51  ;;  %v9220_v51 = vld [vmem:[#allocation38_spill] sm:$0xff] }
 0xc66   :  { %3657 = vmatprep.mubr.bf16.mxu1 %v8058_v58  ;;  %v9221_v58 = vld [vmem:[#allocation39_spill] sm:$0xff] }
 0xc6d   :  { %3658 = vmatmul.mubr.bf16.gmra.mrb[248].mxu1 %v8064_v43  ;;  %v9222_v43 = vld [vmem:[#allocation40_spill] sm:$0xff] }
 0xc6e   :  { %3665 = vmatprep.mubr.bf16.mxu1 %v8070_v22  ;;  %v9223_v22 = vld [vmem:[#allocation41_spill] sm:$0xff] }
 0xc75   :  { %3666 = vmatmul.mubr.bf16.gmra.mrb[252].mxu1 %v8076_v49  ;;  %v9224_v49 = vld [vmem:[#allocation42_spill] sm:$0xff] }
 0xc76   :  { %3673 = vmatprep.mubr.bf16.mxu1 %v6163_v56  ;;  %v8457_v56 = vpop.xlane.xlu1 %4404 }
 0xc77   :  { %9235 = vst [vmem:[#allocation26_spill] sm:$0xff] %v8457_v56 }
 0xc7d   :  { %3674 = vmatmul.mubr.bf16.gmra.mrb[0].mxu1 %v8083_v9  ;;  %v9225_v9 = vld [vmem:[#allocation23_spill] sm:$0xff] }
 0xc7e   :  { %3681 = vmatprep.mubr.bf16.mxu1 %v8089_v40  ;;  %v9226_v40 = vld [vmem:[#allocation25_spill] sm:$0xff] }
 0xc85   :  { %3682 = vmatmul.mubr.bf16.gmra.mrb[4].mxu1 %v8095_v30  ;;  %v9227_v30 = vld [vmem:[#allocation27_spill] sm:$0xff] }
 0xc86   :  { %3689 = vmatprep.mubr.bf16.mxu1 %v8101_v3  ;;  %v9228_v3 = vld [vmem:[#allocation29_spill] sm:$0xff] }
 0xc8d   :  { %3690 = vmatmul.mubr.bf16.gmra.mrb[8].mxu1 %v9217_v10  ;;  %v8459_v10 = vpop.xlane.xlu0 %4413 }
 0xc8e   :  { %3697 = vmatprep.mubr.bf16.mxu1 %v9218_v29  ;;  %9236 = vst [vmem:[#allocation28_spill] sm:$0xff] %v8459_v10  ;;  %v8461_v29 = vpop.xlane.xlu1 %4410 }
 0xc8f   :  { %9237 = vst [vmem:[#allocation30_spill] sm:$0xff] %v8461_v29 }
 0xc95   :  { %3698 = vmatmul.mubr.bf16.gmra.mrb[12].mxu1 %v9219_v35  ;;  %v8463_v35 = vpop.xlane.xlu0 %4419 }
 0xc96   :  { %3705 = vmatprep.mubr.bf16.mxu1 %v9220_v51  ;;  %9238 = vst [vmem:[#allocation31_spill] sm:$0xff] %v8463_v35  ;;  %v8465_v51 = vpop.xlane.xlu1 %4416 }
 0xc97   :  { %9239 = vst [vmem:[#allocation32_spill] sm:$0xff] %v8465_v51 }
 0xc9d   :  { %3706 = vmatmul.mubr.bf16.gmra.mrb[16].mxu1 %v9221_v58  ;;  %v8467_v58 = vpop.xlane.xlu0 %4425 }
 0xc9e   :  { %3713 = vmatprep.mubr.bf16.mxu1 %v9222_v43  ;;  %9240 = vst [vmem:[#allocation33_spill] sm:$0xff] %v8467_v58  ;;  %v8469_v43 = vpop.xlane.xlu1 %4422 }
 0xc9f   :  { %9241 = vst [vmem:[#allocation34_spill] sm:$0xff] %v8469_v43 }
 0xca5   :  { %3714 = vmatmul.mubr.bf16.gmra.mrb[20].mxu1 %v9223_v22  ;;  %v8471_v22 = vpop.xlane.xlu0 %4431 }
 0xca6   :  { %3721 = vmatprep.mubr.bf16.mxu1 %v9224_v49  ;;  %9242 = vst [vmem:[#allocation2_spill] sm:$0xff] %v8471_v22 }
 0xca9   :  { %v8486_v22 = vpop.xlane.xlu0 %4437 }
 0xcaa   :  { %9244 = vst [vmem:[#allocation4_spill] sm:$0xff] %v8486_v22 }
 0xcad   :  { %3722 = vmatmul.mubr.bf16.gmra.mrb[24].mxu1 %v9225_v9  ;;  %v8473_v9 = vpop.xlane.xlu1 %4428 }
 0xcae   :  { %3729 = vmatprep.mubr.bf16.mxu1 %v9226_v40  ;;  %9243 = vst [vmem:[#allocation3_spill] sm:$0xff] %v8473_v9 }
 0xcb5   :  { %3730 = vmatmul.mubr.bf16.gmra.mrb[28].mxu1 %v9227_v30 }
 0xcb6   :  { %3737 = vmatprep.mubr.bf16.mxu1 %v9228_v3 }
 0xcbd   :  { %3738 = vmatmul.mubr.bf16.gmra.mrb[32].mxu1 %v9229_v2 }
 0xcbe   :  { %3745 = vmatprep.mubr.bf16.mxu1 %v9230_v13  ;;  %v8478_v13 = vld [vmem:[%s8988_s3 + $0x28] ss:$0 sm:$0xff] }
 0xcc5   :  { %3746 = vmatmul.mubr.bf16.gmra.mrb[36].mxu1 %v9231_v20 }
 0xcc6   :  { %3753 = vmatprep.mubr.bf16.mxu1 %v9232_v24 }
 0xccd   :  { %3754 = vmatmul.mubr.bf16.gmra.mrb[40].mxu1 %v9233_v53  ;;  %v8484_v53 = vld [vmem:[%s8989_s4] ss:$0 sm:$0xff] }
 0xd28   :  { %v5470_v49 = vpop.f32.mrb[236].mxu1 }
 0xd29   :  { %v5471_v40 = vpop.f32.mrb[237].mxu1 }
 0xd2a   :  { %v5472_v30 = vadd.f32 %v5471_v40, %v5470_v49  ;;  %v5473_v3 = vpop.f32.mrb[238].mxu1  ;;  %v8490_v40 = vpop.xlane.xlu1 %4434 }
 0xd2b   :  { %v5474_v2 = vpop.f32.mrb[239].mxu1  ;;  %9245 = vst [vmem:[#allocation5_spill] sm:$0xff] %v8490_v40 }
 0xd2c   :  { %v3762_v20 = vadd.f32 %v5472_v30, %v8302_v55  ;;  %v5475_v24 = vadd.f32 %v5474_v2, %v5473_v3 }
 0xd2e   :  { %v3763_v9 = vadd.f32 %v5475_v24, %v8308_v34  ;;  %v3799_v49 = vadd.f32 %v8478_v13, %v3762_v20  ;;  %v8496_v34 = vpop.xlane.xlu0 %4443  ;;  %v8499_v40 = vpop.xlane.xlu1 %4440 }
 0xd2f   :  { %9246 = vst [vmem:[#allocation6_spill] sm:$0xff] %v8496_v34  ;;  %9247 = vst [vmem:[#allocation7_spill] sm:$0xff] %v8499_v40 }
 0xd30   :  { %v5476_v58 = vpop.f32.mrb[240].mxu1  ;;  %v3836_v43 = vmul.f32 %v8484_v53, %v3799_v49  ;;  %v3800_v55 = vadd.f32 %v8478_v13, %v3763_v9 }
 0xd31   :  { %v5477_v30 = vpop.f32.mrb[241].mxu1 }
 0xd32   :  { %v5478_v3 = vadd.f32 %v5477_v30, %v5476_v58  ;;  %v5479_v2 = vpop.f32.mrb[242].mxu1  ;;  %v3869_v35 = vsel %vm3868_vm7, %v3836_v43, 0.0  ;;  %v3837_v51 = vmul.f32 %v8484_v53, %v3800_v55  ;;  %v8506_v10 = vpop.xlane.xlu0 %4449 }
 0xd33   :  { %v5480_v22 = vpop.f32.mrb[243].mxu1  ;;  %3870 = vadd.xlane.f32.xlu0 %v3869_v35  ;;  %9248 = vst [vmem:[#allocation8_spill] sm:$0xff] %v8506_v10 }
 0xd34   :  { %v3764_v20 = vadd.f32 %v8300_v18, %v5478_v3  ;;  %v5481_v24 = vadd.f32 %v5480_v22, %v5479_v2  ;;  %v3872_v9 = vsel %vm3868_vm7, %v3837_v51, 0.0 }
 0xd36   :  { %v3765_v49 = vadd.f32 %v8304_v41, %v5481_v24  ;;  %v3801_v58 = vadd.f32 %v8478_v13, %v3764_v20  ;;  %v8510_v41 = vpop.xlane.xlu1 %4446 }
 0xd37   :  { %3873 = vadd.xlane.f32.xlu0 %v3872_v9  ;;  %9249 = vst [vmem:[#allocation9_spill] sm:$0xff] %v8510_v41 }
 0xd38   :  { %v5482_v30 = vpop.f32.mrb[244].mxu1  ;;  %v3838_v43 = vmul.f32 %v8484_v53, %v3801_v58  ;;  %v3802_v55 = vadd.f32 %v8478_v13, %v3765_v49  ;;  %v8516_v58 = vpop.xlane.xlu0 %4168 }
 0xd39   :  { %v5483_v35 = vpop.f32.mrb[245].mxu1 }
 0xd3a   :  { %v5484_v34 = vadd.f32 %v5483_v35, %v5482_v30  ;;  %v5485_v18 = vpop.f32.mrb[246].mxu1  ;;  %v3875_v22 = vsel %vm3868_vm7, %v3838_v43, 0.0  ;;  %v3839_v3 = vmul.f32 %v8484_v53, %v3802_v55  ;;  %v8520_v35 = vpop.xlane.xlu1 %4452 }
 0xd3b   :  { %v5486_v51 = vpop.f32.mrb[247].mxu1  ;;  %3876 = vadd.xlane.f32.xlu1 %v3875_v22  ;;  %9250 = vst [vmem:[#allocation10_spill] sm:$0xff] %v8520_v35 }
 0xd3c   :  { %v3766_v2 = vadd.f32 %v5484_v34, %v8314_v26  ;;  %v5487_v20 = vadd.f32 %v5486_v51, %v5485_v18  ;;  %v3878_v9 = vsel %vm3868_vm7, %v3839_v3, 0.0  ;;  %v8524_v3 = vpop.xlane.xlu0 %4174 }
 0xd3e   :  { %v3803_v24 = vadd.f32 %v8478_v13, %v3766_v2  ;;  %v3767_v49 = vadd.f32 %v5487_v20, %v8320_v23 }
 0xd3f   :  { %3879 = vadd.xlane.f32.xlu1 %v3878_v9  ;;  %v8530_v9 = vpop.xlane.xlu1 %4171 }
 0xd40   :  { %v3804_v30 = vadd.f32 %v8478_v13, %v3767_v49  ;;  %v5488_v43 = vpop.f32.mrb[248].mxu1  ;;  %v3840_v55 = vmul.f32 %v8484_v53, %v3803_v24 }
 0xd41   :  { %v5489_v22 = vpop.f32.mrb[249].mxu1 }
 0xd42   :  { %v5490_v10 = vadd.f32 %v5489_v22, %v5488_v43  ;;  %v5491_v26 = vpop.f32.mrb[250].mxu1  ;;  %v3881_v34 = vsel %vm3868_vm7, %v3840_v55, 0.0  ;;  %v3841_v18 = vmul.f32 %v8484_v53, %v3804_v30  ;;  %v8532_v43 = vpop.xlane.xlu0 %4180 }
 0xd43   :  { %v5492_v23 = vpop.f32.mrb[251].mxu1  ;;  %3882 = vadd.xlane.f32.xlu0 %v3881_v34 }
 0xd44   :  { %v3768_v51 = vadd.f32 %v8312_v54, %v5490_v10  ;;  %v5493_v2 = vadd.f32 %v5492_v23, %v5491_v26  ;;  %v3884_v20 = vsel %vm3868_vm7, %v3841_v18, 0.0  ;;  %v8538_v18 = vpop.xlane.xlu1 %4177 }
 0xd45   :  { %3885 = vadd.xlane.f32.xlu1 %v3884_v20 }
 0xd46   :  { %v3805_v24 = vadd.f32 %v8478_v13, %v3768_v51  ;;  %v3769_v49 = vadd.f32 %v8316_v28, %v5493_v2  ;;  %v8540_v28 = vpop.xlane.xlu0 %4186 }
 0xd48   :  { %v3806_v30 = vadd.f32 %v8478_v13, %v3769_v49  ;;  %v5494_v55 = vpop.f32.mrb[252].mxu1  ;;  %v3842_v22 = vmul.f32 %v8484_v53, %v3805_v24 }
 0xd49   :  { %v5495_v34 = vpop.f32.mrb[253].mxu1 }
 0xd4a   :  { %v5496_v35 = vadd.f32 %v5495_v34, %v5494_v55  ;;  %v5497_v54 = vpop.f32.mrb[254].mxu1  ;;  %v3887_v10 = vsel %vm3868_vm7, %v3842_v22, 0.0  ;;  %v3843_v26 = vmul.f32 %v8484_v53, %v3806_v30  ;;  %v8546_v55 = vpop.xlane.xlu1 %4183 }
 0xd4b   :  { %v5498_v23 = vpop.f32.mrb[255].mxu1  ;;  %3888 = vadd.xlane.f32.xlu0 %v3887_v10  ;;  %v8548_v22 = vpop.xlane.xlu0 %4192 }
 0xd4c   :  { %v3770_v51 = vadd.f32 %v5496_v35, %v8326_v25  ;;  %v5499_v2 = vadd.f32 %v5498_v23, %v5497_v54  ;;  %v3890_v20 = vsel %vm3868_vm7, %v3843_v26, 0.0 }
 0xd4d   :  { %3891 = vadd.xlane.f32.xlu1 %v3890_v20 }
 0xd4e   :  { %v3807_v24 = vadd.f32 %v8478_v13, %v3770_v51  ;;  %v3771_v49 = vadd.f32 %v5499_v2, %v8332_v62  ;;  %v8554_v26 = vpop.xlane.xlu1 %4189 }
 0xd4f   :  { %v8556_v62 = vpop.xlane.xlu0 %4198 }
 0xd50   :  { %v3808_v30 = vadd.f32 %v8478_v13, %v3771_v49  ;;  %v5500_v34 = vpop.f32.mrb[0].mxu1  ;;  %v3844_v10 = vmul.f32 %v8484_v53, %v3807_v24 }
 0xd51   :  { %v5501_v41 = vpop.f32.mrb[1].mxu1 }
 0xd52   :  { %v5502_v40 = vadd.f32 %v5501_v41, %v5500_v34  ;;  %v5503_v25 = vpop.f32.mrb[2].mxu1  ;;  %v3893_v35 = vsel %vm3868_vm7, %v3844_v10, 0.0  ;;  %v3845_v54 = vmul.f32 %v8484_v53, %v3808_v30  ;;  %v8562_v49 = vpop.xlane.xlu1 %4195 }
 0xd53   :  { %v5504_v23 = vpop.f32.mrb[3].mxu1  ;;  %3894 = vadd.xlane.f32.xlu0 %v3893_v35  ;;  %v8564_v34 = vpop.xlane.xlu0 %4204 }
 0xd54   :  { %v3772_v51 = vadd.f32 %v8324_v37, %v5502_v40  ;;  %v5505_v2 = vadd.f32 %v5504_v23, %v5503_v25  ;;  %v3896_v20 = vsel %vm3868_vm7, %v3845_v54, 0.0 }
 0xd55   :  { %3897 = vadd.xlane.f32.xlu1 %v3896_v20 }
 0xd56   :  { %v3809_v24 = vadd.f32 %v8478_v13, %v3772_v51  ;;  %v3773_v41 = vadd.f32 %v8328_v1, %v5505_v2  ;;  %v8570_v54 = vpop.xlane.xlu1 %4201 }
 0xd57   :  { %v8572_v1 = vpop.xlane.xlu0 %4210 }
 0xd58   :  { %v3810_v30 = vadd.f32 %v8478_v13, %v3773_v41  ;;  %v5506_v10 = vpop.f32.mrb[4].mxu1  ;;  %v3846_v35 = vmul.f32 %v8484_v53, %v3809_v24  ;;  %9251 = vst [vmem:[#allocation11_spill] sm:$0xff] %v8572_v1 }
 0xd59   :  { %v5507_v29 = vpop.f32.mrb[5].mxu1 }
 0xd5a   :  { %v5508_v45 = vadd.f32 %v5507_v29, %v5506_v10  ;;  %v5509_v37 = vpop.f32.mrb[6].mxu1  ;;  %v3899_v40 = vsel %vm3868_vm7, %v3846_v35, 0.0  ;;  %v3847_v25 = vmul.f32 %v8484_v53, %v3810_v30  ;;  %v8578_v41 = vpop.xlane.xlu1 %4207 }
 0xd5b   :  { %v5510_v23 = vpop.f32.mrb[7].mxu1  ;;  %3900 = vadd.xlane.f32.xlu0 %v3899_v40  ;;  %v8580_v10 = vpop.xlane.xlu0 %4216 }
 0xd5c   :  { %v3774_v51 = vadd.f32 %v5508_v45, %v8338_v4  ;;  %v5511_v2 = vadd.f32 %v5510_v23, %v5509_v37  ;;  %v3902_v20 = vsel %vm3868_vm7, %v3847_v25, 0.0  ;;  %9252 = vst [vmem:[#allocation12_spill] sm:$0xff] %v8580_v10 }
 0xd5d   :  { %3903 = vadd.xlane.f32.xlu1 %v3902_v20 }
 0xd5e   :  { %v3811_v24 = vadd.f32 %v8478_v13, %v3774_v51  ;;  %v3775_v29 = vadd.f32 %v5511_v2, %v8344_v8  ;;  %v8586_v25 = vpop.xlane.xlu1 %4213 }
 0xd5f   :  { %v8588_v8 = vpop.xlane.xlu0 %4222 }
 0xd60   :  { %v3812_v30 = vadd.f32 %v8478_v13, %v3775_v29  ;;  %v5512_v35 = vpop.f32.mrb[8].mxu1  ;;  %v3848_v40 = vmul.f32 %v8484_v53, %v3811_v24  ;;  %9253 = vst [vmem:[#allocation13_spill] sm:$0xff] %v8588_v8 }
 0xd61   :  { %v5513_v1 = vpop.f32.mrb[9].mxu1 }
 0xd62   :  { %v5514_v56 = vadd.f32 %v5513_v1, %v5512_v35  ;;  %v5515_v4 = vpop.f32.mrb[10].mxu1  ;;  %v3905_v45 = vsel %vm3868_vm7, %v3848_v40, 0.0  ;;  %v3849_v37 = vmul.f32 %v8484_v53, %v3812_v30  ;;  %v8594_v29 = vpop.xlane.xlu1 %4219 }
 0xd63   :  { %v5516_v23 = vpop.f32.mrb[11].mxu1  ;;  %3906 = vadd.xlane.f32.xlu0 %v3905_v45  ;;  %9254 = vst [vmem:[#allocation14_spill] sm:$0xff] %v8594_v29  ;;  %v8596_v35 = vpop.xlane.xlu0 %4228 }
 0xd64   :  { %v3776_v51 = vadd.f32 %v8336_v46, %v5514_v56  ;;  %v5517_v2 = vadd.f32 %v5516_v23, %v5515_v4  ;;  %v3908_v20 = vsel %vm3868_vm7, %v3849_v37, 0.0  ;;  %9255 = vst [vmem:[#allocation15_spill] sm:$0xff] %v8596_v35 }
 0xd65   :  { %3909 = vadd.xlane.f32.xlu1 %v3908_v20 }
 0xd66   :  { %v3813_v24 = vadd.f32 %v8478_v13, %v3776_v51  ;;  %v3777_v1 = vadd.f32 %v8340_v36, %v5517_v2  ;;  %v8602_v37 = vpop.xlane.xlu1 %4225 }
 0xd67   :  { %9256 = vst [vmem:[#allocation16_spill] sm:$0xff] %v8602_v37  ;;  %v8604_v36 = vpop.xlane.xlu0 %4234 }
 0xd68   :  { %v3814_v30 = vadd.f32 %v8478_v13, %v3777_v1  ;;  %v5518_v40 = vpop.f32.mrb[12].mxu1  ;;  %v3850_v45 = vmul.f32 %v8484_v53, %v3813_v24  ;;  %9257 = vst [vmem:[#allocation17_spill] sm:$0xff] %v8604_v36 }
 0xd69   :  { %v5519_v8 = vpop.f32.mrb[13].mxu1 }
 0xd6a   :  { %v5520_v10 = vadd.f32 %v5519_v8, %v5518_v40  ;;  %v5521_v46 = vpop.f32.mrb[14].mxu1  ;;  %v3911_v56 = vsel %vm3868_vm7, %v3850_v45, 0.0  ;;  %v3851_v4 = vmul.f32 %v8484_v53, %v3814_v30  ;;  %v8610_v1 = vpop.xlane.xlu1 %4231 }
 0xd6b   :  { %v5522_v23 = vpop.f32.mrb[15].mxu1  ;;  %3912 = vadd.xlane.f32.xlu0 %v3911_v56  ;;  %9258 = vst [vmem:[#allocation35_spill] sm:$0xff] %v8610_v1  ;;  %v8612_v40 = vpop.xlane.xlu0 %4240 }
 0xd6c   :  { %v3778_v51 = vadd.f32 %v5520_v10, %v8350_v6  ;;  %v5523_v2 = vadd.f32 %v5522_v23, %v5521_v46  ;;  %v3914_v20 = vsel %vm3868_vm7, %v3851_v4, 0.0  ;;  %9259 = vst [vmem:[#allocation36_spill] sm:$0xff] %v8612_v40 }
 0xd6d   :  { %3915 = vadd.xlane.f32.xlu1 %v3914_v20 }
 0xd6e   :  { %v3815_v24 = vadd.f32 %v8478_v13, %v3778_v51  ;;  %v3779_v8 = vadd.f32 %v5523_v2, %v8356_v52  ;;  %v8618_v4 = vpop.xlane.xlu1 %4237 }
 0xd6f   :  { %9260 = vst [vmem:[#allocation37_spill] sm:$0xff] %v8618_v4  ;;  %v8620_v52 = vpop.xlane.xlu0 %4246 }
 0xd70   :  { %v3816_v30 = vadd.f32 %v8478_v13, %v3779_v8  ;;  %v5524_v45 = vpop.f32.mrb[16].mxu1  ;;  %v3852_v56 = vmul.f32 %v8484_v53, %v3815_v24  ;;  %9261 = vst [vmem:[#allocation38_spill] sm:$0xff] %v8620_v52 }
 0xd71   :  { %v5525_v36 = vpop.f32.mrb[17].mxu1 }
 0xd72   :  { %v5526_v35 = vadd.f32 %v5525_v36, %v5524_v45  ;;  %v5527_v6 = vpop.f32.mrb[18].mxu1  ;;  %v3917_v10 = vsel %vm3868_vm7, %v3852_v56, 0.0  ;;  %v3853_v46 = vmul.f32 %v8484_v53, %v3816_v30  ;;  %v8626_v8 = vpop.xlane.xlu1 %4243 }
 0xd73   :  { %v5528_v23 = vpop.f32.mrb[19].mxu1  ;;  %3918 = vadd.xlane.f32.xlu0 %v3917_v10  ;;  %9262 = vst [vmem:[#allocation39_spill] sm:$0xff] %v8626_v8  ;;  %v8628_v45 = vpop.xlane.xlu0 %4252 }
 0xd74   :  { %v3780_v51 = vadd.f32 %v8348_v57, %v5526_v35  ;;  %v5529_v2 = vadd.f32 %v5528_v23, %v5527_v6  ;;  %v3920_v20 = vsel %vm3868_vm7, %v3853_v46, 0.0  ;;  %9263 = vst [vmem:[#allocation40_spill] sm:$0xff] %v8628_v45 }
 0xd75   :  { %3921 = vadd.xlane.f32.xlu1 %v3920_v20 }
 0xd76   :  { %v3817_v24 = vadd.f32 %v8478_v13, %v3780_v51  ;;  %v3781_v36 = vadd.f32 %v8352_v11, %v5529_v2  ;;  %v8634_v46 = vpop.xlane.xlu1 %4249 }
 0xd77   :  { %9264 = vst [vmem:[#allocation41_spill] sm:$0xff] %v8634_v46  ;;  %v8636_v11 = vpop.xlane.xlu0 %4258 }
 0xd78   :  { %v3818_v30 = vadd.f32 %v8478_v13, %v3781_v36  ;;  %v5530_v56 = vpop.f32.mrb[20].mxu1  ;;  %v3854_v10 = vmul.f32 %v8484_v53, %v3817_v24  ;;  %9265 = vst [vmem:[#allocation42_spill] sm:$0xff] %v8636_v11 }
 0xd79   :  { %v5531_v52 = vpop.f32.mrb[21].mxu1 }
 0xd7a   :  { %v5532_v40 = vadd.f32 %v5531_v52, %v5530_v56  ;;  %v5533_v57 = vpop.f32.mrb[22].mxu1  ;;  %v3923_v35 = vsel %vm3868_vm7, %v3854_v10, 0.0  ;;  %v3855_v6 = vmul.f32 %v8484_v53, %v3818_v30  ;;  %v8642_v36 = vpop.xlane.xlu1 %4255 }
 0xd7b   :  { %v5534_v23 = vpop.f32.mrb[23].mxu1  ;;  %3924 = vadd.xlane.f32.xlu0 %v3923_v35  ;;  %9266 = vst [vmem:[#allocation23_spill] sm:$0xff] %v8642_v36  ;;  %v8644_v56 = vpop.xlane.xlu0 %4003 }
 0xd7c   :  { %v3782_v51 = vadd.f32 %v5532_v40, %v8362_v38  ;;  %v5535_v2 = vadd.f32 %v5534_v23, %v5533_v57  ;;  %v3926_v20 = vsel %vm3868_vm7, %v3855_v6, 0.0 }
 0xd7d   :  { %3927 = vadd.xlane.f32.xlu1 %v3926_v20 }
 0xd7e   :  { %v3819_v24 = vadd.f32 %v8478_v13, %v3782_v51  ;;  %v3783_v52 = vadd.f32 %v5535_v2, %v8368_v48  ;;  %v8650_v6 = vpop.xlane.xlu1 %4261 }
 0xd7f   :  { %9267 = vst [vmem:[#allocation25_spill] sm:$0xff] %v8650_v6  ;;  %v8652_v48 = vpop.xlane.xlu0 %4009 }
 0xd80   :  { %v3820_v30 = vadd.f32 %v8478_v13, %v3783_v52  ;;  %v5536_v10 = vpop.f32.mrb[24].mxu1  ;;  %v3856_v35 = vmul.f32 %v8484_v53, %v3819_v24 }
 0xd81   :  { %v5537_v11 = vpop.f32.mrb[25].mxu1 }
 0xd82   :  { %v5538_v45 = vadd.f32 %v5537_v11, %v5536_v10  ;;  %v5539_v38 = vpop.f32.mrb[26].mxu1  ;;  %v3929_v40 = vsel %vm3868_vm7, %v3856_v35, 0.0  ;;  %v3857_v57 = vmul.f32 %v8484_v53, %v3820_v30  ;;  %v8658_v52 = vpop.xlane.xlu1 %4006 }
 0xd83   :  { %v5540_v23 = vpop.f32.mrb[27].mxu1  ;;  %3930 = vadd.xlane.f32.xlu0 %v3929_v40  ;;  %v8660_v10 = vpop.xlane.xlu0 %4015 }
 0xd84   :  { %v3784_v51 = vadd.f32 %v8360_v12, %v5538_v45  ;;  %v5541_v2 = vadd.f32 %v5540_v23, %v5539_v38  ;;  %v3932_v20 = vsel %vm3868_vm7, %v3857_v57, 0.0 }
 0xd85   :  { %3933 = vadd.xlane.f32.xlu1 %v3932_v20 }
 0xd86   :  { %v3821_v24 = vadd.f32 %v8478_v13, %v3784_v51  ;;  %v3785_v11 = vadd.f32 %v8364_v50, %v5541_v2  ;;  %v8666_v57 = vpop.xlane.xlu1 %4012 }
 0xd87   :  { %v8668_v50 = vpop.xlane.xlu0 %4021 }
 0xd88   :  { %v3822_v30 = vadd.f32 %v8478_v13, %v3785_v11  ;;  %v5542_v35 = vpop.f32.mrb[28].mxu1  ;;  %v3858_v40 = vmul.f32 %v8484_v53, %v3821_v24 }
 0xd89   :  { %v5543_v6 = vpop.f32.mrb[29].mxu1 }
 0xd8a   :  { %v5544_v36 = vadd.f32 %v5543_v6, %v5542_v35  ;;  %v5545_v12 = vpop.f32.mrb[30].mxu1  ;;  %v3935_v45 = vsel %vm3868_vm7, %v3858_v40, 0.0  ;;  %v3859_v38 = vmul.f32 %v8484_v53, %v3822_v30  ;;  %v8674_v11 = vpop.xlane.xlu1 %4018 }
 0xd8b   :  { %v5546_v23 = vpop.f32.mrb[31].mxu1  ;;  %3936 = vadd.xlane.f32.xlu0 %v3935_v45  ;;  %v8676_v35 = vpop.xlane.xlu0 %4027 }
 0xd8c   :  { %v3786_v51 = vadd.f32 %v5544_v36, %v8374_v44  ;;  %v5547_v2 = vadd.f32 %v5546_v23, %v5545_v12  ;;  %v3938_v20 = vsel %vm3868_vm7, %v3859_v38, 0.0 }
 0xd8d   :  { %3939 = vadd.xlane.f32.xlu1 %v3938_v20 }
 0xd8e   :  { %v3823_v24 = vadd.f32 %v8478_v13, %v3786_v51  ;;  %v3787_v6 = vadd.f32 %v5547_v2, %v8380_v59  ;;  %v8682_v38 = vpop.xlane.xlu1 %4024 }
 0xd8f   :  { %v8684_v59 = vpop.xlane.xlu0 %4033 }
 0xd90   :  { %v3824_v30 = vadd.f32 %v8478_v13, %v3787_v6  ;;  %v5548_v40 = vpop.f32.mrb[32].mxu1  ;;  %v3860_v45 = vmul.f32 %v8484_v53, %v3823_v24 }
 0xd91   :  { %v5549_v46 = vpop.f32.mrb[33].mxu1 }
 0xd92   :  { %v5550_v8 = vadd.f32 %v5549_v46, %v5548_v40  ;;  %v5551_v44 = vpop.f32.mrb[34].mxu1  ;;  %v3941_v36 = vsel %vm3868_vm7, %v3860_v45, 0.0  ;;  %v3861_v12 = vmul.f32 %v8484_v53, %v3824_v30  ;;  %v8690_v6 = vpop.xlane.xlu1 %4030 }
 0xd93   :  { %v5552_v23 = vpop.f32.mrb[35].mxu1  ;;  %3942 = vadd.xlane.f32.xlu0 %v3941_v36  ;;  %v8692_v40 = vpop.xlane.xlu0 %4039 }
 0xd94   :  { %v3788_v51 = vadd.f32 %v8372_v27, %v5550_v8  ;;  %v5553_v2 = vadd.f32 %v5552_v23, %v5551_v44  ;;  %v3944_v20 = vsel %vm3868_vm7, %v3861_v12, 0.0 }
 0xd95   :  { %3945 = vadd.xlane.f32.xlu1 %v3944_v20 }
 0xd96   :  { %v3825_v24 = vadd.f32 %v8478_v13, %v3788_v51  ;;  %v3789_v46 = vadd.f32 %v8376_v61, %v5553_v2  ;;  %v8698_v12 = vpop.xlane.xlu1 %4036 }
 0xd97   :  { %v8700_v61 = vpop.xlane.xlu0 %4045 }
 0xd98   :  { %v3826_v30 = vadd.f32 %v8478_v13, %v3789_v46  ;;  %v5554_v45 = vpop.f32.mrb[36].mxu1  ;;  %v3862_v36 = vmul.f32 %v8484_v53, %v3825_v24 }
 0xd99   :  { %v5555_v4 = vpop.f32.mrb[37].mxu1 }
 0xd9a   :  { %v5556_v1 = vadd.f32 %v5555_v4, %v5554_v45  ;;  %v5557_v27 = vpop.f32.mrb[38].mxu1  ;;  %v3947_v8 = vsel %vm3868_vm7, %v3862_v36, 0.0  ;;  %v3863_v44 = vmul.f32 %v8484_v53, %v3826_v30  ;;  %v8706_v46 = vpop.xlane.xlu1 %4042 }
 0xd9b   :  { %v5558_v23 = vpop.f32.mrb[39].mxu1  ;;  %3948 = vadd.xlane.f32.xlu0 %v3947_v8  ;;  %v8708_v45 = vpop.xlane.xlu0 %4051 }
 0xd9c   :  { %v3790_v51 = vadd.f32 %v5556_v1, %v8386_v39  ;;  %v5559_v2 = vadd.f32 %v5558_v23, %v5557_v27  ;;  %v3950_v20 = vsel %vm3868_vm7, %v3863_v44, 0.0 }
 0xd9d   :  { %3951 = vadd.xlane.f32.xlu1 %v3950_v20 }
 0xd9e   :  { %v3827_v24 = vadd.f32 %v8478_v13, %v3790_v51  ;;  %v3791_v4 = vadd.f32 %v5559_v2, %v8392_v32  ;;  %v8714_v23 = vpop.xlane.xlu1 %4048 }
 0xd9f   :  { %v8716_v32 = vpop.xlane.xlu0 %4057 }
 0xda0   :  { %v3828_v30 = vadd.f32 %v8478_v13, %v3791_v4  ;;  %v5560_v36 = vpop.f32.mrb[40].mxu1  ;;  %v3864_v8 = vmul.f32 %v8484_v53, %v3827_v24 }
 0xda1   :  { %v5561_v37 = vpop.f32.mrb[41].mxu1 }
 0xda2   :  { %v5562_v29 = vadd.f32 %v5561_v37, %v5560_v36  ;;  %v5563_v39 = vpop.f32.mrb[42].mxu1  ;;  %v3953_v1 = vsel %vm3868_vm7, %v3864_v8, 0.0  ;;  %v3865_v27 = vmul.f32 %v8484_v53, %v3828_v30  ;;  %v6164_v37 = vld [vmem:[%s8986_s0 + $0x78] sm:$0xff]   ;;  %v8725_v8 = vpop.xlane.xlu1 %4054 }
 0xda3   :  { %v5564_v44 = vpop.f32.mrb[43].mxu1  ;;  %3954 = vadd.xlane.f32.xlu0 %v3953_v1  ;;  %v4325_v24 = vunpack.c.l.bf16 %v6164_v37  ;;  %v4326_v36 = vunpack.c.h.bf16 %v6164_v37  ;;  %v8727_v1 = vpop.xlane.xlu0 %4063 }
 0xda4   :  { %v3792_v51 = vadd.f32 %v8384_v33, %v5562_v29  ;;  %v5565_v2 = vadd.f32 %v5564_v44, %v5563_v39  ;;  %v3956_v20 = vsel %vm3868_vm7, %v3865_v27, 0.0  ;;  %v6165_v39 = vld [vmem:[%s8989_s4 + $0x18] ss:$0 sm:$0xff] }
 0xda5   :  { %3957 = vadd.xlane.f32.xlu1 %v3956_v20  ;;  %v4362_v27 = vmul.f32 %v6165_v39, %v4325_v24  ;;  %v4363_v20 = vmul.f32 %v6165_v39, %v4326_v36 }
 0xda6   :  { %v3829_v4 = vadd.f32 %v8478_v13, %v3792_v51  ;;  %v3793_v30 = vadd.f32 %v8388_v14, %v5565_v2  ;;  %v8736_v14 = vpop.xlane.xlu1 %4060 }
 0xda7   :  { %v8738_v2 = vpop.xlane.xlu0 %4069 }
 0xda8   :  { %v3830_v33 = vadd.f32 %v8478_v13, %v3793_v30  ;;  %v3866_v29 = vmul.f32 %v8484_v53, %v3829_v4  ;;  %v4454_v13 = vsel %vm134_vm1, %v4362_v27, 0.0  ;;  %v4457_v4 = vsel %vm134_vm1, %v4363_v20, 0.0 }
 0xdaa   :  { %v3959_v44 = vsel %vm3868_vm7, %v3866_v29, 0.0  ;;  %v3867_v51 = vmul.f32 %v8484_v53, %v3830_v33  ;;  %v8743_v30 = vpop.xlane.xlu1 %4066 }
 0xdab   :  { %3960 = vadd.xlane.f32.xlu0 %v3959_v44  ;;  %v8745_v24 = vpop.xlane.xlu0 %4075 }
 0xdac   :  { %v3962_v37 = vsel %vm3868_vm7, %v3867_v51, 0.0 }
 0xdad   :  { %3963 = vadd.xlane.f32.xlu1 %v3962_v37 }
 0xdae   :  { %v8747_v53 = vpop.xlane.xlu1 %4072 }
 0xdaf   :  { %4455 = vadd.xlane.f32.xlu0 %v4454_v13  ;;  %v8749_v36 = vpop.xlane.xlu0 %4081 }
 0xdb0   :  { %9268 = vst [vmem:[#allocation27_spill] sm:$0xff] %v8749_v36 }
 0xdb1   :  { %4458 = vadd.xlane.f32.xlu1 %v4457_v4 }
 0xdb2   :  { %v8751_v33 = vpop.xlane.xlu1 %4078 }
 0xdb3   :  { %9269 = vst [vmem:[#allocation29_spill] sm:$0xff] %v8751_v33  ;;  %v8753_v29 = vpop.xlane.xlu0 %4087 }
 0xdb6   :  { %v8755_v39 = vpop.xlane.xlu1 %4084 }
 0xdb7   :  { %v8757_v27 = vpop.xlane.xlu0 %4093 }
 0xdb8   :  { %9270 = vst [vmem:[#allocation18_spill] sm:$0xff] %v8757_v27 }
 0xdba   :  { %v8759_v44 = vpop.xlane.xlu1 %4090 }
 0xdbb   :  { %9271 = vst [vmem:[#allocation19_spill] sm:$0xff] %v8759_v44 }
 0xdbe   :  { %v8763_v13 = vpop.xlane.xlu1 %4096 }
 0xdc0   :  { %v3871_v51 = vpop.xlane.xlu0 %3870 }
 0xdc1   :  { %v4098_v20 = vadd.f32 %v8644_v56, %v3871_v51 }
 0xdc3   :  { %v4263_v37 = vadd.f32 %v8516_v58, %v4098_v20 }
 0xdc4   :  { %v3874_v4 = vpop.xlane.xlu0 %3873 }
 0xdc5   :  { %v4460_v36 = vadd.f32 %v8429_v42, %v4263_v37  ;;  %v4099_v33 = vadd.f32 %v8658_v52, %v3874_v4 }
 0xdc7   :  { %4493 = vst.msk [vmem:[%s8990_s5] sm:$0xff] %vm4492_vm8, %v4460_v36  ;;  %v4264_v27 = vadd.f32 %v8530_v9, %v4099_v33 }
 0xdc8   :  { %v3877_v44 = vpop.xlane.xlu1 %3876 }
 0xdc9   :  { %v4461_v56 = vadd.f32 %v8433_v47, %v4264_v27  ;;  %v4100_v58 = vadd.f32 %v8652_v48, %v3877_v44 }
 0xdcb   :  { %4494 = vst.msk [vmem:[%s8990_s5 + $0x8] sm:$0xff] %vm4492_vm8, %v4461_v56  ;;  %v4265_v42 = vadd.f32 %v8524_v3, %v4100_v58 }
 0xdcc   :  { %v3880_v52 = vpop.xlane.xlu1 %3879 }
 0xdcd   :  { %v4462_v51 = vadd.f32 %v8431_v16, %v4265_v42  ;;  %v4101_v20 = vadd.f32 %v8666_v57, %v3880_v52 }
 0xdcf   :  { %4495 = vst.msk [vmem:[%s8990_s5 + $0x10] sm:$0xff] %vm4492_vm8, %v4462_v51  ;;  %v4266_v47 = vadd.f32 %v8538_v18, %v4101_v20 }
 0xdd0   :  { %v3883_v9 = vpop.xlane.xlu0 %3882 }
 0xdd1   :  { %v4463_v48 = vadd.f32 %v8437_v19, %v4266_v47  ;;  %v4102_v36 = vadd.f32 %v8660_v10, %v3883_v9  ;;  %v9274_v47 = vld [vmem:[#allocation24_spill] sm:$0xff] }
 0xdd2   :  { %v3886_v33 = vpop.xlane.xlu1 %3885 }
 0xdd3   :  { %4496 = vst.msk [vmem:[%s8990_s5 + $0x18] sm:$0xff] %vm4492_vm8, %v4463_v48  ;;  %v4267_v16 = vadd.f32 %v8532_v43, %v4102_v36  ;;  %v4103_v3 = vadd.f32 %v8674_v11, %v3886_v33  ;;  %v9275_v36 = vld [vmem:[#allocation30_spill] sm:$0xff] }
 0xdd5   :  { %v4464_v57 = vadd.f32 %v8435_v0, %v4267_v16  ;;  %v4268_v27 = vadd.f32 %v8546_v55, %v4103_v3  ;;  %v9276_v3 = vld [vmem:[#allocation12_spill] sm:$0xff] }
 0xdd7   :  { %4497 = vst.msk [vmem:[%s8990_s5 + $0x20] sm:$0xff] %vm4492_vm8, %v4464_v57  ;;  %v4465_v19 = vadd.f32 %v8441_v7, %v4268_v27  ;;  %v9277_v27 = vld [vmem:[#allocation28_spill] sm:$0xff] }
 0xdd8   :  { %v3889_v18 = vpop.xlane.xlu0 %3888 }
 0xdd9   :  { %4498 = vst.msk [vmem:[%s8990_s5 + $0x28] sm:$0xff] %vm4492_vm8, %v4465_v19  ;;  %v4104_v43 = vadd.f32 %v8668_v50, %v3889_v18  ;;  %v9278_v18 = vld [vmem:[#allocation14_spill] sm:$0xff] }
 0xdda   :  { %v3892_v10 = vpop.xlane.xlu1 %3891 }
 0xddb   :  { %v4269_v0 = vadd.f32 %v8540_v28, %v4104_v43  ;;  %v4105_v55 = vadd.f32 %v8682_v38, %v3892_v10  ;;  %v9279_v10 = vld [vmem:[#allocation32_spill] sm:$0xff] }
 0xddd   :  { %v4466_v11 = vadd.f32 %v8439_v15, %v4269_v0  ;;  %v4270_v44 = vadd.f32 %v8554_v26, %v4105_v55 }
 0xddf   :  { %4499 = vst.msk [vmem:[%s8990_s5 + $0x30] sm:$0xff] %vm4492_vm8, %v4466_v11  ;;  %v4467_v7 = vadd.f32 %v8445_v5, %v4270_v44  ;;  %v9280_v11 = vld [vmem:[#allocation13_spill] sm:$0xff] }
 0xde0   :  { %v3895_v37 = vpop.xlane.xlu0 %3894 }
 0xde1   :  { %4500 = vst.msk [vmem:[%s8990_s5 + $0x38] sm:$0xff] %vm4492_vm8, %v4467_v7  ;;  %v4106_v28 = vadd.f32 %v8676_v35, %v3895_v37  ;;  %v9281_v37 = vld [vmem:[#allocation31_spill] sm:$0xff] }
 0xde2   :  { %v3898_v50 = vpop.xlane.xlu1 %3897 }
 0xde3   :  { %v4271_v15 = vadd.f32 %v8548_v22, %v4106_v28  ;;  %v4107_v26 = vadd.f32 %v8690_v6, %v3898_v50  ;;  %v9282_v50 = vld [vmem:[#allocation16_spill] sm:$0xff] }
 0xde5   :  { %v4468_v38 = vadd.f32 %v8443_v31, %v4271_v15  ;;  %v4272_v4 = vadd.f32 %v8562_v49, %v4107_v26  ;;  %v9283_v26 = vld [vmem:[#allocation34_spill] sm:$0xff] }
 0xde7   :  { %4501 = vst.msk [vmem:[%s8990_s5 + $0x40] sm:$0xff] %vm4492_vm8, %v4468_v38  ;;  %v4469_v5 = vadd.f32 %v8449_v60, %v4272_v4 }
 0xde8   :  { %v3901_v56 = vpop.xlane.xlu0 %3900 }
 0xde9   :  { %4502 = vst.msk [vmem:[%s8990_s5 + $0x48] sm:$0xff] %vm4492_vm8, %v4469_v5  ;;  %v4108_v22 = vadd.f32 %v8684_v59, %v3901_v56  ;;  %v9284_v5 = vld [vmem:[#allocation15_spill] sm:$0xff] }
 0xdea   :  { %v3904_v35 = vpop.xlane.xlu1 %3903 }
 0xdeb   :  { %v4273_v31 = vadd.f32 %v8556_v62, %v4108_v22  ;;  %v4109_v49 = vadd.f32 %v8698_v12, %v3904_v35  ;;  %v9285_v35 = vld [vmem:[#allocation33_spill] sm:$0xff] }
 0xded   :  { %v4470_v6 = vadd.f32 %v8447_v21, %v4273_v31  ;;  %v4274_v58 = vadd.f32 %v8570_v54, %v4109_v49  ;;  %v9286_v49 = vld [vmem:[#allocation35_spill] sm:$0xff] }
 0xdef   :  { %4503 = vst.msk [vmem:[%s8990_s5 + $0x50] sm:$0xff] %vm4492_vm8, %v4470_v6  ;;  %v4471_v60 = vadd.f32 %v8453_v17, %v4274_v58  ;;  %v9272_v17 = vld [vmem:[#allocation26_spill] sm:$0xff]  ;;  %v9287_v58 = vld [vmem:[#allocation3_spill] sm:$0xff] }
 0xdf0   :  { %v3907_v42 = vpop.xlane.xlu0 %3906 }
 0xdf1   :  { %4504 = vst.msk [vmem:[%s8990_s5 + $0x58] sm:$0xff] %vm4492_vm8, %v4471_v60  ;;  %v4110_v62 = vadd.f32 %v8692_v40, %v3907_v42 }
 0xdf2   :  { %v3910_v59 = vpop.xlane.xlu1 %3909 }
 0xdf3   :  { %v4275_v21 = vadd.f32 %v8564_v34, %v4110_v62  ;;  %v4111_v54 = vadd.f32 %v8706_v46, %v3910_v59  ;;  %v9273_v46 = vld [vmem:[#allocation11_spill] sm:$0xff]  ;;  %v9288_v62 = vld [vmem:[#allocation17_spill] sm:$0xff] }
 0xdf5   :  { %v4472_v12 = vadd.f32 %v8451_v63, %v4275_v21  ;;  %v4276_v52 = vadd.f32 %v8578_v41, %v4111_v54  ;;  %v9289_v54 = vld [vmem:[#allocation2_spill] sm:$0xff] }
 0xdf7   :  { %4505 = vst.msk [vmem:[%s8990_s5 + $0x60] sm:$0xff] %vm4492_vm8, %v4472_v12  ;;  %v4473_v51 = vadd.f32 %v9272_v17, %v4276_v52  ;;  %v9290_v52 = vld [vmem:[#allocation37_spill] sm:$0xff] }
 0xdf8   :  { %v3913_v20 = vpop.xlane.xlu0 %3912 }
 0xdf9   :  { %4506 = vst.msk [vmem:[%s8990_s5 + $0x68] sm:$0xff] %vm4492_vm8, %v4473_v51  ;;  %v4112_v34 = vadd.f32 %v8700_v61, %v3913_v20  ;;  %v9291_v51 = vld [vmem:[#allocation5_spill] sm:$0xff] }
 0xdfa   :  { %v3916_v40 = vpop.xlane.xlu1 %3915 }
 0xdfb   :  { %v4277_v63 = vadd.f32 %v9273_v46, %v4112_v34  ;;  %v4113_v41 = vadd.f32 %v8714_v23, %v3916_v40  ;;  %v9292_v40 = vld [vmem:[#allocation36_spill] sm:$0xff] }
 0xdfd   :  { %v4474_v9 = vadd.f32 %v9274_v47, %v4277_v63  ;;  %v4278_v48 = vadd.f32 %v8586_v25, %v4113_v41  ;;  %v9293_v63 = vld [vmem:[#allocation29_spill] sm:$0xff]  ;;  %v9294_v47 = vld [vmem:[#allocation4_spill] sm:$0xff] }
 0xdff   :  { %4507 = vst.msk [vmem:[%s8990_s5 + $0x70] sm:$0xff] %vm4492_vm8, %v4474_v9  ;;  %v4475_v33 = vadd.f32 %v9275_v36, %v4278_v48  ;;  %v9295_v48 = vld [vmem:[#allocation39_spill] sm:$0xff] }
 0xe00   :  { %v3919_v16 = vpop.xlane.xlu0 %3918 }
 0xe01   :  { %4508 = vst.msk [vmem:[%s8990_s5 + $0x78] sm:$0xff] %vm4492_vm8, %v4475_v33  ;;  %v4114_v61 = vadd.f32 %v8708_v45, %v3919_v16  ;;  %v9296_v33 = vld [vmem:[#allocation7_spill] sm:$0xff] }
 0xe02   :  { %v3922_v23 = vpop.xlane.xlu1 %3921 }
 0xe03   :  { %v4279_v57 = vadd.f32 %v9276_v3, %v4114_v61  ;;  %v4115_v25 = vadd.f32 %v8725_v8, %v3922_v23 }
 0xe05   :  { %v4476_v19 = vadd.f32 %v9277_v27, %v4279_v57  ;;  %v4280_v43 = vadd.f32 %v9278_v18, %v4115_v25  ;;  %v9298_v57 = vld [vmem:[#allocation38_spill] sm:$0xff] }
 0xe07   :  { %4509 = vst.msk [vmem:[%s8990_s5 + $0x80] sm:$0xff] %vm4492_vm8, %v4476_v19  ;;  %v4477_v0 = vadd.f32 %v9279_v10, %v4280_v43  ;;  %v9299_v19 = vld [vmem:[#allocation6_spill] sm:$0xff]  ;;  %v9300_v43 = vld [vmem:[#allocation41_spill] sm:$0xff] }
 0xe08   :  { %v3925_v55 = vpop.xlane.xlu0 %3924 }
 0xe09   :  { %4510 = vst.msk [vmem:[%s8990_s5 + $0x88] sm:$0xff] %vm4492_vm8, %v4477_v0  ;;  %v4116_v45 = vadd.f32 %v8716_v32, %v3925_v55  ;;  %v9301_v0 = vld [vmem:[#allocation9_spill] sm:$0xff] }
 0xe0a   :  { %v3928_v8 = vpop.xlane.xlu1 %3927 }
 0xe0b   :  { %v4281_v44 = vadd.f32 %v9280_v11, %v4116_v45  ;;  %v4117_v7 = vadd.f32 %v8736_v14, %v3928_v8  ;;  %v9302_v11 = vld [vmem:[#allocation40_spill] sm:$0xff] }
 0xe0d   :  { %v4478_v28 = vadd.f32 %v9281_v37, %v4281_v44  ;;  %v4282_v15 = vadd.f32 %v9282_v50, %v4117_v7  ;;  %v9303_v7 = vld [vmem:[#allocation19_spill] sm:$0xff] }
 0xe0f   :  { %4511 = vst.msk [vmem:[%s8990_s5 + $0x90] sm:$0xff] %vm4492_vm8, %v4478_v28  ;;  %v4479_v38 = vadd.f32 %v9283_v26, %v4282_v15  ;;  %v9304_v28 = vld [vmem:[#allocation8_spill] sm:$0xff]  ;;  %v9305_v15 = vld [vmem:[#allocation23_spill] sm:$0xff] }
 0xe10   :  { %v3931_v4 = vpop.xlane.xlu0 %3930 }
 0xe11   :  { %4512 = vst.msk [vmem:[%s8990_s5 + $0x98] sm:$0xff] %vm4492_vm8, %v4479_v38  ;;  %v4118_v32 = vadd.f32 %v8727_v1, %v3931_v4  ;;  %v9306_v38 = vld [vmem:[#allocation10_spill] sm:$0xff] }
 0xe12   :  { %v3934_v14 = vpop.xlane.xlu1 %3933 }
 0xe13   :  { %v4283_v56 = vadd.f32 %v9284_v5, %v4118_v32  ;;  %v4119_v22 = vadd.f32 %v8743_v30, %v3934_v14 }
 0xe15   :  { %v4480_v31 = vadd.f32 %v9285_v35, %v4283_v56  ;;  %v4284_v6 = vadd.f32 %v9286_v49, %v4119_v22  ;;  %v9308_v22 = vld [vmem:[#allocation42_spill] sm:$0xff] }
 0xe17   :  { %4513 = vst.msk [vmem:[%s8990_s5 + $0xa0] sm:$0xff] %vm4492_vm8, %v4480_v31  ;;  %v4481_v60 = vadd.f32 %v9287_v58, %v4284_v6  ;;  %v9309_v6 = vld [vmem:[#allocation25_spill] sm:$0xff] }
 0xe18   :  { %v3937_v42 = vpop.xlane.xlu0 %3936 }
 0xe19   :  { %4514 = vst.msk [vmem:[%s8990_s5 + $0xa8] sm:$0xff] %vm4492_vm8, %v4481_v60  ;;  %v4120_v1 = vadd.f32 %v8738_v2, %v3937_v42 }
 0xe1a   :  { %v3940_v30 = vpop.xlane.xlu1 %3939 }
 0xe1b   :  { %v4285_v59 = vadd.f32 %v9288_v62, %v4120_v1  ;;  %v4121_v21 = vadd.f32 %v8747_v53, %v3940_v30 }
 0xe1d   :  { %v4482_v12 = vadd.f32 %v9289_v54, %v4285_v59  ;;  %v4286_v17 = vadd.f32 %v9290_v52, %v4121_v21 }
 0xe1f   :  { %4515 = vst.msk [vmem:[%s8990_s5 + $0xb0] sm:$0xff] %vm4492_vm8, %v4482_v12  ;;  %v4483_v20 = vadd.f32 %v9291_v51, %v4286_v17 }
 0xe20   :  { %v3943_v34 = vpop.xlane.xlu0 %3942 }
 0xe21   :  { %4516 = vst.msk [vmem:[%s8990_s5 + $0xb8] sm:$0xff] %vm4492_vm8, %v4483_v20  ;;  %v4122_v2 = vadd.f32 %v8745_v24, %v3943_v34  ;;  %v9297_v24 = vld [vmem:[#allocation27_spill] sm:$0xff] }
 0xe22   :  { %v3946_v53 = vpop.xlane.xlu1 %3945 }
 0xe23   :  { %v4287_v46 = vadd.f32 %v9292_v40, %v4122_v2  ;;  %v4123_v41 = vadd.f32 %v9293_v63, %v3946_v53 }
 0xe25   :  { %v4484_v9 = vadd.f32 %v9294_v47, %v4287_v46  ;;  %v4288_v36 = vadd.f32 %v9295_v48, %v4123_v41 }
 0xe27   :  { %4517 = vst.msk [vmem:[%s8990_s5 + $0xc0] sm:$0xff] %vm4492_vm8, %v4484_v9  ;;  %v4485_v16 = vadd.f32 %v9296_v33, %v4288_v36 }
 0xe28   :  { %v3949_v61 = vpop.xlane.xlu0 %3948 }
 0xe29   :  { %4518 = vst.msk [vmem:[%s8990_s5 + $0xc8] sm:$0xff] %vm4492_vm8, %v4485_v16  ;;  %v4124_v23 = vadd.f32 %v9297_v24, %v3949_v61 }
 0xe2a   :  { %v3952_v3 = vpop.xlane.xlu1 %3951 }
 0xe2b   :  { %v4289_v25 = vadd.f32 %v9298_v57, %v4124_v23  ;;  %v4125_v27 = vadd.f32 %v8755_v39, %v3952_v3 }
 0xe2d   :  { %v4486_v18 = vadd.f32 %v9299_v19, %v4289_v25  ;;  %v4290_v10 = vadd.f32 %v9300_v43, %v4125_v27 }
 0xe2f   :  { %4519 = vst.msk [vmem:[%s8990_s5 + $0xd0] sm:$0xff] %vm4492_vm8, %v4486_v18  ;;  %v4487_v55 = vadd.f32 %v9301_v0, %v4290_v10 }
 0xe30   :  { %v3955_v45 = vpop.xlane.xlu0 %3954 }
 0xe31   :  { %4520 = vst.msk [vmem:[%s8990_s5 + $0xd8] sm:$0xff] %vm4492_vm8, %v4487_v55  ;;  %v4126_v8 = vadd.f32 %v8753_v29, %v3955_v45  ;;  %v9307_v29 = vld [vmem:[#allocation18_spill] sm:$0xff] }
 0xe32   :  { %v3958_v39 = vpop.xlane.xlu1 %3957 }
 0xe33   :  { %v4291_v44 = vadd.f32 %v9302_v11, %v4126_v8  ;;  %v4127_v37 = vadd.f32 %v9303_v7, %v3958_v39 }
 0xe35   :  { %v4488_v50 = vadd.f32 %v9304_v28, %v4291_v44  ;;  %v4292_v26 = vadd.f32 %v9305_v15, %v4127_v37 }
 0xe37   :  { %4521 = vst.msk [vmem:[%s8990_s5 + $0xe0] sm:$0xff] %vm4492_vm8, %v4488_v50  ;;  %v4489_v4 = vadd.f32 %v9306_v38, %v4292_v26 }
 0xe38   :  { %v3961_v32 = vpop.xlane.xlu0 %3960 }
 0xe39   :  { %4522 = vst.msk [vmem:[%s8990_s5 + $0xe8] sm:$0xff] %vm4492_vm8, %v4489_v4  ;;  %v4128_v14 = vadd.f32 %v9307_v29, %v3961_v32 }
 0xe3a   :  { %v3964_v5 = vpop.xlane.xlu1 %3963 }
 0xe3b   :  { %v4129_v56 = vadd.f32 %v8763_v13, %v3964_v5  ;;  %v4293_v35 = vadd.f32 %v9308_v22, %v4128_v14 }
 0xe3c   :  { %v4456_v31 = vpop.xlane.xlu0 %4455 }
 0xe3d   :  { %v4490_v49 = vadd.f32 %v4456_v31, %v4293_v35  ;;  %v4294_v58 = vadd.f32 %v9309_v6, %v4129_v56 }
 0xe3e   :  { %v4459_v60 = vpop.xlane.xlu1 %4458 }
 0xe3f   :  { %4523 = vst.msk [vmem:[%s8990_s5 + $0xf0] sm:$0xff] %vm4492_vm8, %v4490_v49  ;;  %v4491_v42 = vadd.f32 %v4459_v60, %v4294_v58 }
 0xe41   :  { %4524 = vst.msk [vmem:[%s8990_s5 + $0xf8] sm:$0xff] %vm4492_vm8, %v4491_v42 }

</bundles_post_ra>
